<compile_context>
chip_gen: v5e
topology: v5e:2x2
jax: 0.10.0
libtpu: 0.0.40
codegen_flags: <defaults>
</compile_context>

<pallas_src>
import functools

import numpy as np
import jax
import jax.numpy as jnp
from jax.experimental import pallas as pl
from jax.experimental.pallas import tpu as pltpu


# ---------------------------------------------------------------------------
# Activations
# ---------------------------------------------------------------------------
def _hardswish(v):
    return v * (jnp.clip(v + 3.0, 0.0, 6.0) * (1.0 / 6.0))


def _hardsigmoid(v):
    return jnp.clip(v + 3.0, 0.0, 6.0) * (1.0 / 6.0)


def _act(v, kind):
    if kind == "RE":
        return jnp.maximum(v, 0.0)
    return _hardswish(v)  # "HS"


# ---------------------------------------------------------------------------
# Fused InvertedResidual kernel: one batch element per grid step,
# layout = (channels on sublanes, flattened H*W on lanes)  == flattened NCHW.
# ---------------------------------------------------------------------------
def _inverted_residual_kernel(x_ref, cmask_ref, we_ref, be_ref, dw_ref, db_ref,
                              w1_ref, b1_ref, w2_ref, b2_ref, wp_ref, bp_ref,
                              out_ref, pad_ref,
                              *, wdim, ksize, pad_left, act, use_se,
                              use_connect, has_expand):
    # x_ref   : (1, Cin, HW)   f32
    # cmask   : (K, HW)        f32   per-column-offset validity masks {0,1}
    # we_ref  : (E, Cin)       bf16  1x1 expand weight (BN folded)
    # be_ref  : (E, 1)         f32
    # dw_ref  : (E, K*K)       f32   depthwise taps (BN folded)
    # db_ref  : (E, 1)         f32
    # w1_ref  : (E, R), b1_ref: (1, R)   SE squeeze
    # w2_ref  : (E, R), b2_ref: (E, 1)   SE excite
    # wp_ref  : (Cout, E)      bf16  1x1 project weight (BN folded)
    # bp_ref  : (Cout, 1)      f32
    # out_ref : (1, Cout, HW)  f32
    # pad_ref : VMEM (E, pad_left + HW + margin) f32   zero-padded line buffer
    E = dw_ref.shape[0]
    HW = x_ref.shape[2]
    K = ksize
    P = (K - 1) // 2
    W = wdim
    margin = P * (W + 1)

    # ---- conv1: 1x1 expand + folded BN + activation (MXU bf16, f32 acc) -----
    if has_expand:
        t = jnp.dot(we_ref[...], x_ref[0].astype(jnp.bfloat16),
                    preferred_element_type=jnp.float32)
        t = _act(t + be_ref[...], act)
    else:
        t = x_ref[0]                        # conv1 == nn.Sequential() (identity)

    # ---- conv2: KxK depthwise + folded BN + activation -----------------------
    # Single aligned dense store of t into the padded line buffer, then K*K
    # lane-shifted window loads.  Row out-of-range reads land in the zero
    # margin; column wraparound is masked with the precomputed cmask rows.
    if margin > 0:
        halo = jnp.zeros((E, margin), jnp.float32)
        pad_ref[:, pad_left - margin:pad_left] = halo
        pad_ref[:, pad_left + HW:pad_left + HW + margin] = halo
    pad_ref[:, pad_left:pad_left + HW] = t

    taps = dw_ref[...]                                        # (E, K*K) load once
    cmask = cmask_ref[...]                                    # (K, HW)
    parts = []                           # K independent partial accumulators (ILP)
    for di in range(K):
        part = None
        for dj in range(K):
            s = (di - P) * W + (dj - P)
            win = pad_ref[:, pad_left + s:pad_left + s + HW]  # (E, HW) dense vregs
            idx = di * K + dj
            term = win * taps[:, idx:idx + 1]
            if dj != P:                  # mask columns that wrapped across rows
                term = term * cmask[dj:dj + 1, :]
            part = term if part is None else part + term
        parts.append(part)
    acc = parts[0]
    for p in parts[1:]:
        acc = acc + p
    acc = _act(acc + db_ref[...], act)                        # (E, HW) f32

    # ---- squeeze-and-excitation (tiny: VPU muls + XLU reductions) ------------
    if use_se:
        pooled = jnp.mean(acc, axis=1, keepdims=True)                     # (E, 1)
        s1 = jnp.sum(w1_ref[...] * pooled, axis=0, keepdims=True)         # (1, R)
        s1 = jnp.maximum(s1 + b1_ref[...], 0.0)
        s2 = jnp.sum(w2_ref[...] * s1, axis=1, keepdims=True)             # (E, 1)
        s2 = _hardsigmoid(s2 + b2_ref[...])
        acc = acc * s2

    # ---- conv3: 1x1 project + folded BN (no activation) ----------------------
    y = jnp.dot(wp_ref[...], acc.astype(jnp.bfloat16),
                preferred_element_type=jnp.float32) + bp_ref[...]         # (Cout, HW)

    if use_connect:                      # static: stride == 1 and Cin == Cout
        y = y + x_ref[0]                 # re-read x here (short live range)

    out_ref[0] = y                       # lane-dense unmasked store


# ---------------------------------------------------------------------------
# Wrapper (PyTorch NCHW in/out; only reshapes, no transposes)
# ---------------------------------------------------------------------------
def inverted_residual_forward(params, x_nchw, *, kernel_size=3, stride=1,
                              use_se=True, use_hs="HS"):
    if stride != 1:
        # TODO(synk): stride=2 depthwise (strided output sub-sampling, no residual).
        raise NotImplementedError("stride != 1 is not supported by this kernel")
    assert kernel_size % 2 == 1, "even kernel sizes (asymmetric padding) unsupported"
    assert use_hs in ("HS", "RE")

    N, Cin, H, W = x_nchw.shape
    E = params["dw"].shape[0]
    Cout = params["wp"].shape[0]
    HW = H * W
    K = kernel_size
    P = (K - 1) // 2
    margin = P * (W + 1)
    pad_left = ((margin + 127) // 128) * 128          # 128-lane-aligned interior
    has_expand = (Cin != E)
    use_connect = (stride == 1 and Cin == Cout)

    # NCHW -> (N, C, H*W): metadata-only reshape, lane-dense pallas blocks.
    x = x_nchw.reshape(N, Cin, HW).astype(jnp.float32)

    # Column-validity masks for each depthwise column offset (built host-side).
    j = np.arange(HW, dtype=np.int64) % W
    cmask_np = np.stack(
        [((j + (dj - P) >= 0) & (j + (dj - P) < W)).astype(np.float32)
         for dj in range(K)], axis=0)
    cmask = jnp.asarray(cmask_np)

    kern = functools.partial(_inverted_residual_kernel, wdim=W, ksize=K,
                             pad_left=pad_left, act=use_hs, use_se=use_se,
                             use_connect=use_connect, has_expand=has_expand)

    def _full(arr):
        return pl.BlockSpec(arr.shape, lambda n, nd=arr.ndim: (0,) * nd)

    out = pl.pallas_call(
        kern,
        out_shape=jax.ShapeDtypeStruct((N, Cout, HW), jnp.float32),
        grid=(N,),
        in_specs=[pl.BlockSpec((1, Cin, HW), lambda n: (n, 0, 0)),
                  _full(cmask),
                  _full(params["we"]), _full(params["be"]),
                  _full(params["dw"]), _full(params["db"]),
                  _full(params["se_w1"]), _full(params["se_b1"]),
                  _full(params["se_w2"]), _full(params["se_b2"]),
                  _full(params["wp"]), _full(params["bp"])],
        out_specs=pl.BlockSpec((1, Cout, HW), lambda n: (n, 0, 0)),
        scratch_shapes=[pltpu.VMEM((E, pad_left + HW + margin), jnp.float32)],
        compiler_params=pltpu.CompilerParams(
            dimension_semantics=("parallel",),          # batch axis -> megacore
            vmem_limit_bytes=48 * 1024 * 1024),         # v7x-safe (< 64 MiB phys)
    )(x, cmask, params["we"], params["be"], params["dw"], params["db"],
      params["se_w1"], params["se_b1"], params["se_w2"], params["se_b2"],
      params["wp"], params["bp"])

    return out.reshape(N, Cout, H, W)


# ---------------------------------------------------------------------------
# Parameter construction: synthetic conv + BatchNorm params, BN folded (eval)
# Weight orientations match PyTorch NCHW conv weights with 1x1 dims squeezed.
# ---------------------------------------------------------------------------
def init_inverted_residual_params(key, in_ch, expand_ch, out_ch,
                                  kernel_size=3, se_ratio=0.25, eps=1e-5):
    K = kernel_size
    r = max(1, int(round(expand_ch * se_ratio)))
    ks = jax.random.split(key, 10)

    def _bn(k, c):
        k1, k2, k3, k4 = jax.random.split(k, 4)
        gamma = 1.0 + 0.1 * jax.random.normal(k1, (c,), jnp.float32)
        beta = 0.1 * jax.random.normal(k2, (c,), jnp.float32)
        mean = 0.1 * jax.random.normal(k3, (c,), jnp.float32)
        var = jax.random.uniform(k4, (c,), jnp.float32, minval=0.5, maxval=1.5)
        return gamma, beta, mean, var

    def _fold(w, bn):                        # w: (C_out, ...) out-channel first
        gamma, beta, mean, var = bn
        scale = gamma * jax.lax.rsqrt(var + eps)
        return w * scale[:, None], beta - mean * scale

    # conv1: torch (E, Cin, 1, 1) -> (E, Cin)
    we, be = _fold(0.1 * jax.random.normal(ks[0], (expand_ch, in_ch), jnp.float32),
                   _bn(ks[1], expand_ch))
    # conv2 depthwise: torch (E, 1, K, K) -> (E, K*K)
    dw, db = _fold(0.1 * jax.random.normal(ks[2], (expand_ch, K * K), jnp.float32),
                   _bn(ks[3], expand_ch))
    # conv3: torch (Cout, E, 1, 1) -> (Cout, E)
    wp, bp = _fold(0.1 * jax.random.normal(ks[4], (out_ch, expand_ch), jnp.float32),
                   _bn(ks[5], out_ch))

    # SE: torch conv weights (R, E, 1, 1) and (E, R, 1, 1); both stored as (E, R).
    se_w1 = 0.1 * jax.random.normal(ks[6], (expand_ch, r), jnp.float32)    # = w1.T
    se_b1 = 0.1 * jax.random.normal(ks[7], (r,), jnp.float32)
    se_w2 = 0.1 * jax.random.normal(ks[8], (expand_ch, r), jnp.float32)
    se_b2 = 0.1 * jax.random.normal(ks[9], (expand_ch,), jnp.float32)

    return {
        "we": we.astype(jnp.bfloat16), "be": be.reshape(expand_ch, 1),
        "dw": dw, "db": db.reshape(expand_ch, 1),
        "se_w1": se_w1, "se_b1": se_b1.reshape(1, r),
        "se_w2": se_w2, "se_b2": se_b2.reshape(expand_ch, 1),
        "wp": wp.astype(jnp.bfloat16), "bp": bp.reshape(out_ch, 1),
    }


# ---------------------------------------------------------------------------
# Pure-JAX reference (same folded weights) for a numerical sanity check
# ---------------------------------------------------------------------------
def _reference_forward(params, x_nchw, *, kernel_size=3, stride=1,
                       use_se=True, use_hs="HS"):
    assert stride == 1
    act = (lambda v: jnp.maximum(v, 0.0)) if use_hs == "RE" else \
          (lambda v: v * jnp.clip(v + 3.0, 0.0, 6.0) / 6.0)
    x = x_nchw.astype(jnp.float32)
    N, Cin, H, W = x.shape
    E = params["dw"].shape[0]
    Cout = params["wp"].shape[0]
    K = kernel_size
    P = (K - 1) // 2

    we = params["we"].astype(jnp.float32)          # (E, Cin)
    wp = params["wp"].astype(jnp.float32)          # (Cout, E)

    if Cin != E:
        t = act(jnp.einsum("ec,nchw->nehw", we, x) + params["be"].reshape(1, E, 1, 1))
    else:
        t = x
    tp = jnp.pad(t, ((0, 0), (0, 0), (P, P), (P, P)))
    dw = params["dw"].reshape(E, K, K)
    acc = jnp.zeros((N, E, H, W), jnp.float32)
    for di in range(K):
        for dj in range(K):
            acc = acc + tp[:, :, di:di + H, dj:dj + W] * dw[:, di, dj][None, :, None, None]
    acc = act(acc + params["db"].reshape(1, E, 1, 1))
    if use_se:
        pooled = jnp.mean(acc, axis=(2, 3))                                    # (N, E)
        s1 = jnp.maximum(pooled @ params["se_w1"] + params["se_b1"], 0.0)      # (N, R)
        s2 = s1 @ params["se_w2"].T + params["se_b2"].reshape(1, E)            # (N, E)
        s2 = jnp.clip(s2 + 3.0, 0.0, 6.0) / 6.0
        acc = acc * s2[:, :, None, None]
    y = jnp.einsum("oe,nehw->nohw", wp, acc) + params["bp"].reshape(1, Cout, 1, 1)
    if stride == 1 and Cin == Cout:
        y = y + x
    return y


if __name__ == "__main__":
    key = jax.random.PRNGKey(0)
    k_x, k_p = jax.random.split(key)

    # MobileNetV3-ish block config: 16 -> expand 64 -> 16, k=3, s=1, SE + HS
    N, Cin, H, W = 4, 16, 16, 16
    expand_ch, Cout = 64, 16
    K, stride, use_se, use_hs = 3, 1, True, "HS"

    x = jax.random.normal(k_x, (N, Cin, H, W), jnp.float32)
    params = init_inverted_residual_params(k_p, Cin, expand_ch, Cout, K)

    fwd = jax.jit(functools.partial(inverted_residual_forward,
                                    kernel_size=K, stride=stride,
                                    use_se=use_se, use_hs=use_hs))
    out = jax.block_until_ready(fwd(params, x))

    assert out.shape == (N, Cout, H, W), out.shape
    assert bool(jnp.all(jnp.isfinite(out)))

    ref = _reference_forward(params, x, kernel_size=K, stride=stride,
                             use_se=use_se, use_hs=use_hs)
    err = float(jnp.max(jnp.abs(out - ref)))
    assert err < 1e-1, f"max abs err vs reference: {err}"

    print("KERNEL_OK")
</pallas_src>

<mosaic_0001>
module attributes {stable_mosaic.version = 11 : i64} {
  func.func @_inverted_residual_kernel(%arg0: i32, %arg1: memref<1x16x256xf32, #tpu.memory_space<vmem>>, %arg2: memref<3x256xf32, #tpu.memory_space<vmem>>, %arg3: memref<64x16xbf16, #tpu.memory_space<vmem>>, %arg4: memref<64x1xf32, #tpu.memory_space<vmem>>, %arg5: memref<64x9xf32, #tpu.memory_space<vmem>>, %arg6: memref<64x1xf32, #tpu.memory_space<vmem>>, %arg7: memref<64x16xf32, #tpu.memory_space<vmem>>, %arg8: memref<1x16xf32, #tpu.memory_space<vmem>>, %arg9: memref<64x16xf32, #tpu.memory_space<vmem>>, %arg10: memref<64x1xf32, #tpu.memory_space<vmem>>, %arg11: memref<16x64xbf16, #tpu.memory_space<vmem>>, %arg12: memref<16x1xf32, #tpu.memory_space<vmem>>, %arg13: memref<1x16x256xf32, #tpu.memory_space<vmem>>, %arg14: memref<64x401xf32, #tpu.memory_space<vmem>>) attributes {dimension_semantics = [#tpu.dimension_semantics<parallel>], iteration_bounds = array<i64: 4>, scalar_prefetch = 0 : i64, scratch_operands = 1 : i64, tpu.core_type = #tpu.core_type<tc>, window_params = [{transform_indices = @transform_0, window_bounds = array<i64: 1, 16, 256>}, {pipeline_mode = #tpu.pipeline_mode<synchronous>, transform_indices = @transform_1, window_bounds = array<i64: 3, 256>}, {pipeline_mode = #tpu.pipeline_mode<synchronous>, transform_indices = @transform_2, window_bounds = array<i64: 64, 16>}, {pipeline_mode = #tpu.pipeline_mode<synchronous>, transform_indices = @transform_3, window_bounds = array<i64: 64, 1>}, {pipeline_mode = #tpu.pipeline_mode<synchronous>, transform_indices = @transform_4, window_bounds = array<i64: 64, 9>}, {pipeline_mode = #tpu.pipeline_mode<synchronous>, transform_indices = @transform_5, window_bounds = array<i64: 64, 1>}, {pipeline_mode = #tpu.pipeline_mode<synchronous>, transform_indices = @transform_6, window_bounds = array<i64: 64, 16>}, {pipeline_mode = #tpu.pipeline_mode<synchronous>, transform_indices = @transform_7, window_bounds = array<i64: 1, 16>}, {pipeline_mode = #tpu.pipeline_mode<synchronous>, transform_indices = @transform_8, window_bounds = array<i64: 64, 16>}, {pipeline_mode = #tpu.pipeline_mode<synchronous>, transform_indices = @transform_9, window_bounds = array<i64: 64, 1>}, {pipeline_mode = #tpu.pipeline_mode<synchronous>, transform_indices = @transform_10, window_bounds = array<i64: 16, 64>}, {pipeline_mode = #tpu.pipeline_mode<synchronous>, transform_indices = @transform_11, window_bounds = array<i64: 16, 1>}, {transform_indices = @transform_12, window_bounds = array<i64: 1, 16, 256>}]} {
    %c0 = arith.constant 0 : index
    %c0_0 = arith.constant 0 : index
    %0 = vector.load %arg3[%c0, %c0_0] : memref<64x16xbf16, #tpu.memory_space<vmem>>, vector<64x16xbf16>
    %c0_1 = arith.constant 0 : index
    %c0_2 = arith.constant 0 : index
    %c0_3 = arith.constant 0 : index
    %1 = vector.load %arg1[%c0_1, %c0_2, %c0_3] : memref<1x16x256xf32, #tpu.memory_space<vmem>>, vector<1x16x256xf32>
    %2 = vector.shape_cast %1 : vector<1x16x256xf32> to vector<16x256xf32>
    %3 = arith.truncf %2 : vector<16x256xf32> to vector<16x256xbf16>
    %cst = arith.constant dense<0.000000e+00> : vector<64x256xf32>
    %4 = tpu.matmul %0, %3, %cst {dimension_numbers = #tpu.dot_dimension_numbers<[1], [0], [0], [1], [0, 0, 1, 1], [], []>} : vector<64x16xbf16>, vector<16x256xbf16>, vector<64x256xf32> -> vector<64x256xf32>
    %c0_4 = arith.constant 0 : index
    %c0_5 = arith.constant 0 : index
    %5 = vector.load %arg4[%c0_4, %c0_5] : memref<64x1xf32, #tpu.memory_space<vmem>>, vector<64x1xf32>
    %6 = vector.broadcast %5 : vector<64x1xf32> to vector<64x256xf32>
    %7 = arith.addf %4, %6 : vector<64x256xf32>
    %cst_6 = arith.constant 3.000000e+00 : f32
    %8 = vector.broadcast %cst_6 : f32 to vector<64x256xf32>
    %9 = arith.addf %7, %8 : vector<64x256xf32>
    %cst_7 = arith.constant 0.000000e+00 : f32
    %cst_8 = arith.constant 6.000000e+00 : f32
    %10 = vector.broadcast %cst_7 : f32 to vector<64x256xf32>
    %11 = arith.maximumf %10, %9 : vector<64x256xf32>
    %12 = vector.broadcast %cst_8 : f32 to vector<64x256xf32>
    %13 = arith.minimumf %12, %11 : vector<64x256xf32>
    %cst_9 = arith.constant 0.166666672 : f32
    %14 = vector.broadcast %cst_9 : f32 to vector<64x256xf32>
    %15 = arith.mulf %13, %14 : vector<64x256xf32>
    %16 = arith.mulf %7, %15 : vector<64x256xf32>
    %cst_10 = arith.constant 0.000000e+00 : f32
    %17 = vector.broadcast %cst_10 : f32 to vector<64x17xf32>
    %c0_11 = arith.constant 0 : index
    %c111 = arith.constant 111 : index
    %18 = vector.load %arg14[%c0_11, %c111] : memref<64x401xf32, #tpu.memory_space<vmem>>, vector<64x17xf32>
    tpu.vector_store %arg14[%c0_11, %c111], %17 {strides = array<i32>} : memref<64x401xf32, #tpu.memory_space<vmem>>, vector<64x17xf32>,
    %c0_12 = arith.constant 0 : index
    %c384 = arith.constant 384 : index
    %19 = vector.load %arg14[%c0_12, %c384] : memref<64x401xf32, #tpu.memory_space<vmem>>, vector<64x17xf32>
    tpu.vector_store %arg14[%c0_12, %c384], %17 {strides = array<i32>} : memref<64x401xf32, #tpu.memory_space<vmem>>, vector<64x17xf32>,
    %c0_13 = arith.constant 0 : index
    %c128 = arith.constant 128 : index
    %20 = vector.load %arg14[%c0_13, %c128] : memref<64x401xf32, #tpu.memory_space<vmem>>, vector<64x256xf32>
    tpu.vector_store %arg14[%c0_13, %c128], %16 {strides = array<i32>} : memref<64x401xf32, #tpu.memory_space<vmem>>, vector<64x256xf32>,
    %c0_14 = arith.constant 0 : index
    %c0_15 = arith.constant 0 : index
    %21 = vector.load %arg5[%c0_14, %c0_15] : memref<64x9xf32, #tpu.memory_space<vmem>>, vector<64x9xf32>
    %c0_16 = arith.constant 0 : index
    %c0_17 = arith.constant 0 : index
    %22 = vector.load %arg2[%c0_16, %c0_17] : memref<3x256xf32, #tpu.memory_space<vmem>>, vector<3x256xf32>
    %c0_18 = arith.constant 0 : index
    %c111_19 = arith.constant 111 : index
    %23 = vector.load %arg14[%c0_18, %c111_19] : memref<64x401xf32, #tpu.memory_space<vmem>>, vector<64x256xf32>
    %24 = vector.extract_strided_slice %21 {offsets = [0, 0], sizes = [64, 1], strides = [1, 1]} : vector<64x9xf32> to vector<64x1xf32>
    %25 = vector.broadcast %24 : vector<64x1xf32> to vector<64x256xf32>
    %26 = arith.mulf %23, %25 : vector<64x256xf32>
    %27 = vector.extract_strided_slice %22 {offsets = [0, 0], sizes = [1, 256], strides = [1, 1]} : vector<3x256xf32> to vector<1x256xf32>
    %28 = vector.broadcast %27 : vector<1x256xf32> to vector<64x256xf32>
    %29 = arith.mulf %26, %28 : vector<64x256xf32>
    %c0_20 = arith.constant 0 : index
    %c112 = arith.constant 112 : index
    %30 = vector.load %arg14[%c0_20, %c112] : memref<64x401xf32, #tpu.memory_space<vmem>>, vector<64x256xf32>
    %31 = vector.extract_strided_slice %21 {offsets = [0, 1], sizes = [64, 1], strides = [1, 1]} : vector<64x9xf32> to vector<64x1xf32>
    %32 = vector.broadcast %31 : vector<64x1xf32> to vector<64x256xf32>
    %33 = arith.mulf %30, %32 : vector<64x256xf32>
    %34 = arith.addf %29, %33 : vector<64x256xf32>
    %c0_21 = arith.constant 0 : index
    %c113 = arith.constant 113 : index
    %35 = vector.load %arg14[%c0_21, %c113] : memref<64x401xf32, #tpu.memory_space<vmem>>, vector<64x256xf32>
    %36 = vector.extract_strided_slice %21 {offsets = [0, 2], sizes = [64, 1], strides = [1, 1]} : vector<64x9xf32> to vector<64x1xf32>
    %37 = vector.broadcast %36 : vector<64x1xf32> to vector<64x256xf32>
    %38 = arith.mulf %35, %37 : vector<64x256xf32>
    %39 = vector.extract_strided_slice %22 {offsets = [2, 0], sizes = [1, 256], strides = [1, 1]} : vector<3x256xf32> to vector<1x256xf32>
    %40 = vector.broadcast %39 : vector<1x256xf32> to vector<64x256xf32>
    %41 = arith.mulf %38, %40 : vector<64x256xf32>
    %42 = arith.addf %34, %41 : vector<64x256xf32>
    %c0_22 = arith.constant 0 : index
    %c127 = arith.constant 127 : index
    %43 = vector.load %arg14[%c0_22, %c127] : memref<64x401xf32, #tpu.memory_space<vmem>>, vector<64x256xf32>
    %44 = vector.extract_strided_slice %21 {offsets = [0, 3], sizes = [64, 1], strides = [1, 1]} : vector<64x9xf32> to vector<64x1xf32>
    %45 = vector.broadcast %44 : vector<64x1xf32> to vector<64x256xf32>
    %46 = arith.mulf %43, %45 : vector<64x256xf32>
    %47 = vector.extract_strided_slice %22 {offsets = [0, 0], sizes = [1, 256], strides = [1, 1]} : vector<3x256xf32> to vector<1x256xf32>
    %48 = vector.broadcast %47 : vector<1x256xf32> to vector<64x256xf32>
    %49 = arith.mulf %46, %48 : vector<64x256xf32>
    %c0_23 = arith.constant 0 : index
    %c128_24 = arith.constant 128 : index
    %50 = vector.load %arg14[%c0_23, %c128_24] : memref<64x401xf32, #tpu.memory_space<vmem>>, vector<64x256xf32>
    %51 = vector.extract_strided_slice %21 {offsets = [0, 4], sizes = [64, 1], strides = [1, 1]} : vector<64x9xf32> to vector<64x1xf32>
    %52 = vector.broadcast %51 : vector<64x1xf32> to vector<64x256xf32>
    %53 = arith.mulf %50, %52 : vector<64x256xf32>
    %54 = arith.addf %49, %53 : vector<64x256xf32>
    %c0_25 = arith.constant 0 : index
    %c129 = arith.constant 129 : index
    %55 = vector.load %arg14[%c0_25, %c129] : memref<64x401xf32, #tpu.memory_space<vmem>>, vector<64x256xf32>
    %56 = vector.extract_strided_slice %21 {offsets = [0, 5], sizes = [64, 1], strides = [1, 1]} : vector<64x9xf32> to vector<64x1xf32>
    %57 = vector.broadcast %56 : vector<64x1xf32> to vector<64x256xf32>
    %58 = arith.mulf %55, %57 : vector<64x256xf32>
    %59 = vector.extract_strided_slice %22 {offsets = [2, 0], sizes = [1, 256], strides = [1, 1]} : vector<3x256xf32> to vector<1x256xf32>
    %60 = vector.broadcast %59 : vector<1x256xf32> to vector<64x256xf32>
    %61 = arith.mulf %58, %60 : vector<64x256xf32>
    %62 = arith.addf %54, %61 : vector<64x256xf32>
    %c0_26 = arith.constant 0 : index
    %c143 = arith.constant 143 : index
    %63 = vector.load %arg14[%c0_26, %c143] : memref<64x401xf32, #tpu.memory_space<vmem>>, vector<64x256xf32>
    %64 = vector.extract_strided_slice %21 {offsets = [0, 6], sizes = [64, 1], strides = [1, 1]} : vector<64x9xf32> to vector<64x1xf32>
    %65 = vector.broadcast %64 : vector<64x1xf32> to vector<64x256xf32>
    %66 = arith.mulf %63, %65 : vector<64x256xf32>
    %67 = vector.extract_strided_slice %22 {offsets = [0, 0], sizes = [1, 256], strides = [1, 1]} : vector<3x256xf32> to vector<1x256xf32>
    %68 = vector.broadcast %67 : vector<1x256xf32> to vector<64x256xf32>
    %69 = arith.mulf %66, %68 : vector<64x256xf32>
    %c0_27 = arith.constant 0 : index
    %c144 = arith.constant 144 : index
    %70 = vector.load %arg14[%c0_27, %c144] : memref<64x401xf32, #tpu.memory_space<vmem>>, vector<64x256xf32>
    %71 = vector.extract_strided_slice %21 {offsets = [0, 7], sizes = [64, 1], strides = [1, 1]} : vector<64x9xf32> to vector<64x1xf32>
    %72 = vector.broadcast %71 : vector<64x1xf32> to vector<64x256xf32>
    %73 = arith.mulf %70, %72 : vector<64x256xf32>
    %74 = arith.addf %69, %73 : vector<64x256xf32>
    %c0_28 = arith.constant 0 : index
    %c145 = arith.constant 145 : index
    %75 = vector.load %arg14[%c0_28, %c145] : memref<64x401xf32, #tpu.memory_space<vmem>>, vector<64x256xf32>
    %76 = vector.extract_strided_slice %21 {offsets = [0, 8], sizes = [64, 1], strides = [1, 1]} : vector<64x9xf32> to vector<64x1xf32>
    %77 = vector.broadcast %76 : vector<64x1xf32> to vector<64x256xf32>
    %78 = arith.mulf %75, %77 : vector<64x256xf32>
    %79 = vector.extract_strided_slice %22 {offsets = [2, 0], sizes = [1, 256], strides = [1, 1]} : vector<3x256xf32> to vector<1x256xf32>
    %80 = vector.broadcast %79 : vector<1x256xf32> to vector<64x256xf32>
    %81 = arith.mulf %78, %80 : vector<64x256xf32>
    %82 = arith.addf %74, %81 : vector<64x256xf32>
    %83 = arith.addf %42, %62 : vector<64x256xf32>
    %84 = arith.addf %83, %82 : vector<64x256xf32>
    %c0_29 = arith.constant 0 : index
    %c0_30 = arith.constant 0 : index
    %85 = vector.load %arg6[%c0_29, %c0_30] : memref<64x1xf32, #tpu.memory_space<vmem>>, vector<64x1xf32>
    %86 = vector.broadcast %85 : vector<64x1xf32> to vector<64x256xf32>
    %87 = arith.addf %84, %86 : vector<64x256xf32>
    %cst_31 = arith.constant 3.000000e+00 : f32
    %88 = vector.broadcast %cst_31 : f32 to vector<64x256xf32>
    %89 = arith.addf %87, %88 : vector<64x256xf32>
    %cst_32 = arith.constant 0.000000e+00 : f32
    %cst_33 = arith.constant 6.000000e+00 : f32
    %90 = vector.broadcast %cst_32 : f32 to vector<64x256xf32>
    %91 = arith.maximumf %90, %89 : vector<64x256xf32>
    %92 = vector.broadcast %cst_33 : f32 to vector<64x256xf32>
    %93 = arith.minimumf %92, %91 : vector<64x256xf32>
    %cst_34 = arith.constant 0.166666672 : f32
    %94 = vector.broadcast %cst_34 : f32 to vector<64x256xf32>
    %95 = arith.mulf %93, %94 : vector<64x256xf32>
    %96 = arith.mulf %87, %95 : vector<64x256xf32>
    %cst_35 = arith.constant dense<0.000000e+00> : vector<64xf32>
    %97 = vector.multi_reduction <add>, %96, %cst_35 [1] : vector<64x256xf32> to vector<64xf32>
    %98 = vector.shape_cast %97 : vector<64xf32> to vector<64x1xf32>
    %cst_36 = arith.constant 2.560000e+02 : f32
    %99 = vector.broadcast %cst_36 : f32 to vector<64x1xf32>
    %100 = arith.divf %98, %99 : vector<64x1xf32>
    %c0_37 = arith.constant 0 : index
    %c0_38 = arith.constant 0 : index
    %101 = vector.load %arg7[%c0_37, %c0_38] : memref<64x16xf32, #tpu.memory_space<vmem>>, vector<64x16xf32>
    %102 = vector.broadcast %100 : vector<64x1xf32> to vector<64x16xf32>
    %103 = arith.mulf %101, %102 : vector<64x16xf32>
    %cst_39 = arith.constant dense<0.000000e+00> : vector<16xf32>
    %104 = vector.multi_reduction <add>, %103, %cst_39 [0] : vector<64x16xf32> to vector<16xf32>
    %105 = vector.shape_cast %104 : vector<16xf32> to vector<1x16xf32>
    %c0_40 = arith.constant 0 : index
    %c0_41 = arith.constant 0 : index
    %106 = vector.load %arg8[%c0_40, %c0_41] : memref<1x16xf32, #tpu.memory_space<vmem>>, vector<1x16xf32>
    %107 = arith.addf %105, %106 : vector<1x16xf32>
    %cst_42 = arith.constant 0.000000e+00 : f32
    %108 = vector.broadcast %cst_42 : f32 to vector<1x16xf32>
    %109 = arith.maximumf %107, %108 : vector<1x16xf32>
    %c0_43 = arith.constant 0 : index
    %c0_44 = arith.constant 0 : index
    %110 = vector.load %arg9[%c0_43, %c0_44] : memref<64x16xf32, #tpu.memory_space<vmem>>, vector<64x16xf32>
    %111 = vector.broadcast %109 : vector<1x16xf32> to vector<64x16xf32>
    %112 = arith.mulf %110, %111 : vector<64x16xf32>
    %cst_45 = arith.constant dense<0.000000e+00> : vector<64xf32>
    %113 = vector.multi_reduction <add>, %112, %cst_45 [1] : vector<64x16xf32> to vector<64xf32>
    %114 = vector.shape_cast %113 : vector<64xf32> to vector<64x1xf32>
    %c0_46 = arith.constant 0 : index
    %c0_47 = arith.constant 0 : index
    %115 = vector.load %arg10[%c0_46, %c0_47] : memref<64x1xf32, #tpu.memory_space<vmem>>, vector<64x1xf32>
    %116 = arith.addf %114, %115 : vector<64x1xf32>
    %cst_48 = arith.constant 3.000000e+00 : f32
    %117 = vector.broadcast %cst_48 : f32 to vector<64x1xf32>
    %118 = arith.addf %116, %117 : vector<64x1xf32>
    %cst_49 = arith.constant 0.000000e+00 : f32
    %cst_50 = arith.constant 6.000000e+00 : f32
    %119 = vector.broadcast %cst_49 : f32 to vector<64x1xf32>
    %120 = arith.maximumf %119, %118 : vector<64x1xf32>
    %121 = vector.broadcast %cst_50 : f32 to vector<64x1xf32>
    %122 = arith.minimumf %121, %120 : vector<64x1xf32>
    %cst_51 = arith.constant 0.166666672 : f32
    %123 = vector.broadcast %cst_51 : f32 to vector<64x1xf32>
    %124 = arith.mulf %122, %123 : vector<64x1xf32>
    %125 = vector.broadcast %124 : vector<64x1xf32> to vector<64x256xf32>
    %126 = arith.mulf %96, %125 : vector<64x256xf32>
    %c0_52 = arith.constant 0 : index
    %c0_53 = arith.constant 0 : index
    %127 = vector.load %arg11[%c0_52, %c0_53] : memref<16x64xbf16, #tpu.memory_space<vmem>>, vector<16x64xbf16>
    %128 = arith.truncf %126 : vector<64x256xf32> to vector<64x256xbf16>
    %cst_54 = arith.constant dense<0.000000e+00> : vector<16x256xf32>
    %129 = tpu.matmul %127, %128, %cst_54 {dimension_numbers = #tpu.dot_dimension_numbers<[1], [0], [0], [1], [0, 0, 1, 1], [], []>} : vector<16x64xbf16>, vector<64x256xbf16>, vector<16x256xf32> -> vector<16x256xf32>
    %c0_55 = arith.constant 0 : index
    %c0_56 = arith.constant 0 : index
    %130 = vector.load %arg12[%c0_55, %c0_56] : memref<16x1xf32, #tpu.memory_space<vmem>>, vector<16x1xf32>
    %131 = vector.broadcast %130 : vector<16x1xf32> to vector<16x256xf32>
    %132 = arith.addf %129, %131 : vector<16x256xf32>
    %c0_57 = arith.constant 0 : index
    %c0_58 = arith.constant 0 : index
    %c0_59 = arith.constant 0 : index
    %133 = vector.load %arg1[%c0_57, %c0_58, %c0_59] : memref<1x16x256xf32, #tpu.memory_space<vmem>>, vector<1x16x256xf32>
    %134 = vector.shape_cast %133 : vector<1x16x256xf32> to vector<16x256xf32>
    %135 = arith.addf %132, %134 : vector<16x256xf32>
    %c0_60 = arith.constant 0 : index
    %c0_61 = arith.constant 0 : index
    %c0_62 = arith.constant 0 : index
    %136 = vector.load %arg13[%c0_60, %c0_61, %c0_62] : memref<1x16x256xf32, #tpu.memory_space<vmem>>, vector<1x16x256xf32>
    %137 = vector.shape_cast %136 : vector<1x16x256xf32> to vector<16x256xf32>
    %138 = vector.shape_cast %135 : vector<16x256xf32> to vector<1x16x256xf32>
    tpu.vector_store %arg13[%c0_60, %c0_61, %c0_62], %138 {strides = array<i32>} : memref<1x16x256xf32, #tpu.memory_space<vmem>>, vector<1x16x256xf32>,
    return
  }
  func.func @transform_0(%arg0: i32) -> (i32, i32, i32) {
    %c0_i32 = arith.constant 0 : i32
    %c0_i32_0 = arith.constant 0 : i32
    %c0_i32_1 = arith.constant 0 : i32
    return %arg0, %c0_i32, %c0_i32_0 : i32, i32, i32
  }
  func.func @transform_1(%arg0: i32) -> (i32, i32) {
    %c0_i32 = arith.constant 0 : i32
    %c0_i32_0 = arith.constant 0 : i32
    %c0_i32_1 = arith.constant 0 : i32
    return %c0_i32, %c0_i32_0 : i32, i32
  }
  func.func @transform_2(%arg0: i32) -> (i32, i32) {
    %c0_i32 = arith.constant 0 : i32
    %c0_i32_0 = arith.constant 0 : i32
    %c0_i32_1 = arith.constant 0 : i32
    return %c0_i32, %c0_i32_0 : i32, i32
  }
  func.func @transform_3(%arg0: i32) -> (i32, i32) {
    %c0_i32 = arith.constant 0 : i32
    %c0_i32_0 = arith.constant 0 : i32
    %c0_i32_1 = arith.constant 0 : i32
    return %c0_i32, %c0_i32_0 : i32, i32
  }
  func.func @transform_4(%arg0: i32) -> (i32, i32) {
    %c0_i32 = arith.constant 0 : i32
    %c0_i32_0 = arith.constant 0 : i32
    %c0_i32_1 = arith.constant 0 : i32
    return %c0_i32, %c0_i32_0 : i32, i32
  }
  func.func @transform_5(%arg0: i32) -> (i32, i32) {
    %c0_i32 = arith.constant 0 : i32
    %c0_i32_0 = arith.constant 0 : i32
    %c0_i32_1 = arith.constant 0 : i32
    return %c0_i32, %c0_i32_0 : i32, i32
  }
  func.func @transform_6(%arg0: i32) -> (i32, i32) {
    %c0_i32 = arith.constant 0 : i32
    %c0_i32_0 = arith.constant 0 : i32
    %c0_i32_1 = arith.constant 0 : i32
    return %c0_i32, %c0_i32_0 : i32, i32
  }
  func.func @transform_7(%arg0: i32) -> (i32, i32) {
    %c0_i32 = arith.constant 0 : i32
    %c0_i32_0 = arith.constant 0 : i32
    %c0_i32_1 = arith.constant 0 : i32
    return %c0_i32, %c0_i32_0 : i32, i32
  }
  func.func @transform_8(%arg0: i32) -> (i32, i32) {
    %c0_i32 = arith.constant 0 : i32
    %c0_i32_0 = arith.constant 0 : i32
    %c0_i32_1 = arith.constant 0 : i32
    return %c0_i32, %c0_i32_0 : i32, i32
  }
  func.func @transform_9(%arg0: i32) -> (i32, i32) {
    %c0_i32 = arith.constant 0 : i32
    %c0_i32_0 = arith.constant 0 : i32
    %c0_i32_1 = arith.constant 0 : i32
    return %c0_i32, %c0_i32_0 : i32, i32
  }
  func.func @transform_10(%arg0: i32) -> (i32, i32) {
    %c0_i32 = arith.constant 0 : i32
    %c0_i32_0 = arith.constant 0 : i32
    %c0_i32_1 = arith.constant 0 : i32
    return %c0_i32, %c0_i32_0 : i32, i32
  }
  func.func @transform_11(%arg0: i32) -> (i32, i32) {
    %c0_i32 = arith.constant 0 : i32
    %c0_i32_0 = arith.constant 0 : i32
    %c0_i32_1 = arith.constant 0 : i32
    return %c0_i32, %c0_i32_0 : i32, i32
  }
  func.func @transform_12(%arg0: i32) -> (i32, i32, i32) {
    %c0_i32 = arith.constant 0 : i32
    %c0_i32_0 = arith.constant 0 : i32
    %c0_i32_1 = arith.constant 0 : i32
    return %arg0, %c0_i32, %c0_i32_0 : i32, i32, i32
  }
}

</mosaic_0001>

<bundles_post_ra>
// kernel: inverted_residual_forward.1
= control target key start
LH: loop header
LB: loop body
LE: loop exit
PB: predicated region body
PF: predicated region fallthrough
CT: control target
= control target key end

     0   :  { %s3475_s21 = smov 0   ;;  %s5686_s0 = inlined_call_operand.vmem [shape: f32[4,16,256], index: 0, kind: input, shape index: {}]   ;;  %s5687_s1 = inlined_call_operand.vmem [shape: f32[3,256], index: 1, kind: input, shape index: {}]   ;;  %s5688_s2 = inlined_call_operand.vmem [shape: bf16[64,16], index: 2, kind: input, shape index: {}]   ;;  %s5689_s3 = inlined_call_operand.vmem [shape: f32[64,1], index: 3, kind: input, shape index: {}]   ;;  %s5690_s4 = inlined_call_operand.vmem [shape: f32[64,9], index: 4, kind: input, shape index: {}]   ;;  %s5691_s5 = inlined_call_operand.vmem [shape: f32[64,1], index: 5, kind: input, shape index: {}]   ;;  %s5692_s6 = inlined_call_operand.vmem [shape: f32[64,16], index: 6, kind: input, shape index: {}]   ;;  %s5693_s7 = inlined_call_operand.vmem [shape: f32[1,16], index: 7, kind: input, shape index: {}]   ;;  %s5694_s8 = inlined_call_operand.vmem [shape: f32[64,16], index: 8, kind: input, shape index: {}]   ;;  %s5695_s9 = inlined_call_operand.vmem [shape: f32[64,1], index: 9, kind: input, shape index: {}]   ;;  %s5696_s10 = inlined_call_operand.vmem [shape: bf16[16,64], index: 10, kind: input, shape index: {}]   ;;  %s5697_s11 = inlined_call_operand.vmem [shape: f32[16,1], index: 11, kind: input, shape index: {}]   ;;  %s5698_s12 = inlined_call_operand.vmem [shape: f32[4,16,256], index: 12, kind: output, shape index: {}]  }
   0x1 LB: > { %s3227_s22 = sadd.s32 4294967295, %s3388_s21   ;;  %p3231_p0 = scmp.ge.s32.totalorder %s3388_s21, 1  ;;  %s3388_s21 = sphi %s3475_s21, %s22_s21  }
   0x2   : > { %p362_p1 = scmp.lt.s32.totalorder %s3388_s21, 5 }
   0x4   : > { %p363_p2 = pnand %p3231_p0, %p362_p1 }
   0x6   : > { %366 = sbr.rel (%p363_p2) target bundleno = 2345 (0x929), region = 68 }
   0xb   : > { %v433_v0 = vld [vmem:[%s5689_s3 + $0x20] sm:$0xff]  ;;  %v431_v1 = vld [vmem:[%s5689_s3 + $0x10] sm:$0xff]  ;;  %p404_p3 = scmp.lt.s32.totalorder %s3227_s22, 3  ;;  %v5699_v3 = vmov 0   ;;  %v434_v10 = vld [vmem:[%s5689_s3 + $0x28] sm:$0xff]  ;;  %vm497_vm0 = vcmask 130048  }
   0xc   : > { %v429_v2 = vld [vmem:[%s5689_s3] sm:$0xff]  ;;  %3307 = vset.pattern.permute.xlu2 %v5699_v3  ;;  %3306 = vset.pattern.permute.xlu1 %v5699_v3  ;;  %v432_v11 = vld [vmem:[%s5689_s3 + $0x18] sm:$0xff]  ;;  %v430_v13 = vld [vmem:[%s5689_s3 + $0x8] sm:$0xff]  ;;  %v3391_v21 = vmov 1   ;;  %s3392_s17 = smov 111   ;;  %v3393_v30 = vmov 2  }
   0xd   : > { %3305 = vset.pattern.permute.xlu0 %v5699_v3  ;;  %459 = vperm.xlu2 %3307, %v433_v0   ;;  %s6015_s22 = smov (!%p404_p3, %s3227_s22), 3  ;;  %v3270_v12 = vld [vmem:[%s5688_s2] sm:$0xff]  ;;  %v3273_v14 = vld [vmem:[%s5688_s2 + $0x18] sm:$0xff]  ;;  %v435_v17 = vld [vmem:[%s5689_s3 + $0x30] sm:$0xff]  ;;  %vm648_vm1 = vcmask 1048440   ;;  %v5701_v34 = vmov 0.0  }
   0xe   : > { %449 = vperm.xlu1 %3306, %v431_v1   ;;  %439 = vperm.xlu0 %3305, %v429_v2   ;;  %s3268_s29 = sshll.u32 %s6015_s22, 5  ;;  %v3531_v15 = vld [vmem:[%s5690_s4] sm:$0xff]  ;;  %v436_v16 = vld [vmem:[%s5689_s3 + $0x38] sm:$0xff]  ;;  %v3548_v19 = vld [vmem:[%s5690_s4 + $0x10] sm:$0xff]  ;;  %649 = vst.msk [vmem:[#allocation2] sm:$0xff] %vm648_vm1, %v5701_v34  ;;  %s3395_s26 = smov 113  }
   0xf   : > { %s3503_s14 = scalar_lea.vmem %s5686_s0, %s3268_s29  ;;  %v3543_v18 = vld [vmem:[%s5690_s4 + $0x18] sm:$0xff]  ;;  %v3271_v20 = vld [vmem:[%s5688_s2 + $0x8] sm:$0xff]  ;;  %v3561_v22 = vld [vmem:[%s5690_s4 + $0x30] sm:$0xff]  ;;  %650 = vst.msk [vmem:[#allocation2 + $0x20] sm:$0xff] %vm648_vm1, %v5701_v34  ;;  %s3396_s27 = smov 127   ;;  %vm1082_vm2 = vcmask 924672  }
  0x10   : > { %v423_v4 = vld [vmem:[%s3503_s14] sm:$0xff]  ;;  %v425_v5 = vld [vmem:[%s3503_s14 + $0x10] sm:$0xff]  ;;  %v424_v6 = vld [vmem:[%s3503_s14 + $0x8] sm:$0xff]  ;;  %651 = vst.msk [vmem:[#allocation2 + $0x40] sm:$0xff] %vm648_vm1, %v5701_v34  ;;  %s3397_s28 = smov 126   ;;  %s3401_s30 = smov 1  }
  0x11   : > { %v427_v7 = vpack.c.bf16 %v425_v5, %v423_v4  ;;  %v426_v8 = vld [vmem:[%s3503_s14 + $0x18] sm:$0xff]  ;;  %v3566_v23 = vld [vmem:[%s5690_s4 + $0x28] sm:$0xff]  ;;  %v3571_v24 = vld [vmem:[%s5687_s1] sm:$0x77]  ;;  %652 = vst.msk [vmem:[#allocation2 + $0x60] sm:$0xff] %vm648_vm1, %v5701_v34  ;;  %vm657_vm3 = vcmask 138240   ;;  %s413_s16 = scalar_lea.vmem %s5698_s12, %s3268_s29 }
  0x12   : > { %v428_v9 = vpack.c.bf16 %v426_v8, %v424_v6  ;;  %v781_v25 = vperm.slane %v3571_v24, 4  ;;  %v780_v26 = vperm.slane %v3571_v24, 0  ;;  %v3272_v29 = vld [vmem:[%s5688_s2 + $0x10] sm:$0xff]  ;;  %v3592_v31 = vld [vmem:[%s5690_s4 + $0x8] sm:$0xff]  ;;  %v3599_v32 = vld [vmem:[%s5690_s4 + $0x20] sm:$0xff]  ;;  %653 = vst.msk [vmem:[#allocation2 + $0x80] sm:$0xff] %vm648_vm1, %v5701_v34 }
  0x13   : > { %517 = vmatpush.bf16.msra.mxu0 %v427_v7  ;;  %3275 = vmatpush.bf16.msra.mxu2 %v427_v7  ;;  %v3606_v33 = vld [vmem:[%s5690_s4 + $0x38] sm:$0xff]  ;;  %654 = vst.msk [vmem:[#allocation2 + $0xa0] sm:$0xff] %vm648_vm1, %v5701_v34  ;;  %v1071_v35 = vperm.slane %v3571_v24, 6  ;;  %vm1572_vm4 = vcmask 7168   ;;  %s3406_s19 = smov 17   ;;  %vm949_vm5 = vcmask 1039360  }
  0x14   : > { %546 = vmatpush.bf16.msra.mxu1 %v428_v9  ;;  %3276 = vmatpush.bf16.msra.mxu3 %v428_v9  ;;  %v3578_v27 = vperm.slane %v781_v25, 0  ;;  %v3580_v28 = vperm.slane %v780_v26, 0  ;;  %655 = vst.msk [vmem:[#allocation2 + $0xc0] sm:$0xff] %vm648_vm1, %v5701_v34  ;;  %vm1183_vm6 = vcmask 1031168   ;;  %vm1797_vm7 = vcmask 121856  }
  0x15   : > { %464 = vperm.xlu2 %3307, %v434_v10   ;;  %656 = vst.msk [vmem:[#allocation2 + $0xe0] sm:$0xff] %vm648_vm1, %v5701_v34  ;;  %v3625_v36 = vperm.slane %v1071_v35, 2  ;;  %v3643_v55 = vld [vmem:[#allocation2] sm:$0xff]  ;;  %vm792_vm8 = vcmask 908288   ;;  %vm2314_vm9 = vcmask 916480   ;;  %vm2451_vm10 = vcmask 785408  }
  0x16   : > { %454 = vperm.xlu1 %3306, %v432_v11   ;;  %444 = vperm.xlu0 %3305, %v430_v13   ;;  %vm3128_vm12 = vcmask 523264  }
  0x17   : > { %3252 = vmatmul.msk.bf16.vlgmr.msra.gmra.mxu0 %vm497_vm0, %v3270_v12  ;;  %3255 = vmatmul.msk.bf16.vlgmr.msra.gmra.mxu2 %vm497_vm0, %v3273_v14 }
  0x18   : > { %3256 = vmatmul.msk.bf16.vlgmr.msra.gmra.mxu1 %vm497_vm0, %v3270_v12  ;;  %3259 = vmatmul.msk.bf16.vlgmr.msra.gmra.mxu3 %vm497_vm0, %v3273_v14 }
  0x1d   : > { %717 = vperm.xlu2 %3307, %v3531_v15  }
  0x1e   : > { %474 = vperm.xlu1 %3306, %v436_v16   ;;  %469 = vperm.xlu0 %3305, %v435_v17  }
  0x25   : > { %732 = vperm.xlu2 %3307, %v3543_v18  }
  0x26   : > { %727 = vperm.xlu1 %3306, %v3548_v19   ;;  %3308 = vset.pattern.permute.xlu0 %v3391_v21 }
  0x27   : > { %3253 = vmatmul.msk.bf16.gmra.mxu0 %vm497_vm0, %v3271_v20  ;;  %822 = vperm.xlu0 %3308, %v3531_v15  }
  0x28   : > { %3257 = vmatmul.msk.bf16.gmra.mxu1 %vm497_vm0, %v3271_v20 }
  0x2d   : > { %747 = vperm.xlu2 %3307, %v3561_v22  }
  0x2e   : > { %742 = vperm.xlu1 %3306, %v3566_v23  }
  0x2f   : > { %842 = vperm.xlu0 %3308, %v3566_v23  }
  0x35   : > { %790 = vrot.lane.b32.xlu2 %v3578_v27, %s3392_s17 }
  0x36   : > { %788 = vrot.lane.b32.xlu1 %v3580_v28, %s3392_s17  ;;  %3310 = vset.pattern.permute.xlu2 %v3391_v21 }
  0x37   : > { %3254 = vmatmul.msk.bf16.gmra.mxu0 %vm497_vm0, %v3272_v29  ;;  %3309 = vset.pattern.permute.xlu1 %v3391_v21 }
  0x38   : > { %3258 = vmatmul.msk.bf16.gmra.mxu1 %vm497_vm0, %v3272_v29  ;;  %3311 = vset.pattern.permute.xlu0 %v3393_v30 }
  0x3d   : > { %830 = vperm.xlu2 %3310, %v3548_v19  }
  0x3e   : > { %826 = vperm.xlu1 %3309, %v3592_v31  }
  0x45   : > { %838 = vperm.xlu2 %3310, %v3599_v32  }
  0x46   : > { %834 = vperm.xlu1 %3309, %v3543_v18  }
  0x4d   : > { %850 = vperm.xlu2 %3310, %v3606_v33  }
  0x4e   : > { %846 = vperm.xlu1 %3309, %v3561_v22  }
  0x55   : > { %3313 = vset.pattern.permute.xlu2 %v3393_v30 }
  0x56   : > { %3312 = vset.pattern.permute.xlu1 %v3393_v30  ;;  %1023 = vperm.xlu2 %3313, %v3548_v19  }
  0x57   : > { %1019 = vperm.xlu1 %3312, %v3592_v31  }
  0x5e   : > { %1031 = vperm.xlu2 %3313, %v3599_v32  }
  0x5f   : > { %1027 = vperm.xlu1 %3312, %v3543_v18  }
  0x66   : > { %1043 = vperm.xlu2 %3313, %v3606_v33  }
  0x67   : > { %1039 = vperm.xlu1 %3312, %v3561_v22   ;;  %v3629_v37 = vpop.permute.xlu2 %459 }
  0x6f   : > { %1080 = vrot.lane.b32.xlu1 %v3625_v36, %s3395_s26  ;;  %v3633_v40 = vpop.permute.xlu2 %464 }
  0x77   : > { %v3637_v43 = vpop.permute.xlu2 %717 }
  0x78   : > { %5788 = vst [vmem:[#allocation3_spill] sm:$0xff] %v3637_v43 }
  0x7f   : > { %v3639_v51 = vpop.permute.xlu2 %732 }
  0x80   : > { %v3631_v38 = vpop.permute.xlu1 %449  ;;  %v440_v39 = vpop.permute.xlu0 %439  ;;  %5789 = vst [vmem:[#allocation4_spill] sm:$0xff] %v3639_v51 }
  0x87   : > { %v3659_v25 = vpop.permute.xlu2 %747 }
  0x88   : > { %v3635_v41 = vpop.permute.xlu1 %454  ;;  %v445_v42 = vpop.permute.xlu0 %444  ;;  %5792 = vst [vmem:[#allocation7_spill] sm:$0xff] %v3659_v25 }
  0x90   : > { %v475_v44 = vpop.permute.xlu1 %474  ;;  %v470_v45 = vpop.permute.xlu0 %469 }
  0x94   : > { %v519_v46 = vpop.f32.mrf.mxu0 }
  0x95   : > { %v520_v47 = vadd.f32 %v519_v46, %v440_v39  ;;  %v548_v48 = vpop.f32.mrf.mxu1 }
  0x96   : > { %v549_v49 = vadd.f32 %v548_v48, %v440_v39 }
  0x97   : > { %v568_v50 = vadd.f32 3.0, %v520_v47 }
  0x98   : > { %v569_v52 = vadd.f32 3.0, %v549_v49  ;;  %v3641_v53 = vpop.permute.xlu1 %727 }
  0x99   : > { %5790 = vst [vmem:[#allocation5_spill] sm:$0xff] %v3641_v53  ;;  %v584_v54 = vmax.f32 %v568_v50, 0.0  ;;  %v3645_v57 = vpop.permute.xlu0 %822 }
  0x9a   : > { %v585_v56 = vmax.f32 %v569_v52, 0.0  ;;  %v534_v59 = vpop.f32.mrf.mxu2  ;;  %v853_v60 = vmul.f32 %v3645_v57, %v3643_v55 }
  0x9b   : > { %v600_v58 = vmin.f32 %v584_v54, 6.0  ;;  %v535_v62 = vadd.f32 %v534_v59, %v470_v45  ;;  %v563_v63 = vpop.f32.mrf.mxu3 }
  0x9c   : > { %v601_v61 = vmin.f32 %v585_v56, 6.0  ;;  %v521_v0 = vpop.f32.mrf.mxu0  ;;  %v564_v2 = vadd.f32 %v563_v63, %v470_v45  ;;  %901 = vrot.lane.b32.xlu0 %v853_v60, %s3396_s27 }
  0x9d   : > { %v616_v1 = vmul.f32 0.16666667, %v600_v58  ;;  %v522_v4 = vadd.f32 %v521_v0, %v445_v42  ;;  %v550_v5 = vpop.f32.mrf.mxu1  ;;  %v580_v7 = vadd.f32 3.0, %v535_v62 }
  0x9e   : > { %v617_v6 = vmul.f32 0.16666667, %v601_v61  ;;  %v551_v8 = vadd.f32 %v550_v5, %v445_v42  ;;  %v581_v10 = vadd.f32 3.0, %v564_v2 }
  0x9f   : > { %v3650_v9 = vmul.f32 %v616_v1, %v520_v47  ;;  %v570_v11 = vadd.f32 3.0, %v522_v4  ;;  %v596_v13 = vmax.f32 %v580_v7, 0.0 }
  0xa0   : > { %v3652_v12 = vmul.f32 %v617_v6, %v549_v49  ;;  %v571_v14 = vadd.f32 3.0, %v551_v8  ;;  %v3654_v16 = vpop.permute.xlu1 %742  ;;  %v597_v17 = vmax.f32 %v581_v10, 0.0 }
  0xa1   : > { %5791 = vst [vmem:[#allocation6_spill] sm:$0xff] %v3654_v16  ;;  %v586_v20 = vmax.f32 %v570_v11, 0.0  ;;  %v854_v21 = vmul.f32 %v3645_v57, %v3650_v9  ;;  %v612_v26 = vmin.f32 %v596_v13, 6.0 }
  0xa2   : > { %666 = vst [vmem:[#allocation2 + $0x8] sm:$0xff] %v3650_v9  ;;  %v587_v29 = vmax.f32 %v571_v14, 0.0  ;;  %v613_v30 = vmin.f32 %v597_v17, 6.0  ;;  %v536_v39 = vpop.f32.mrf.mxu2  ;;  %v3679_v14 = vpop.permute.xlu2 %790 }
  0xa3   : > { %667 = vst [vmem:[#allocation2 + $0x10] sm:$0xff] %v3652_v12  ;;  %v602_v35 = vmin.f32 %v586_v20, 6.0  ;;  %903 = vrot.lane.b32.xlu1 %v854_v21, %s3396_s27  ;;  %v628_v42 = vmul.f32 0.16666667, %v612_v26  ;;  %v537_v46 = vadd.f32 %v536_v39, %v475_v44  ;;  %v565_v47 = vpop.f32.mrf.mxu3 }
  0xa4   : > { %v603_v45 = vmin.f32 %v587_v29, 6.0  ;;  %v524_v48 = vpop.f32.mrf.mxu0  ;;  %v629_v49 = vmul.f32 0.16666667, %v613_v30  ;;  %v566_v52 = vadd.f32 %v565_v47, %v475_v44  ;;  %5794 = vst [vmem:[#allocation9_spill] sm:$0xff] %v3679_v14 }
  0xa5   : > { %v618_v50 = vmul.f32 0.16666667, %v602_v35  ;;  %v525_v54 = vadd.f32 %v524_v48, %v3631_v38  ;;  %v553_v56 = vpop.f32.mrf.mxu1  ;;  %v3664_v58 = vmul.f32 %v628_v42, %v535_v62  ;;  %v582_v60 = vadd.f32 3.0, %v537_v46 }
  0xa6   : > { %v619_v59 = vmul.f32 0.16666667, %v603_v45  ;;  %v554_v61 = vadd.f32 %v553_v56, %v3631_v38  ;;  %v3667_v63 = vmul.f32 %v629_v49, %v564_v2  ;;  %v583_v1 = vadd.f32 3.0, %v566_v52  ;;  %v3685_v45 = vld [vmem:[#allocation2 + $0x20] sm:$0xff] }
  0xa7   : > { %v3669_v0 = vmul.f32 %v618_v50, %v522_v4  ;;  %v572_v5 = vadd.f32 3.0, %v525_v54  ;;  %678 = vst [vmem:[#allocation2 + $0xc8] sm:$0xff] %v3664_v58  ;;  %v598_v44 = vmax.f32 %v582_v60, 0.0 }
  0xa8   : > { %v3672_v6 = vmul.f32 %v619_v59, %v551_v8  ;;  %v573_v7 = vadd.f32 3.0, %v554_v61  ;;  %v3674_v10 = vpop.permute.xlu1 %788  ;;  %679 = vst [vmem:[#allocation2 + $0xd0] sm:$0xff] %v3667_v63  ;;  %v599_v62 = vmax.f32 %v583_v1, 0.0 }
  0xa9   : > { %5793 = vst [vmem:[#allocation8_spill] sm:$0xff] %v3674_v10  ;;  %v588_v11 = vmax.f32 %v572_v5, 0.0  ;;  %v614_v38 = vmin.f32 %v598_v44, 6.0 }
  0xaa   : > { %668 = vst [vmem:[#allocation2 + $0x28] sm:$0xff] %v3669_v0  ;;  %v589_v2 = vmax.f32 %v573_v7, 0.0  ;;  %v615_v4 = vmin.f32 %v599_v62, 6.0  ;;  %v3703_v7 = vld [vmem:[#allocation2 + $0x40] sm:$0xff]  ;;  %v3705_v62 = vpop.permute.xlu2 %830 }
  0xab   : > { %669 = vst [vmem:[#allocation2 + $0x30] sm:$0xff] %v3672_v6  ;;  %v604_v13 = vmin.f32 %v588_v11, 6.0  ;;  %v630_v8 = vmul.f32 0.16666667, %v614_v38 }
  0xac   : > { %v605_v17 = vmin.f32 %v589_v2, 6.0  ;;  %v526_v20 = vpop.f32.mrf.mxu0  ;;  %v631_v21 = vmul.f32 0.16666667, %v615_v4 }
  0xad   : > { %v620_v26 = vmul.f32 0.16666667, %v604_v13  ;;  %v527_v29 = vadd.f32 %v526_v20, %v3635_v41  ;;  %v555_v30 = vpop.f32.mrf.mxu1  ;;  %v3682_v35 = vmul.f32 %v630_v8, %v537_v46  ;;  %v859_v13 = vmul.f32 %v3705_v62, %v3703_v7 }
  0xae   : > { %v621_v39 = vmul.f32 0.16666667, %v605_v17  ;;  %v556_v42 = vadd.f32 %v555_v30, %v3635_v41  ;;  %v3687_v47 = vmul.f32 %v631_v21, %v566_v52 }
  0xaf   : > { %v3689_v48 = vmul.f32 %v620_v26, %v525_v54  ;;  %v574_v49 = vadd.f32 3.0, %v527_v29  ;;  %680 = vst [vmem:[#allocation2 + $0xe8] sm:$0xff] %v3682_v35 }
  0xb0   : > { %v3692_v50 = vmul.f32 %v621_v39, %v554_v61  ;;  %v575_v56 = vadd.f32 3.0, %v556_v42  ;;  %v3694_v59 = vpop.permute.xlu1 %826  ;;  %681 = vst [vmem:[#allocation2 + $0xf0] sm:$0xff] %v3687_v47 }
  0xb1   : > { %v590_v46 = vmax.f32 %v574_v49, 0.0  ;;  %v856_v41 = vmul.f32 %v3694_v59, %v3685_v45  ;;  %670 = vst [vmem:[#allocation2 + $0x48] sm:$0xff] %v3689_v48 }
  0xb2   : > { %v591_v52 = vmax.f32 %v575_v56, 0.0  ;;  %671 = vst [vmem:[#allocation2 + $0x50] sm:$0xff] %v3692_v50 }
  0xb3   : > { %v606_v54 = vmin.f32 %v590_v46, 6.0  ;;  %907 = vrot.lane.b32.xlu0 %v856_v41, %s3396_s27 }
  0xb4   : > { %v607_v60 = vmin.f32 %v591_v52, 6.0  ;;  %v529_v61 = vpop.f32.mrf.mxu0 }
  0xb5   : > { %v622_v1 = vmul.f32 0.16666667, %v606_v54  ;;  %v530_v5 = vadd.f32 %v529_v61, %v3629_v37  ;;  %v558_v44 = vpop.f32.mrf.mxu1  ;;  %v3723_v54 = vld [vmem:[#allocation2 + $0x60] sm:$0xff] }
  0xb6   : > { %v623_v11 = vmul.f32 0.16666667, %v607_v60  ;;  %v559_v38 = vadd.f32 %v558_v44, %v3629_v37 }
  0xb7   : > { %v3708_v2 = vmul.f32 %v622_v1, %v527_v29  ;;  %v576_v4 = vadd.f32 3.0, %v530_v5 }
  0xb8   : > { %v3712_v8 = vmul.f32 %v623_v11, %v556_v42  ;;  %v577_v17 = vadd.f32 3.0, %v559_v38  ;;  %v3718_v46 = vpop.permute.xlu1 %834 }
  0xb9   : > { %672 = vst [vmem:[#allocation2 + $0x68] sm:$0xff] %v3708_v2  ;;  %v592_v20 = vmax.f32 %v576_v4, 0.0  ;;  %v862_v44 = vmul.f32 %v3718_v46, %v3723_v54 }
  0xba   : > { %673 = vst [vmem:[#allocation2 + $0x70] sm:$0xff] %v3712_v8  ;;  %v593_v21 = vmax.f32 %v577_v17, 0.0 }
  0xbb   : > { %v608_v26 = vmin.f32 %v592_v20, 6.0  ;;  %913 = vrot.lane.b32.xlu0 %v859_v13, %s3396_s27  ;;  %v3732_v13 = vld [vmem:[#allocation2 + $0x80] sm:$0xff]  ;;  %v3736_v20 = vpop.permute.xlu2 %838 }
  0xbc   : > { %v609_v30 = vmin.f32 %v593_v21, 6.0  ;;  %v531_v37 = vpop.f32.mrf.mxu0 }
  0xbd   : > { %v624_v29 = vmul.f32 0.16666667, %v608_v26  ;;  %v532_v39 = vadd.f32 %v531_v37, %v3633_v40  ;;  %v560_v49 = vpop.f32.mrf.mxu1  ;;  %v865_v26 = vmul.f32 %v3736_v20, %v3732_v13  ;;  %v3747_v37 = vld [vmem:[#allocation2 + $0xa0] sm:$0xff] }
  0xbe   : > { %v625_v56 = vmul.f32 0.16666667, %v609_v30  ;;  %v561_v42 = vadd.f32 %v560_v49, %v3633_v40  ;;  %v3745_v30 = vpop.permute.xlu0 %842  ;;  %v3754_v49 = vld [vmem:[#allocation2 + $0xc0] sm:$0xff] }
  0xbf   : > { %v3721_v41 = vmul.f32 %v624_v29, %v530_v5  ;;  %v578_v52 = vadd.f32 3.0, %v532_v39  ;;  %v868_v29 = vmul.f32 %v3745_v30, %v3747_v37 }
  0xc0   : > { %v3725_v60 = vmul.f32 %v625_v56, %v559_v38  ;;  %v579_v61 = vadd.f32 3.0, %v561_v42 }
  0xc1   : > { %674 = vst [vmem:[#allocation2 + $0x88] sm:$0xff] %v3721_v41  ;;  %v594_v1 = vmax.f32 %v578_v52, 0.0 }
  0xc2   : > { %675 = vst [vmem:[#allocation2 + $0x90] sm:$0xff] %v3725_v60  ;;  %v595_v11 = vmax.f32 %v579_v61, 0.0 }
  0xc3   : > { %v610_v4 = vmin.f32 %v594_v1, 6.0  ;;  %919 = vrot.lane.b32.xlu0 %v862_v44, %s3396_s27  ;;  %v3761_v52 = vpop.permute.xlu2 %850  ;;  %v1070_v1 = vperm.slane %v3571_v24, 2 }
  0xc4   : > { %v611_v40 = vmin.f32 %v595_v11, 6.0 }
  0xc5   : > { %v626_v5 = vmul.f32 0.16666667, %v610_v4  ;;  %v3769_v44 = vperm.slane %v1070_v1, 2 }
  0xc6   : > { %v627_v17 = vmul.f32 0.16666667, %v611_v40 }
  0xc7   : > { %v3734_v38 = vmul.f32 %v626_v5, %v532_v39  ;;  %v3752_v39 = vpop.permute.xlu1 %846 }
  0xc8   : > { %v3738_v21 = vmul.f32 %v627_v17, %v561_v42  ;;  %v871_v56 = vmul.f32 %v3752_v39, %v3754_v49  ;;  %v3759_v42 = vld [vmem:[#allocation2 + $0xe0] sm:$0xff] }
  0xc9   : > { %676 = vst [vmem:[#allocation2 + $0xa8] sm:$0xff] %v3734_v38  ;;  %v874_v61 = vmul.f32 %v3761_v52, %v3759_v42 }
  0xca   : > { %677 = vst [vmem:[#allocation2 + $0xb0] sm:$0xff] %v3738_v21 }
  0xcb   : > { %925 = vrot.lane.b32.xlu0 %v865_v26, %s3396_s27 }
  0xcf   : > { %v1020_v26 = vpop.permute.xlu1 %1019 }
  0xd3   : > { %931 = vrot.lane.b32.xlu0 %v868_v29, %s3396_s27 }
  0xdb   : > { %937 = vrot.lane.b32.xlu0 %v871_v56, %s3396_s27  ;;  %v3785_v56 = vpop.permute.xlu1 %1027 }
  0xe3   : > { %943 = vrot.lane.b32.xlu0 %v874_v61, %s3396_s27  ;;  %v3789_v61 = vpop.permute.xlu1 %1039 }
  0xeb   : > { %1015 = vperm.xlu0 %3311, %v3531_v15   ;;  %v3794_v25 = vpop.permute.xlu1 %1080 }
  0xf3   : > { %1035 = vperm.xlu0 %3311, %v3566_v23  }
  0xfb   : > { %1078 = vrot.lane.b32.xlu0 %v3769_v44, %s3395_s26  ;;  %s3403_s26 = smov 15  }
 0x10e   : > { %v3773_v11 = vpop.permute.xlu0 %901 }
 0x10f   : > { %5795 = vst [vmem:[#allocation10_spill] sm:$0xff] %v3773_v11  ;;  %v3402_v11 = vmov 6  }
 0x125   : > { %v3775_v4 = vpop.permute.xlu0 %907 }
 0x126   : > { %5796 = vst [vmem:[#allocation11_spill] sm:$0xff] %v3775_v4 }
 0x12d   : > { %v3777_v40 = vpop.permute.xlu0 %913 }
 0x12e   : > { %5797 = vst [vmem:[#allocation12_spill] sm:$0xff] %v3777_v40 }
 0x135   : > { %v3779_v5 = vpop.permute.xlu0 %919 }
 0x136   : > { %5798 = vst [vmem:[#allocation13_spill] sm:$0xff] %v3779_v5 }
 0x13d   : > { %v3781_v17 = vpop.permute.xlu0 %925 }
 0x13e   : > { %5799 = vst [vmem:[#allocation14_spill] sm:$0xff] %v3781_v17 }
 0x145   : > { %v3783_v29 = vpop.permute.xlu0 %931 }
 0x146   : > { %5800 = vst [vmem:[#allocation15_spill] sm:$0xff] %v3783_v29  ;;  %v872_v29 = vmul.f32 %v3752_v39, %v3664_v58 }
 0x14d   : > { %v3787_v24 = vpop.permute.xlu0 %937 }
 0x14e   : > { %5801 = vst [vmem:[#allocation16_spill] sm:$0xff] %v3787_v24 }
 0x155   : > { %v3791_v1 = vpop.permute.xlu0 %943 }
 0x156   : > { %5802 = vst [vmem:[#allocation17_spill] sm:$0xff] %v3791_v1 }
 0x15d   : > { %v1016_v3 = vpop.permute.xlu0 %1015 }
 0x15e   : > { %v1048_v34 = vmul.f32 %v1016_v3, %v3652_v12  ;;  %v1046_v1 = vmul.f32 %v1016_v3, %v3643_v55  ;;  %v1047_v24 = vmul.f32 %v1016_v3, %v3650_v9  ;;  %v1049_v3 = vmul.f32 %v1020_v26, %v3685_v45 }
 0x15f   : > { %v1050_v55 = vmul.f32 %v1020_v26, %v3669_v0 }
 0x160   : > { %v1089_v16 = vmul.f32 %v3794_v25, %v1048_v34 }
 0x162   : > { %1139 = vrot.lane.b32.xlu1 %v1089_v16, %s3397_s28 }
 0x165   : > { %v3798_v17 = vpop.permute.xlu0 %1035 }
 0x16a   : > { %939 = vrot.lane.b32.xlu1 %v872_v29, %s3396_s27  ;;  %v857_v29 = vmul.f32 %v3694_v59, %v3669_v0 }
 0x16d   : > { %v3805_v5 = vpop.permute.xlu0 %1078 }
 0x16e   : > { %v1087_v51 = vmul.f32 %v3805_v5, %v1046_v1  ;;  %v3810_v34 = vsel %vm1082_vm2, %v3805_v5, %v3794_v25  ;;  %v1051_v1 = vmul.f32 %v1020_v26, %v3672_v6  ;;  %v1090_v4 = vmul.f32 %v3805_v5, %v1049_v3 }
 0x16f   : > { %v1088_v16 = vmul.f32 %v3810_v34, %v1047_v24  ;;  %v1091_v40 = vmul.f32 %v3810_v34, %v1050_v55  ;;  %v1024_v24 = vpop.permute.xlu2 %1023 }
 0x170   : > { %1135 = vrot.lane.b32.xlu2 %v1087_v51, %s3397_s28  ;;  %v1092_v51 = vmul.f32 %v3794_v25, %v1051_v1  ;;  %v1053_v45 = vmul.f32 %v1024_v24, %v3689_v48  ;;  %v860_v1 = vmul.f32 %v3705_v62, %v3689_v48 }
 0x171   : > { %1137 = vrot.lane.b32.xlu0 %v1088_v16, %s3397_s28  ;;  %v1052_v16 = vmul.f32 %v1024_v24, %v3703_v7  ;;  %v1055_v7 = vmul.f32 %v3785_v56, %v3723_v54  ;;  %v3398_v54 = vmov 3  }
 0x172   : > { %909 = vrot.lane.b32.xlu1 %v857_v29, %s3396_s27  ;;  %v1094_v26 = vmul.f32 %v3810_v34, %v1053_v45  ;;  %3315 = vset.pattern.permute.xlu0 %v3398_v54 }
 0x173   : > { %v1093_v29 = vmul.f32 %v3805_v5, %v1052_v16  ;;  %v1096_v3 = vmul.f32 %v3805_v5, %v1055_v7  ;;  %3316 = vset.pattern.permute.xlu1 %v3398_v54  ;;  %3314 = vset.pattern.permute.xlu2 %v3398_v54 }
 0x178   : > { %1141 = vrot.lane.b32.xlu2 %v1090_v4, %s3397_s28  ;;  %v875_v4 = vmul.f32 %v3761_v52, %v3682_v35 }
 0x179   : > { %1143 = vrot.lane.b32.xlu0 %v1091_v40, %s3397_s28  ;;  %v1056_v40 = vmul.f32 %v3785_v56, %v3708_v2 }
 0x17a   : > { %1145 = vrot.lane.b32.xlu1 %v1092_v51, %s3397_s28  ;;  %v1032_v51 = vpop.permute.xlu2 %1031 }
 0x17b   : > { %v1097_v55 = vmul.f32 %v3810_v34, %v1056_v40  ;;  %v1058_v16 = vmul.f32 %v1032_v51, %v3732_v13  ;;  %v1059_v45 = vmul.f32 %v1032_v51, %v3721_v41  ;;  %v1061_v13 = vmul.f32 %v3798_v17, %v3747_v37 }
 0x17c   : > { %v1062_v40 = vmul.f32 %v3798_v17, %v3734_v38  ;;  %v1057_v37 = vmul.f32 %v3785_v56, %v3712_v8 }
 0x180   : > { %1147 = vrot.lane.b32.xlu2 %v1093_v29, %s3397_s28  ;;  %v1054_v29 = vmul.f32 %v1024_v24, %v3692_v50  ;;  %v1102_v24 = vmul.f32 %v3805_v5, %v1061_v13  ;;  %v858_v13 = vmul.f32 %v3694_v59, %v3672_v6  ;;  %v1063_v59 = vmul.f32 %v3798_v17, %v3738_v21 }
 0x181   : > { %1149 = vrot.lane.b32.xlu0 %v1094_v26, %s3397_s28  ;;  %v1099_v26 = vmul.f32 %v3805_v5, %v1058_v16  ;;  %v855_v16 = vmul.f32 %v3645_v57, %v3652_v12  ;;  %v866_v57 = vmul.f32 %v3736_v20, %v3721_v41  ;;  %v864_v17 = vmul.f32 %v3718_v46, %v3712_v8 }
 0x182   : > { %945 = vrot.lane.b32.xlu1 %v875_v4, %s3396_s27  ;;  %v1100_v4 = vmul.f32 %v3810_v34, %v1059_v45  ;;  %v1095_v7 = vmul.f32 %v3794_v25, %v1054_v29  ;;  %v1098_v45 = vmul.f32 %v3794_v25, %v1057_v37  ;;  %v1044_v29 = vpop.permute.xlu2 %1043 }
 0x183   : > { %v1069_v37 = vmul.f32 %v1044_v29, %v3687_v47 }
 0x188   : > { %1153 = vrot.lane.b32.xlu2 %v1096_v3, %s3397_s28  ;;  %v1103_v3 = vmul.f32 %v3810_v34, %v1062_v40  ;;  %v869_v40 = vmul.f32 %v3745_v30, %v3734_v38 }
 0x189   : > { %1155 = vrot.lane.b32.xlu0 %v1097_v55, %s3397_s28  ;;  %v863_v55 = vmul.f32 %v3718_v46, %v3708_v2  ;;  %v1110_v46 = vmul.f32 %v3794_v25, %v1069_v37 }
 0x18a   : > { %915 = vrot.lane.b32.xlu1 %v860_v1, %s3396_s27  ;;  %v1065_v1 = vmul.f32 %v3789_v61, %v3664_v58 }
 0x18c   : > { %v1106_v54 = vmul.f32 %v3810_v34, %v1065_v1  ;;  %v3920_v1 = vpop.permute.xlu1 %903 }
 0x18d   : > { %5804 = vst [vmem:[#allocation19_spill] sm:$0xff] %v3920_v1 }
 0x190   : > { %1159 = vrot.lane.b32.xlu2 %v1099_v26, %s3397_s28  ;;  %v1068_v26 = vmul.f32 %v1044_v29, %v3682_v35 }
 0x191   : > { %1161 = vrot.lane.b32.xlu0 %v1100_v4, %s3397_s28  ;;  %v873_v4 = vmul.f32 %v3752_v39, %v3667_v63 }
 0x192   : > { %1151 = vrot.lane.b32.xlu1 %v1095_v7, %s3397_s28  ;;  %v1109_v56 = vmul.f32 %v3810_v34, %v1068_v26  ;;  %v1060_v7 = vmul.f32 %v1032_v51, %v3725_v60  ;;  %v876_v34 = vmul.f32 %v3761_v52, %v3687_v47  ;;  %v861_v51 = vmul.f32 %v3705_v62, %v3692_v50 }
 0x193   : > { %v3399_v52 = vmov 4   ;;  %v870_v26 = vmul.f32 %v3745_v30, %v3738_v21 }
 0x194   : > { %v1101_v39 = vmul.f32 %v3794_v25, %v1060_v7 }
 0x198   : > { %1165 = vrot.lane.b32.xlu2 %v1102_v24, %s3397_s28  ;;  %v1104_v24 = vmul.f32 %v3794_v25, %v1063_v59 }
 0x199   : > { %1167 = vrot.lane.b32.xlu0 %v1103_v3, %s3397_s28  ;;  %v1066_v3 = vmul.f32 %v3789_v61, %v3667_v63 }
 0x19a   : > { %921 = vrot.lane.b32.xlu1 %v863_v55, %s3396_s27 }
 0x19b   : > { %v1107_v62 = vmul.f32 %v3794_v25, %v1066_v3  ;;  %v1064_v25 = vmul.f32 %v3789_v61, %v3754_v49 }
 0x1a0   : > { %905 = vrot.lane.b32.xlu2 %v855_v16, %s3396_s27  ;;  %v867_v16 = vmul.f32 %v3736_v20, %v3725_v60 }
 0x1a1   : > { %1173 = vrot.lane.b32.xlu0 %v1106_v54, %s3397_s28 }
 0x1a2   : > { %1157 = vrot.lane.b32.xlu1 %v1098_v45, %s3397_s28 }
 0x1a8   : > { %941 = vrot.lane.b32.xlu2 %v873_v4, %s3396_s27 }
 0x1a9   : > { %1179 = vrot.lane.b32.xlu0 %v1109_v56, %s3397_s28  ;;  %v1105_v56 = vmul.f32 %v3805_v5, %v1064_v25 }
 0x1aa   : > { %927 = vrot.lane.b32.xlu1 %v866_v57, %s3396_s27  ;;  %v1067_v57 = vmul.f32 %v1044_v29, %v3759_v42 }
 0x1b0   : > { %911 = vrot.lane.b32.xlu2 %v858_v13, %s3396_s27  ;;  %v1108_v13 = vmul.f32 %v3805_v5, %v1067_v57 }
 0x1b1   : > { %1253 = vperm.xlu0 %3315, %v3592_v31  }
 0x1b2   : > { %1163 = vrot.lane.b32.xlu1 %v1101_v39, %s3397_s28 }
 0x1b8   : > { %947 = vrot.lane.b32.xlu2 %v876_v34, %s3396_s27 }
 0x1b9   : > { %1273 = vperm.xlu0 %3315, %v3561_v22  }
 0x1ba   : > { %933 = vrot.lane.b32.xlu1 %v869_v40, %s3396_s27 }
 0x1c0   : > { %917 = vrot.lane.b32.xlu2 %v861_v51, %s3396_s27 }
 0x1c1   : > { %1306 = vrot.lane.b32.xlu0 %v3578_v27, %s3396_s27 }
 0x1c2   : > { %1169 = vrot.lane.b32.xlu1 %v1104_v24, %s3397_s28  ;;  %3319 = vset.pattern.permute.xlu0 %v3399_v52 }
 0x1c8   : > { %923 = vrot.lane.b32.xlu2 %v864_v17, %s3396_s27 }
 0x1c9   : > { %1345 = vperm.xlu0 %3319, %v3548_v19  }
 0x1ca   : > { %v3917_v55 = vpop.permute.xlu2 %1135  ;;  %1175 = vrot.lane.b32.xlu1 %v1107_v62, %s3397_s28 }
 0x1cb   : > { %5803 = vst [vmem:[#allocation18_spill] sm:$0xff] %v3917_v55  ;;  %v4187_v55 = vld [vmem:[#allocation2 + $0x88] sm:$0xff] }
 0x1d0   : > { %929 = vrot.lane.b32.xlu2 %v867_v16, %s3396_s27 }
 0x1d1   : > { %1365 = vperm.xlu0 %3319, %v3606_v33  }
 0x1d2   : > { %v3928_v54 = vpop.permute.xlu2 %1141  ;;  %1181 = vrot.lane.b32.xlu1 %v1110_v46, %s3397_s28 }
 0x1d3   : > { %5805 = vst [vmem:[#allocation20_spill] sm:$0xff] %v3928_v54 }
 0x1d4   : > { %v3931_v45 = vpop.permute.xlu1 %1139 }
 0x1d5   : > { %5806 = vst [vmem:[#allocation21_spill] sm:$0xff] %v3931_v45 }
 0x1d8   : > { %935 = vrot.lane.b32.xlu2 %v870_v26, %s3396_s27 }
 0x1da   : > { %v3936_v4 = vpop.permute.xlu2 %1147  ;;  %1257 = vperm.xlu1 %3316, %v3548_v19  }
 0x1db   : > { %5807 = vst [vmem:[#allocation22_spill] sm:$0xff] %v3936_v4  ;;  %v3400_v4 = vmov 5  }
 0x1dc   : > { %v3941_v20 = vpop.permute.xlu1 %939  ;;  %3321 = vset.pattern.permute.xlu0 %v3400_v4 }
 0x1dd   : > { %5808 = vst [vmem:[#allocation23_spill] sm:$0xff] %v3941_v20 }
 0x1e0   : > { %1171 = vrot.lane.b32.xlu2 %v1105_v56, %s3397_s28 }
 0x1e2   : > { %v3946_v7 = vpop.permute.xlu2 %1153  ;;  %1265 = vperm.xlu1 %3316, %v3599_v32  }
 0x1e3   : > { %5809 = vst [vmem:[#allocation24_spill] sm:$0xff] %v3946_v7  ;;  %v3970_v34 = vpop.permute.xlu0 %1137 }
 0x1e4   : > { %v3949_v30 = vpop.permute.xlu1 %909  ;;  %5817 = vst [vmem:[#allocation32_spill] sm:$0xff] %v3970_v34 }
 0x1e5   : > { %5810 = vst [vmem:[#allocation25_spill] sm:$0xff] %v3949_v30 }
 0x1e8   : > { %1177 = vrot.lane.b32.xlu2 %v1108_v13, %s3397_s28 }
 0x1ea   : > { %v3953_v39 = vpop.permute.xlu2 %1159  ;;  %1277 = vperm.xlu1 %3316, %v3606_v33  }
 0x1eb   : > { %5811 = vst [vmem:[#allocation26_spill] sm:$0xff] %v3953_v39  ;;  %v3978_v51 = vpop.permute.xlu0 %1143 }
 0x1ec   : > { %v3956_v49 = vpop.permute.xlu1 %1145  ;;  %5820 = vst [vmem:[#allocation35_spill] sm:$0xff] %v3978_v51 }
 0x1ed   : > { %5812 = vst [vmem:[#allocation27_spill] sm:$0xff] %v3956_v49 }
 0x1f0   : > { %1249 = vperm.xlu2 %3314, %v3531_v15  }
 0x1f2   : > { %v3959_v61 = vpop.permute.xlu2 %1165  ;;  %3317 = vset.pattern.permute.xlu1 %v3399_v52 }
 0x1f3   : > { %5813 = vst [vmem:[#allocation28_spill] sm:$0xff] %v3959_v61  ;;  %1337 = vperm.xlu1 %3317, %v3531_v15   ;;  %v3987_v17 = vpop.permute.xlu0 %1149 }
 0x1f4   : > { %v3962_v42 = vpop.permute.xlu1 %945  ;;  %5823 = vst [vmem:[#allocation38_spill] sm:$0xff] %v3987_v17 }
 0x1f5   : > { %5814 = vst [vmem:[#allocation29_spill] sm:$0xff] %v3962_v42 }
 0x1f8   : > { %1261 = vperm.xlu2 %3314, %v3543_v18  }
 0x1fa   : > { %v3965_v5 = vpop.permute.xlu2 %905 }
 0x1fb   : > { %5815 = vst [vmem:[#allocation30_spill] sm:$0xff] %v3965_v5  ;;  %1349 = vperm.xlu1 %3317, %v3543_v18   ;;  %v3996_v46 = vpop.permute.xlu0 %1155 }
 0x1fc   : > { %v3968_v29 = vpop.permute.xlu1 %915  ;;  %5827 = vst [vmem:[#allocation42_spill] sm:$0xff] %v3996_v46 }
 0x1fd   : > { %5816 = vst [vmem:[#allocation31_spill] sm:$0xff] %v3968_v29 }
 0x200   : > { %1269 = vperm.xlu2 %3314, %v3566_v23  }
 0x202   : > { %v3973_v40 = vpop.permute.xlu2 %941 }
 0x203   : > { %5818 = vst [vmem:[#allocation33_spill] sm:$0xff] %v3973_v40  ;;  %1357 = vperm.xlu1 %3317, %v3566_v23   ;;  %v4005_v56 = vpop.permute.xlu0 %1161 }
 0x204   : > { %v3976_v59 = vpop.permute.xlu1 %1151  ;;  %5831 = vst [vmem:[#allocation46_spill] sm:$0xff] %v4005_v56 }
 0x205   : > { %5819 = vst [vmem:[#allocation34_spill] sm:$0xff] %v3976_v59 }
 0x208   : > { %1304 = vrot.lane.b32.xlu2 %v3580_v28, %s3396_s27 }
 0x209   : > { %3318 = vset.pattern.permute.xlu2 %v3399_v52 }
 0x20a   : > { %v3982_v24 = vpop.permute.xlu2 %911 }
 0x20b   : > { %5821 = vst [vmem:[#allocation36_spill] sm:$0xff] %v3982_v24  ;;  %3322 = vset.pattern.permute.xlu1 %v3400_v4 }
 0x20c   : > { %v3984_v3 = vpop.permute.xlu1 %921 }
 0x20d   : > { %5822 = vst [vmem:[#allocation37_spill] sm:$0xff] %v3984_v3 }
 0x210   : > { %1341 = vperm.xlu2 %3318, %v3592_v31  }
 0x212   : > { %v3989_v62 = vpop.permute.xlu2 %947 }
 0x213   : > { %5824 = vst [vmem:[#allocation39_spill] sm:$0xff] %v3989_v62  ;;  %v4011_v62 = vpop.permute.xlu0 %1167 }
 0x214   : > { %v3991_v37 = vpop.permute.xlu1 %1157  ;;  %5834 = vst [vmem:[#allocation49_spill] sm:$0xff] %v4011_v62 }
 0x215   : > { %5825 = vst [vmem:[#allocation40_spill] sm:$0xff] %v3991_v37 }
 0x218   : > { %1353 = vperm.xlu2 %3318, %v3599_v32  }
 0x21a   : > { %v3994_v16 = vpop.permute.xlu2 %917 }
 0x21b   : > { %5826 = vst [vmem:[#allocation41_spill] sm:$0xff] %v3994_v16  ;;  %v4017_v20 = vpop.permute.xlu0 %1173 }
 0x21c   : > { %v3998_v26 = vpop.permute.xlu1 %927  ;;  %5837 = vst [vmem:[#allocation52_spill] sm:$0xff] %v4017_v20 }
 0x21d   : > { %5828 = vst [vmem:[#allocation43_spill] sm:$0xff] %v3998_v26 }
 0x220   : > { %1361 = vperm.xlu2 %3318, %v3561_v22  }
 0x222   : > { %v4001_v52 = vpop.permute.xlu2 %923 }
 0x223   : > { %5829 = vst [vmem:[#allocation44_spill] sm:$0xff] %v4001_v52 }
 0x224   : > { %v4003_v25 = vpop.permute.xlu1 %1163 }
 0x225   : > { %5830 = vst [vmem:[#allocation45_spill] sm:$0xff] %v4003_v25  ;;  %v4025_v25 = vpop.permute.xlu0 %1179 }
 0x226   : > { %5841 = vst [vmem:[#allocation56_spill] sm:$0xff] %v4025_v25 }
 0x228   : > { %3320 = vset.pattern.permute.xlu2 %v3400_v4 }
 0x22a   : > { %v4007_v57 = vpop.permute.xlu2 %929 }
 0x22b   : > { %5832 = vst [vmem:[#allocation47_spill] sm:$0xff] %v4007_v57 }
 0x22c   : > { %v4009_v13 = vpop.permute.xlu1 %933 }
 0x22d   : > { %5833 = vst [vmem:[#allocation48_spill] sm:$0xff] %v4009_v13  ;;  %v4033_v62 = vpop.permute.xlu0 %1253 }
 0x232   : > { %v4013_v42 = vpop.permute.xlu2 %935 }
 0x233   : > { %5835 = vst [vmem:[#allocation50_spill] sm:$0xff] %v4013_v42 }
 0x234   : > { %v4015_v40 = vpop.permute.xlu1 %1169 }
 0x235   : > { %5836 = vst [vmem:[#allocation51_spill] sm:$0xff] %v4015_v40  ;;  %v4039_v20 = vpop.permute.xlu0 %1273 }
 0x236   : > { %5845 = vst [vmem:[#allocation60_spill] sm:$0xff] %v4039_v20 }
 0x23a   : > { %v4019_v61 = vpop.permute.xlu2 %1171 }
 0x23b   : > { %5838 = vst [vmem:[#allocation53_spill] sm:$0xff] %v4019_v61 }
 0x23c   : > { %v4021_v39 = vpop.permute.xlu1 %1175 }
 0x23d   : > { %5839 = vst [vmem:[#allocation54_spill] sm:$0xff] %v4021_v39 }
 0x242   : > { %v4023_v26 = vpop.permute.xlu2 %1177 }
 0x243   : > { %5840 = vst [vmem:[#allocation55_spill] sm:$0xff] %v4023_v26  ;;  %v4045_v26 = vpop.permute.xlu0 %1306 }
 0x244   : > { %v4027_v56 = vpop.permute.xlu1 %1181 }
 0x245   : > { %5842 = vst [vmem:[#allocation57_spill] sm:$0xff] %v4027_v56 }
 0x24a   : > { %v4029_v57 = vpop.permute.xlu2 %1249 }
 0x24b   : > { %v1346_v52 = vpop.permute.xlu0 %1345 }
 0x24c   : > { %v4031_v13 = vpop.permute.xlu1 %1257  ;;  %v1372_v59 = vmul.f32 %v1346_v52, %v3689_v48 }
 0x252   : > { %v4035_v42 = vpop.permute.xlu2 %1261 }
 0x253   : > { %5843 = vst [vmem:[#allocation58_spill] sm:$0xff] %v4035_v42 }
 0x254   : > { %v4037_v40 = vpop.permute.xlu1 %1265 }
 0x255   : > { %5844 = vst [vmem:[#allocation59_spill] sm:$0xff] %v4037_v40 }
 0x25a   : > { %v4041_v61 = vpop.permute.xlu2 %1269 }
 0x25b   : > { %5846 = vst [vmem:[#allocation61_spill] sm:$0xff] %v4041_v61 }
 0x25c   : > { %v4043_v39 = vpop.permute.xlu1 %1277 }
 0x25d   : > { %5847 = vst [vmem:[#allocation62_spill] sm:$0xff] %v4043_v39 }
 0x262   : > { %v4047_v25 = vpop.permute.xlu2 %1304 }
 0x265   : > { %v1338_v56 = vpop.permute.xlu1 %1337 }
 0x266   : > { %v1368_v37 = vmul.f32 %v1338_v56, %v3650_v9  ;;  %v1369_v7 = vmul.f32 %v1338_v56, %v3652_v12  ;;  %v1373_v12 = vmul.f32 %v1346_v52, %v3692_v50 }
 0x268   : > { %1402 = vrot.lane.b32.xlu2 %v1369_v7, %s3396_s27  ;;  %1400 = vrot.lane.b32.xlu1 %v1368_v37, %s3396_s27 }
 0x26a   : > { %v1342_v46 = vpop.permute.xlu2 %1341 }
 0x26b   : > { %v1370_v3 = vmul.f32 %v1342_v46, %v3669_v0  ;;  %v1371_v49 = vmul.f32 %v1342_v46, %v3672_v6  ;;  %v1366_v46 = vpop.permute.xlu0 %1365 }
 0x26c   : > { %v1383_v52 = vmul.f32 %v1366_v46, %v3687_v47 }
 0x26d   : > { %1404 = vrot.lane.b32.xlu0 %v1370_v3, %s3396_s27  ;;  %v1350_v9 = vpop.permute.xlu1 %1349 }
 0x26e   : > { %v1374_v0 = vmul.f32 %v1350_v9, %v3708_v2  ;;  %v1375_v7 = vmul.f32 %v1350_v9, %v3712_v8 }
 0x270   : > { %1408 = vrot.lane.b32.xlu2 %v1372_v59, %s3396_s27  ;;  %1406 = vrot.lane.b32.xlu1 %v1371_v49, %s3396_s27 }
 0x272   : > { %v1354_v48 = vpop.permute.xlu2 %1353 }
 0x273   : > { %v1376_v6 = vmul.f32 %v1354_v48, %v3721_v41  ;;  %v1377_v49 = vmul.f32 %v1354_v48, %v3725_v60  ;;  %v1382_v60 = vmul.f32 %v1366_v46, %v3682_v35 }
 0x275   : > { %1410 = vrot.lane.b32.xlu0 %v1373_v12, %s3396_s27  ;;  %v1358_v4 = vpop.permute.xlu1 %1357 }
 0x276   : > { %v1378_v50 = vmul.f32 %v1358_v4, %v3734_v38  ;;  %v1379_v59 = vmul.f32 %v1358_v4, %v3738_v21  ;;  %v4141_v4 = vld [vmem:[#allocation2 + $0x8] sm:$0xff] }
 0x278   : > { %1414 = vrot.lane.b32.xlu2 %v1375_v7, %s3396_s27  ;;  %1412 = vrot.lane.b32.xlu1 %v1374_v0, %s3396_s27 }
 0x27a   : > { %v1362_v3 = vpop.permute.xlu2 %1361 }
 0x27b   : > { %v1380_v37 = vmul.f32 %v1362_v3, %v3664_v58  ;;  %v1381_v41 = vmul.f32 %v1362_v3, %v3667_v63 }
 0x27d   : > { %1416 = vrot.lane.b32.xlu0 %v1376_v6, %s3396_s27 }
 0x280   : > { %1418 = vrot.lane.b32.xlu1 %v1377_v49, %s3396_s27  ;;  %1420 = vrot.lane.b32.xlu2 %v1378_v50, %s3396_s27 }
 0x285   : > { %1422 = vrot.lane.b32.xlu0 %v1379_v59, %s3396_s27 }
 0x288   : > { %1424 = vrot.lane.b32.xlu1 %v1380_v37, %s3396_s27  ;;  %1426 = vrot.lane.b32.xlu2 %v1381_v41, %s3396_s27  ;;  %v4150_v37 = vld [vmem:[#allocation2 + $0x28] sm:$0xff] }
 0x28d   : > { %1428 = vrot.lane.b32.xlu0 %v1382_v60, %s3396_s27 }
 0x290   : > { %1430 = vrot.lane.b32.xlu1 %v1383_v52, %s3396_s27  ;;  %1513 = vperm.xlu2 %3320, %v3531_v15  }
 0x295   : > { %1517 = vperm.xlu0 %3321, %v3592_v31  }
 0x298   : > { %1521 = vperm.xlu1 %3322, %v3548_v19   ;;  %1525 = vperm.xlu2 %3320, %v3543_v18   ;;  %v5848_v19 = vmov 0.0  }
 0x299   : > { %658 = vst.msk [vmem:[#allocation2 + $0x18] sm:$0xff] %vm657_vm3, %v5848_v19 }
 0x29a   : > { %659 = vst.msk [vmem:[#allocation2 + $0x38] sm:$0xff] %vm657_vm3, %v5848_v19 }
 0x29b   : > { %660 = vst.msk [vmem:[#allocation2 + $0x58] sm:$0xff] %vm657_vm3, %v5848_v19 }
 0x29c   : > { %661 = vst.msk [vmem:[#allocation2 + $0x78] sm:$0xff] %vm657_vm3, %v5848_v19 }
 0x29d   : > { %1537 = vperm.xlu0 %3321, %v3561_v22   ;;  %662 = vst.msk [vmem:[#allocation2 + $0x98] sm:$0xff] %vm657_vm3, %v5848_v19 }
 0x29e   : > { %663 = vst.msk [vmem:[#allocation2 + $0xb8] sm:$0xff] %vm657_vm3, %v5848_v19 }
 0x29f   : > { %664 = vst.msk [vmem:[#allocation2 + $0xd8] sm:$0xff] %vm657_vm3, %v5848_v19 }
 0x2a0   : > { %1529 = vperm.xlu1 %3322, %v3599_v32   ;;  %1533 = vperm.xlu2 %3320, %v3566_v23   ;;  %665 = vst.msk [vmem:[#allocation2 + $0xf8] sm:$0xff] %vm657_vm3, %v5848_v19  ;;  %v4155_v19 = vld [vmem:[#allocation2 + $0x48] sm:$0xff]  ;;  %v4160_v51 = vld [vmem:[#allocation2 + $0x18] sm:$0xff] }
 0x2a1   : > { %v4179_v29 = vld [vmem:[#allocation2 + $0x38] sm:$0xff] }
 0x2a2   : > { %v4192_v34 = vld [vmem:[#allocation2 + $0x58] sm:$0xff] }
 0x2a4   : > { %v4222_v1 = vld [vmem:[#allocation2 + $0x98] sm:$0xff] }
 0x2a5   : > { %1570 = vrot.lane.b32.xlu0 %v3625_v36, %s3401_s30 }
 0x2a6   : > { %3325 = vset.pattern.permute.xlu0 %v3402_v11 }
 0x2a8   : > { %1541 = vperm.xlu1 %3322, %v3606_v33   ;;  %1568 = vrot.lane.b32.xlu2 %v3769_v44, %s3401_s30 }
 0x2a9   : > { %3324 = vset.pattern.permute.xlu2 %v3402_v11 }
 0x2b0   : > { %3323 = vset.pattern.permute.xlu1 %v3402_v11 }
 0x2c2   : > { %v4091_v15 = vpop.permute.xlu2 %1402 }
 0x2ca   : > { %v4093_v31 = vpop.permute.xlu2 %1408 }
 0x2d2   : > { %v4111_v18 = vpop.permute.xlu2 %1414 }
 0x2d3   : > { %5849 = vst [vmem:[#allocation63_spill] sm:$0xff] %v4111_v18 }
 0x2da   : > { %v4113_v22 = vpop.permute.xlu2 %1420  ;;  %v4115_v23 = vpop.permute.xlu1 %1400 }
 0x2db   : > { %5850 = vst [vmem:[#allocation64_spill] sm:$0xff] %v4113_v22 }
 0x2df   : > { %v4117_v32 = vpop.permute.xlu0 %1404 }
 0x2e2   : > { %v4119_v33 = vpop.permute.xlu2 %1426  ;;  %v4121_v58 = vpop.permute.xlu1 %1406 }
 0x2e3   : > { %5851 = vst [vmem:[#allocation65_spill] sm:$0xff] %v4119_v33 }
 0x2e7   : > { %v4123_v63 = vpop.permute.xlu0 %1410 }
 0x2ea   : > { %v1514_v35 = vpop.permute.xlu2 %1513  ;;  %v4125_v47 = vpop.permute.xlu1 %1412 }
 0x2eb   : > { %5852 = vst [vmem:[#allocation66_spill] sm:$0xff] %v4125_v47  ;;  %v1544_v49 = vmul.f32 %v1514_v35, %v4141_v4 }
 0x2ef   : > { %v4127_v56 = vpop.permute.xlu0 %1416 }
 0x2f0   : > { %5853 = vst [vmem:[#allocation67_spill] sm:$0xff] %v4127_v56 }
 0x2f2   : > { %v4129_v9 = vpop.permute.xlu2 %1525  ;;  %v4131_v12 = vpop.permute.xlu1 %1418 }
 0x2f3   : > { %5854 = vst [vmem:[#allocation68_spill] sm:$0xff] %v4131_v12 }
 0x2f7   : > { %v4133_v0 = vpop.permute.xlu0 %1422 }
 0x2f8   : > { %5855 = vst [vmem:[#allocation69_spill] sm:$0xff] %v4133_v0 }
 0x2fa   : > { %v4135_v7 = vpop.permute.xlu2 %1533  ;;  %v4137_v48 = vpop.permute.xlu1 %1424 }
 0x2fb   : > { %5856 = vst [vmem:[#allocation70_spill] sm:$0xff] %v4137_v48 }
 0x2ff   : > { %v4139_v6 = vpop.permute.xlu0 %1428 }
 0x300   : > { %5857 = vst [vmem:[#allocation71_spill] sm:$0xff] %v4139_v6 }
 0x302   : > { %v4144_v50 = vpop.permute.xlu2 %1568  ;;  %v4146_v59 = vpop.permute.xlu1 %1430 }
 0x303   : > { %5858 = vst [vmem:[#allocation72_spill] sm:$0xff] %v4146_v59  ;;  %v1577_v3 = vmul.f32 %v4144_v50, %v1544_v49 }
 0x305   : > { %1625 = vrot.lane.b32.xlu1 %v1577_v3, %s3397_s28  ;;  %v4164_v3 = vld [vmem:[#allocation2 + $0x10] sm:$0xff] }
 0x306   : > { %v1545_v24 = vmul.f32 %v1514_v35, %v4164_v3 }
 0x307   : > { %v1518_v41 = vpop.permute.xlu0 %1517 }
 0x308   : > { %v1547_v46 = vmul.f32 %v1518_v41, %v4150_v37  ;;  %v1549_v45 = vmul.f32 %v1518_v41, %v4179_v29 }
 0x30a   : > { %v1580_v60 = vmul.f32 %v4144_v50, %v1547_v46  ;;  %v1522_v52 = vpop.permute.xlu1 %1521  ;;  %v1546_v46 = vmul.f32 %v1514_v35, %v4160_v51 }
 0x30b   : > { %v1550_v17 = vmul.f32 %v1522_v52, %v4155_v19 }
 0x30d   : > { %1631 = vrot.lane.b32.xlu1 %v1580_v60, %s3397_s28  ;;  %v1583_v49 = vmul.f32 %v4144_v50, %v1550_v17  ;;  %v1553_v17 = vmul.f32 %v4129_v9, %v3708_v2 }
 0x30f   : > { %v4158_v54 = vpop.permute.xlu0 %1537  ;;  %v1586_v35 = vmul.f32 %v4144_v50, %v1553_v17 }
 0x312   : > { %v1530_v53 = vpop.permute.xlu1 %1529 }
 0x315   : > { %1637 = vrot.lane.b32.xlu1 %v1583_v49, %s3397_s28 }
 0x317   : > { %v4168_v60 = vpop.permute.xlu0 %1570 }
 0x318   : > { %v1579_v30 = vmul.f32 %v4168_v60, %v1546_v46  ;;  %v4173_v16 = vsel %vm1572_vm4, %v4144_v50, %v4168_v60  ;;  %v4184_v46 = vld [vmem:[#allocation2 + $0x30] sm:$0xff] }
 0x319   : > { %v1578_v49 = vmul.f32 %v4173_v16, %v1545_v24  ;;  %v1548_v2 = vmul.f32 %v1518_v41, %v4184_v46  ;;  %v1556_v24 = vmul.f32 %v1530_v53, %v4187_v55  ;;  %v4200_v41 = vld [vmem:[#allocation2 + $0x50] sm:$0xff] }
 0x31a   : > { %1629 = vrot.lane.b32.xlu0 %v1579_v30, %s3397_s28  ;;  %v1582_v30 = vmul.f32 %v4168_v60, %v1549_v45  ;;  %v1551_v45 = vmul.f32 %v1522_v52, %v4200_v41  ;;  %v1542_v5 = vpop.permute.xlu1 %1541 }
 0x31b   : > { %1627 = vrot.lane.b32.xlu2 %v1578_v49, %s3397_s28  ;;  %v1581_v49 = vmul.f32 %v4173_v16, %v1548_v2  ;;  %v1589_v17 = vmul.f32 %v4144_v50, %v1556_v24  ;;  %v4208_v24 = vld [vmem:[#allocation2 + $0x78] sm:$0xff] }
 0x31c   : > { %v1555_v11 = vmul.f32 %v4129_v9, %v4208_v24 }
 0x31d   : > { %1643 = vrot.lane.b32.xlu1 %v1586_v35, %s3397_s28  ;;  %v1552_v35 = vmul.f32 %v1522_v52, %v4192_v34  ;;  %v4215_v52 = vld [vmem:[#allocation2 + $0xc8] sm:$0xff] }
 0x31f   : > { %v1585_v2 = vmul.f32 %v4168_v60, %v1552_v35  ;;  %v1554_v35 = vmul.f32 %v4129_v9, %v3712_v8  ;;  %v4230_v8 = vld [vmem:[#allocation2 + $0x90] sm:$0xff]  ;;  %v4232_v9 = vld [vmem:[#allocation2 + $0xe8] sm:$0xff] }
 0x320   : > { %v1565_v10 = vmul.f32 %v1542_v5, %v4232_v9 }
 0x322   : > { %1635 = vrot.lane.b32.xlu0 %v1582_v30, %s3397_s28  ;;  %v1559_v30 = vmul.f32 %v4135_v7, %v3734_v38 }
 0x323   : > { %1633 = vrot.lane.b32.xlu2 %v1581_v49, %s3397_s28  ;;  %v1584_v49 = vmul.f32 %v4173_v16, %v1551_v45  ;;  %v1562_v45 = vmul.f32 %v4158_v54, %v4215_v52 }
 0x325   : > { %1649 = vrot.lane.b32.xlu1 %v1589_v17, %s3397_s28  ;;  %v1592_v17 = vmul.f32 %v4144_v50, %v1559_v30  ;;  %v1595_v30 = vmul.f32 %v4144_v50, %v1562_v45  ;;  %v4239_v45 = vld [vmem:[#allocation2 + $0xb8] sm:$0xff] }
 0x32a   : > { %1641 = vrot.lane.b32.xlu0 %v1585_v2, %s3397_s28  ;;  %v1588_v2 = vmul.f32 %v4168_v60, %v1555_v11  ;;  %v1557_v11 = vmul.f32 %v1530_v53, %v4230_v8 }
 0x32b   : > { %1639 = vrot.lane.b32.xlu2 %v1584_v49, %s3397_s28  ;;  %v1587_v49 = vmul.f32 %v4173_v16, %v1554_v35 }
 0x32d   : > { %1655 = vrot.lane.b32.xlu1 %v1592_v17, %s3397_s28  ;;  %v1558_v17 = vmul.f32 %v1530_v53, %v4222_v1  ;;  %v1560_v53 = vmul.f32 %v4135_v7, %v3738_v21 }
 0x32f   : > { %v1591_v35 = vmul.f32 %v4168_v60, %v1558_v17 }
 0x332   : > { %1647 = vrot.lane.b32.xlu0 %v1588_v2, %s3397_s28  ;;  %v1590_v2 = vmul.f32 %v4173_v16, %v1557_v11  ;;  %v1593_v11 = vmul.f32 %v4173_v16, %v1560_v53 }
 0x333   : > { %1645 = vrot.lane.b32.xlu2 %v1587_v49, %s3397_s28  ;;  %v1598_v49 = vmul.f32 %v4144_v50, %v1565_v10  ;;  %v4257_v10 = vld [vmem:[%s5690_s4] sm:$0xff]  ;;  %v4260_v50 = vld [vmem:[#allocation2 + $0xd0] sm:$0xff] }
 0x335   : > { %1661 = vrot.lane.b32.xlu1 %v1595_v30, %s3397_s28  ;;  %v1561_v30 = vmul.f32 %v4135_v7, %v4239_v45 }
 0x337   : > { %v1594_v17 = vmul.f32 %v4168_v60, %v1561_v30  ;;  %v4267_v30 = vld [vmem:[#allocation2 + $0xf8] sm:$0xff] }
 0x33a   : > { %1653 = vrot.lane.b32.xlu0 %v1591_v35, %s3397_s28  ;;  %v4251_v35 = vld [vmem:[#allocation2 + $0xd8] sm:$0xff] }
 0x33b   : > { %1651 = vrot.lane.b32.xlu2 %v1590_v2, %s3397_s28  ;;  %v1564_v7 = vmul.f32 %v4158_v54, %v4251_v35  ;;  %v1563_v2 = vmul.f32 %v4158_v54, %v4260_v50  ;;  %v4279_v54 = vld [vmem:[%s5690_s4 + $0x18] sm:$0xff] }
 0x33d   : > { %1667 = vrot.lane.b32.xlu1 %v1598_v49, %s3397_s28  ;;  %v1597_v49 = vmul.f32 %v4168_v60, %v1564_v7  ;;  %v1596_v53 = vmul.f32 %v4173_v16, %v1563_v2 }
 0x342   : > { %1659 = vrot.lane.b32.xlu0 %v1594_v17, %s3397_s28  ;;  %v4272_v17 = vld [vmem:[#allocation2 + $0xf0] sm:$0xff] }
 0x343   : > { %1657 = vrot.lane.b32.xlu2 %v1593_v11, %s3397_s28  ;;  %v1567_v11 = vmul.f32 %v1542_v5, %v4267_v30  ;;  %v1566_v14 = vmul.f32 %v1542_v5, %v4272_v17  ;;  %v4295_v5 = vld [vmem:[%s5690_s4 + $0x10] sm:$0xff] }
 0x345   : > { %1738 = vperm.xlu1 %3323, %v4257_v10   ;;  %v1600_v7 = vmul.f32 %v4168_v60, %v1567_v11  ;;  %v1599_v2 = vmul.f32 %v4173_v16, %v1566_v14  ;;  %v4301_v14 = vld [vmem:[%s5690_s4 + $0x8] sm:$0xff]  ;;  %v3404_v16 = vmov 7   ;;  %v4308_v60 = vld [vmem:[%s5690_s4 + $0x38] sm:$0xff] }
 0x34a   : > { %1665 = vrot.lane.b32.xlu0 %v1597_v49, %s3397_s28  ;;  %v4289_v49 = vld [vmem:[%s5690_s4 + $0x28] sm:$0xff] }
 0x34b   : > { %1663 = vrot.lane.b32.xlu2 %v1596_v53, %s3397_s28  ;;  %v4314_v53 = vld [vmem:[%s5690_s4 + $0x20] sm:$0xff] }
 0x34d   : > { %1750 = vperm.xlu1 %3323, %v4279_v54  }
 0x352   : > { %1671 = vrot.lane.b32.xlu0 %v1600_v7, %s3397_s28 }
 0x353   : > { %1669 = vrot.lane.b32.xlu2 %v1599_v2, %s3397_s28 }
 0x355   : > { %1758 = vperm.xlu1 %3323, %v4289_v49  }
 0x35a   : > { %1746 = vperm.xlu0 %3325, %v4295_v5  }
 0x35b   : > { %1742 = vperm.xlu2 %3324, %v4301_v14  }
 0x35d   : > { %1793 = vrot.lane.b32.xlu1 %v3580_v28, %s3403_s26  ;;  %v4322_v28 = vld [vmem:[%s5690_s4 + $0x30] sm:$0xff] }
 0x35e   : > { %3327 = vset.pattern.permute.xlu1 %v3404_v16 }
 0x362   : > { %1766 = vperm.xlu0 %3325, %v4308_v60  }
 0x363   : > { %1754 = vperm.xlu2 %3324, %v4314_v53  }
 0x365   : > { %1831 = vperm.xlu1 %3327, %v4301_v14  }
 0x36a   : > { %3326 = vset.pattern.permute.xlu0 %v3404_v16 }
 0x36b   : > { %1827 = vperm.xlu0 %3326, %v4257_v10   ;;  %1762 = vperm.xlu2 %3324, %v4322_v28  }
 0x36d   : > { %1839 = vperm.xlu1 %3327, %v4279_v54  }
 0x373   : > { %1847 = vperm.xlu0 %3326, %v4289_v49   ;;  %1795 = vrot.lane.b32.xlu2 %v3578_v27, %s3403_s26 }
 0x374   : > { %3328 = vset.pattern.permute.xlu2 %v3404_v16 }
 0x375   : > { %v4328_v11 = vpop.permute.xlu2 %1627  ;;  %1851 = vperm.xlu1 %3327, %v4322_v28  }
 0x377   : > { %v4331_v7 = vpop.permute.xlu1 %1625 }
 0x37b   : > { %1835 = vperm.xlu2 %3328, %v4295_v5  }
 0x37d   : > { %v4334_v2 = vpop.permute.xlu2 %1633 }
 0x37f   : > { %v4336_v43 = vpop.permute.xlu1 %1631 }
 0x383   : > { %1843 = vperm.xlu2 %3328, %v4314_v53  }
 0x385   : > { %v4339_v6 = vpop.permute.xlu2 %1639 }
 0x387   : > { %v4341_v59 = vpop.permute.xlu1 %1637 }
 0x38b   : > { %1855 = vperm.xlu2 %3328, %v4308_v60  }
 0x38c   : > { %v4344_v27 = vpop.permute.xlu0 %1629 }
 0x38d   : > { %v4348_v39 = vpop.permute.xlu2 %1645 }
 0x38e   : > { %5860 = vst [vmem:[#allocation74_spill] sm:$0xff] %v4348_v39 }
 0x38f   : > { %v4346_v16 = vpop.permute.xlu1 %1643 }
 0x390   : > { %5859 = vst [vmem:[#allocation73_spill] sm:$0xff] %v4346_v16 }
 0x394   : > { %v4350_v33 = vpop.permute.xlu0 %1635 }
 0x395   : > { %v4354_v20 = vpop.permute.xlu2 %1651 }
 0x396   : > { %5862 = vst [vmem:[#allocation76_spill] sm:$0xff] %v4354_v20 }
 0x397   : > { %v4352_v48 = vpop.permute.xlu1 %1649 }
 0x398   : > { %5861 = vst [vmem:[#allocation75_spill] sm:$0xff] %v4352_v48 }
 0x39c   : > { %v4356_v0 = vpop.permute.xlu0 %1641 }
 0x39d   : > { %v4362_v12 = vpop.permute.xlu2 %1657 }
 0x39e   : > { %5865 = vst [vmem:[#allocation79_spill] sm:$0xff] %v4362_v12 }
 0x39f   : > { %v4358_v22 = vpop.permute.xlu1 %1655 }
 0x3a0   : > { %5863 = vst [vmem:[#allocation77_spill] sm:$0xff] %v4358_v22 }
 0x3a4   : > { %v4360_v61 = vpop.permute.xlu0 %1647 }
 0x3a5   : > { %5864 = vst [vmem:[#allocation78_spill] sm:$0xff] %v4360_v61  ;;  %v4368_v16 = vpop.permute.xlu2 %1663 }
 0x3a6   : > { %5868 = vst [vmem:[#allocation82_spill] sm:$0xff] %v4368_v16 }
 0x3a7   : > { %v4364_v56 = vpop.permute.xlu1 %1661 }
 0x3a8   : > { %5866 = vst [vmem:[#allocation80_spill] sm:$0xff] %v4364_v56 }
 0x3ac   : > { %v4366_v40 = vpop.permute.xlu0 %1653 }
 0x3ad   : > { %5867 = vst [vmem:[#allocation81_spill] sm:$0xff] %v4366_v40  ;;  %v4374_v48 = vpop.permute.xlu2 %1669 }
 0x3ae   : > { %5871 = vst [vmem:[#allocation85_spill] sm:$0xff] %v4374_v48 }
 0x3af   : > { %v4370_v39 = vpop.permute.xlu1 %1667 }
 0x3b0   : > { %5869 = vst [vmem:[#allocation83_spill] sm:$0xff] %v4370_v39 }
 0x3b4   : > { %v4372_v47 = vpop.permute.xlu0 %1659 }
 0x3b5   : > { %5870 = vst [vmem:[#allocation84_spill] sm:$0xff] %v4372_v47  ;;  %v4380_v22 = vpop.permute.xlu2 %1742 }
 0x3b6   : > { %5873 = vst [vmem:[#allocation87_spill] sm:$0xff] %v4380_v22 }
 0x3b7   : > { %v4376_v20 = vpop.permute.xlu1 %1738 }
 0x3bc   : > { %v4378_v18 = vpop.permute.xlu0 %1665 }
 0x3bd   : > { %5872 = vst [vmem:[#allocation86_spill] sm:$0xff] %v4378_v18  ;;  %v4388_v40 = vpop.permute.xlu2 %1754 }
 0x3be   : > { %5877 = vst [vmem:[#allocation91_spill] sm:$0xff] %v4388_v40 }
 0x3bf   : > { %v4384_v12 = vpop.permute.xlu1 %1750 }
 0x3c0   : > { %5875 = vst [vmem:[#allocation89_spill] sm:$0xff] %v4384_v12 }
 0x3c4   : > { %v4382_v61 = vpop.permute.xlu0 %1671 }
 0x3c5   : > { %5874 = vst [vmem:[#allocation88_spill] sm:$0xff] %v4382_v61  ;;  %v4394_v47 = vpop.permute.xlu2 %1762 }
 0x3c6   : > { %5880 = vst [vmem:[#allocation94_spill] sm:$0xff] %v4394_v47 }
 0x3c7   : > { %v4390_v16 = vpop.permute.xlu1 %1758 }
 0x3c8   : > { %5878 = vst [vmem:[#allocation92_spill] sm:$0xff] %v4390_v16 }
 0x3cc   : > { %v4386_v56 = vpop.permute.xlu0 %1746 }
 0x3cd   : > { %5876 = vst [vmem:[#allocation90_spill] sm:$0xff] %v4386_v56  ;;  %v4403_v40 = vpop.permute.xlu2 %1795  ;;  %v4418_v56 = vld [vmem:[#allocation2 + $0x68] sm:$0xff] }
 0x3ce   : > { %5882 = vst [vmem:[#allocation96_spill] sm:$0xff] %v4403_v40 }
 0x3cf   : > { %v4396_v48 = vpop.permute.xlu1 %1793 }
 0x3d0   : > { %5881 = vst [vmem:[#allocation95_spill] sm:$0xff] %v4396_v48 }
 0x3d4   : > { %v4392_v39 = vpop.permute.xlu0 %1766 }
 0x3d5   : > { %5879 = vst [vmem:[#allocation93_spill] sm:$0xff] %v4392_v39 }
 0x3d7   : > { %v1832_v39 = vpop.permute.xlu1 %1831 }
 0x3d8   : > { %v1863_v47 = vmul.f32 %v1832_v39, %v4179_v29  ;;  %v1861_v16 = vmul.f32 %v1832_v39, %v4150_v37  ;;  %v1862_v12 = vmul.f32 %v1832_v39, %v4184_v46 }
 0x3dd   : > { %v1828_v42 = vpop.permute.xlu0 %1827 }
 0x3de   : > { %v1858_v18 = vmul.f32 %v1828_v42, %v4141_v4  ;;  %v1859_v22 = vmul.f32 %v1828_v42, %v4164_v3  ;;  %v1860_v61 = vmul.f32 %v1828_v42, %v4160_v51  ;;  %v1836_v42 = vpop.permute.xlu2 %1835 }
 0x3df   : > { %v1840_v39 = vpop.permute.xlu1 %1839 }
 0x3e0   : > { %1906 = vrot.lane.b32.xlu0 %v1858_v18, %s3396_s27  ;;  %1910 = vrot.lane.b32.xlu2 %v1860_v61, %s3396_s27  ;;  %v1866_v61 = vmul.f32 %v1836_v42, %v4192_v34  ;;  %v1864_v18 = vmul.f32 %v1836_v42, %v4155_v19 }
 0x3e1   : > { %1908 = vrot.lane.b32.xlu1 %v1859_v22, %s3396_s27  ;;  %v1865_v22 = vmul.f32 %v1836_v42, %v4200_v41  ;;  %v3405_v42 = vmov 8  }
 0x3e2   : > { %3329 = vset.pattern.permute.xlu0 %v3405_v42  ;;  %3330 = vset.pattern.permute.xlu1 %v3405_v42 }
 0x3e3   : > { %3331 = vset.pattern.permute.xlu2 %v3405_v42 }
 0x3e7   : > { %v1852_v42 = vpop.permute.xlu1 %1851 }
 0x3e8   : > { %1916 = vrot.lane.b32.xlu2 %v1863_v47, %s3396_s27  ;;  %1912 = vrot.lane.b32.xlu0 %v1861_v16, %s3396_s27  ;;  %v1867_v47 = vmul.f32 %v4418_v56, %v1840_v39  ;;  %v4422_v16 = vld [vmem:[#allocation2 + $0x70] sm:$0xff] }
 0x3e9   : > { %1914 = vrot.lane.b32.xlu1 %v1862_v12, %s3396_s27  ;;  %v1869_v12 = vmul.f32 %v1840_v39, %v4208_v24  ;;  %v1868_v48 = vmul.f32 %v4422_v16, %v1840_v39  ;;  %v1848_v39 = vpop.permute.xlu0 %1847 }
 0x3f0   : > { %1922 = vrot.lane.b32.xlu2 %v1866_v61, %s3396_s27  ;;  %1918 = vrot.lane.b32.xlu0 %v1864_v18, %s3396_s27  ;;  %v1844_v61 = vpop.permute.xlu2 %1843 }
 0x3f1   : > { %1920 = vrot.lane.b32.xlu1 %v1865_v22, %s3396_s27  ;;  %v1870_v18 = vmul.f32 %v1844_v61, %v4187_v55  ;;  %v1872_v22 = vmul.f32 %v1844_v61, %v4222_v1  ;;  %v1871_v40 = vmul.f32 %v1844_v61, %v4230_v8  ;;  %v1876_v61 = vmul.f32 %v1852_v42, %v4215_v52 }
 0x3f8   : > { %1928 = vrot.lane.b32.xlu2 %v1869_v12, %s3396_s27  ;;  %1924 = vrot.lane.b32.xlu0 %v1867_v47, %s3396_s27  ;;  %v1875_v47 = vmul.f32 %v1848_v39, %v4239_v45  ;;  %v1874_v12 = vmul.f32 %v1848_v39, %v3738_v21 }
 0x3f9   : > { %1926 = vrot.lane.b32.xlu1 %v1868_v48, %s3396_s27  ;;  %v1873_v48 = vmul.f32 %v1848_v39, %v3734_v38  ;;  %v1856_v38 = vpop.permute.xlu2 %1855 }
 0x3fa   : > { %v1879_v21 = vmul.f32 %v1856_v38, %v4232_v9  ;;  %v1880_v39 = vmul.f32 %v1856_v38, %v4272_v17 }
 0x400   : > { %1934 = vrot.lane.b32.xlu2 %v1872_v22, %s3396_s27  ;;  %1930 = vrot.lane.b32.xlu0 %v1870_v18, %s3396_s27  ;;  %v1878_v18 = vmul.f32 %v1852_v42, %v4251_v35  ;;  %v1881_v22 = vmul.f32 %v1856_v38, %v4267_v30 }
 0x401   : > { %1932 = vrot.lane.b32.xlu1 %v1871_v40, %s3396_s27  ;;  %v1877_v40 = vmul.f32 %v1852_v42, %v4260_v50 }
 0x408   : > { %1940 = vrot.lane.b32.xlu2 %v1875_v47, %s3396_s27  ;;  %1936 = vrot.lane.b32.xlu0 %v1873_v48, %s3396_s27  ;;  %v5883_v48 = vmov 0  }
 0x409   : > { %1938 = vrot.lane.b32.xlu1 %v1874_v12, %s3396_s27 }
 0x410   : > { %1946 = vrot.lane.b32.xlu2 %v1878_v18, %s3396_s27  ;;  %1942 = vrot.lane.b32.xlu0 %v1876_v61, %s3396_s27 }
 0x411   : > { %1944 = vrot.lane.b32.xlu1 %v1877_v40, %s3396_s27 }
 0x418   : > { %1952 = vrot.lane.b32.xlu2 %v1881_v22, %s3396_s27  ;;  %1948 = vrot.lane.b32.xlu0 %v1879_v21, %s3396_s27 }
 0x419   : > { %1950 = vrot.lane.b32.xlu1 %v1880_v39, %s3396_s27  ;;  %s3407_s27 = smov 112  }
 0x420   : > { %2074 = vrot.lane.b32.xlu2 %v3769_v44, %s3406_s19  ;;  %2019 = vperm.xlu0 %3329, %v4257_v10  }
 0x421   : > { %2023 = vperm.xlu1 %3330, %v4301_v14  }
 0x428   : > { %2027 = vperm.xlu2 %3331, %v4295_v5   ;;  %2031 = vperm.xlu0 %3329, %v4279_v54  }
 0x429   : > { %2076 = vrot.lane.b32.xlu1 %v3625_v36, %s3406_s19 }
 0x430   : > { %2039 = vperm.xlu2 %3331, %v4289_v49   ;;  %2043 = vperm.xlu0 %3329, %v4322_v28  }
 0x431   : > { %2035 = vperm.xlu1 %3330, %v4314_v53  }
 0x438   : > { %3332 = vset.pattern.permute.xlu0 %v5883_v48  ;;  %3333 = vset.pattern.permute.xlu2 %v5883_v48 }
 0x439   : > { %2047 = vperm.xlu1 %3330, %v4308_v60   ;;  %722 = vperm.xlu0 %3332, %v4301_v14  }
 0x43a   : > { %v4469_v44 = vpop.permute.xlu2 %1910 }
 0x441   : > { %737 = vperm.xlu0 %3332, %v4314_v53   ;;  %3334 = vset.pattern.permute.xlu1 %v5883_v48 }
 0x442   : > { %v4472_v36 = vpop.permute.xlu2 %1916 }
 0x449   : > { %752 = vperm.xlu0 %3332, %v4308_v60  }
 0x44a   : > { %v4478_v49 = vpop.permute.xlu2 %1922 }
 0x44b   : > { %5884 = vst [vmem:[#allocation97_spill] sm:$0xff] %v4478_v49 }
 0x452   : > { %v4474_v10 = vpop.permute.xlu0 %1906  ;;  %v4484_v14 = vpop.permute.xlu2 %1928 }
 0x453   : > { %v4476_v54 = vpop.permute.xlu1 %1908  ;;  %5885 = vst [vmem:[#allocation98_spill] sm:$0xff] %v4484_v14 }
 0x45a   : > { %v4480_v5 = vpop.permute.xlu0 %1912  ;;  %v4494_v42 = vpop.permute.xlu2 %1934 }
 0x45b   : > { %v4482_v28 = vpop.permute.xlu1 %1914  ;;  %5890 = vst [vmem:[#allocation103_spill] sm:$0xff] %v4494_v42 }
 0x462   : > { %v4486_v53 = vpop.permute.xlu0 %1918  ;;  %v4500_v40 = vpop.permute.xlu2 %1940 }
 0x463   : > { %5886 = vst [vmem:[#allocation99_spill] sm:$0xff] %v4486_v53  ;;  %v4488_v47 = vpop.permute.xlu1 %1920 }
 0x464   : > { %5887 = vst [vmem:[#allocation100_spill] sm:$0xff] %v4488_v47 }
 0x465   : > { %5893 = vst [vmem:[#allocation106_spill] sm:$0xff] %v4500_v40 }
 0x46a   : > { %v4490_v12 = vpop.permute.xlu0 %1924  ;;  %v4506_v22 = vpop.permute.xlu2 %1946 }
 0x46b   : > { %5888 = vst [vmem:[#allocation101_spill] sm:$0xff] %v4490_v12  ;;  %v4492_v60 = vpop.permute.xlu1 %1926 }
 0x46c   : > { %5889 = vst [vmem:[#allocation102_spill] sm:$0xff] %v4492_v60 }
 0x46d   : > { %5896 = vst [vmem:[#allocation109_spill] sm:$0xff] %v4506_v22 }
 0x472   : > { %v4496_v61 = vpop.permute.xlu0 %1930  ;;  %v4512_v12 = vpop.permute.xlu2 %1952 }
 0x473   : > { %5891 = vst [vmem:[#allocation104_spill] sm:$0xff] %v4496_v61  ;;  %v4498_v18 = vpop.permute.xlu1 %1932 }
 0x474   : > { %5892 = vst [vmem:[#allocation105_spill] sm:$0xff] %v4498_v18 }
 0x475   : > { %5899 = vst [vmem:[#allocation112_spill] sm:$0xff] %v4512_v12 }
 0x47a   : > { %v4502_v38 = vpop.permute.xlu0 %1936  ;;  %v4519_v14 = vpop.permute.xlu2 %2074 }
 0x47b   : > { %5894 = vst [vmem:[#allocation107_spill] sm:$0xff] %v4502_v38  ;;  %v4504_v21 = vpop.permute.xlu1 %1938 }
 0x47c   : > { %5895 = vst [vmem:[#allocation108_spill] sm:$0xff] %v4504_v21 }
 0x482   : > { %v4508_v39 = vpop.permute.xlu0 %1942 }
 0x483   : > { %5897 = vst [vmem:[#allocation110_spill] sm:$0xff] %v4508_v39  ;;  %v4510_v48 = vpop.permute.xlu1 %1944 }
 0x484   : > { %5898 = vst [vmem:[#allocation111_spill] sm:$0xff] %v4510_v48 }
 0x48a   : > { %v4514_v60 = vpop.permute.xlu0 %1948 }
 0x48b   : > { %5900 = vst [vmem:[#allocation113_spill] sm:$0xff] %v4514_v60  ;;  %v4516_v42 = vpop.permute.xlu1 %1950 }
 0x48c   : > { %5901 = vst [vmem:[#allocation114_spill] sm:$0xff] %v4516_v42 }
 0x492   : > { %v2020_v61 = vpop.permute.xlu0 %2019 }
 0x493   : > { %v2050_v18 = vmul.f32 %v2020_v61, %v4141_v4  ;;  %v2024_v40 = vpop.permute.xlu1 %2023  ;;  %v2052_v39 = vmul.f32 %v2020_v61, %v4160_v51  ;;  %v2051_v12 = vmul.f32 %v2020_v61, %v4164_v3 }
 0x494   : > { %v2053_v48 = vmul.f32 %v2024_v40, %v4150_v37  ;;  %v2054_v49 = vmul.f32 %v2024_v40, %v4184_v46 }
 0x495   : > { %v2082_v38 = vmul.f32 %v4519_v14, %v2050_v18 }
 0x496   : > { %v2085_v18 = vmul.f32 %v4519_v14, %v2053_v48 }
 0x497   : > { %2130 = vrot.lane.b32.xlu2 %v2082_v38, %s3397_s28  ;;  %v2028_v38 = vpop.permute.xlu2 %2027 }
 0x498   : > { %v2056_v61 = vmul.f32 %v2028_v38, %v4155_v19 }
 0x49a   : > { %v2032_v48 = vpop.permute.xlu0 %2031 }
 0x49b   : > { %v4526_v22 = vpop.permute.xlu1 %2076 }
 0x49c   : > { %v2084_v60 = vmul.f32 %v4526_v22, %v2052_v39  ;;  %v4532_v42 = vsel %vm657_vm3, %v4519_v14, %v4526_v22  ;;  %v2055_v39 = vmul.f32 %v2024_v40, %v4179_v29 }
 0x49d   : > { %v2083_v21 = vmul.f32 %v4532_v42, %v2051_v12  ;;  %v2086_v47 = vmul.f32 %v4532_v42, %v2054_v49  ;;  %v2088_v12 = vmul.f32 %v4519_v14, %v2056_v61 }
 0x49e   : > { %2134 = vrot.lane.b32.xlu1 %v2084_v60, %s3397_s28  ;;  %v2087_v53 = vmul.f32 %v4526_v22, %v2055_v39  ;;  %v2058_v60 = vmul.f32 %v2028_v38, %v4192_v34 }
 0x49f   : > { %2132 = vrot.lane.b32.xlu0 %v2083_v21, %s3397_s28  ;;  %2136 = vrot.lane.b32.xlu2 %v2085_v18, %s3397_s28  ;;  %v2059_v21 = vmul.f32 %v4418_v56, %v2032_v48  ;;  %v2057_v18 = vmul.f32 %v2028_v38, %v4200_v41 }
 0x4a0   : > { %v2090_v40 = vmul.f32 %v4526_v22, %v2058_v60 }
 0x4a1   : > { %v2089_v39 = vmul.f32 %v4532_v42, %v2057_v18  ;;  %v2091_v49 = vmul.f32 %v4519_v14, %v2059_v21  ;;  %v2040_v21 = vpop.permute.xlu2 %2039 }
 0x4a3   : > { %v2036_v61 = vpop.permute.xlu1 %2035 }
 0x4a6   : > { %2140 = vrot.lane.b32.xlu1 %v2087_v53, %s3397_s28  ;;  %v2061_v53 = vmul.f32 %v2032_v48, %v4208_v24 }
 0x4a7   : > { %2138 = vrot.lane.b32.xlu0 %v2086_v47, %s3397_s28  ;;  %2142 = vrot.lane.b32.xlu2 %v2088_v12, %s3397_s28  ;;  %v2060_v47 = vmul.f32 %v4422_v16, %v2032_v48  ;;  %v2062_v12 = vmul.f32 %v2036_v61, %v4187_v55  ;;  %v2063_v55 = vmul.f32 %v2036_v61, %v4230_v8 }
 0x4a8   : > { %v2093_v38 = vmul.f32 %v4526_v22, %v2061_v53 }
 0x4a9   : > { %v2094_v60 = vmul.f32 %v4519_v14, %v2062_v12  ;;  %v2092_v18 = vmul.f32 %v4532_v42, %v2060_v47  ;;  %v2095_v47 = vmul.f32 %v4532_v42, %v2063_v55  ;;  %v2044_v12 = vpop.permute.xlu0 %2043 }
 0x4ab   : > { %v2048_v55 = vpop.permute.xlu1 %2047 }
 0x4ae   : > { %2146 = vrot.lane.b32.xlu1 %v2090_v40, %s3397_s28  ;;  %v2064_v40 = vmul.f32 %v2036_v61, %v4222_v1  ;;  %v2067_v1 = vmul.f32 %v2040_v21, %v4239_v45  ;;  %v2070_v45 = vmul.f32 %v2044_v12, %v4251_v35  ;;  %v2073_v35 = vmul.f32 %v2048_v55, %v4267_v30 }
 0x4af   : > { %2144 = vrot.lane.b32.xlu0 %v2089_v39, %s3397_s28  ;;  %2148 = vrot.lane.b32.xlu2 %v2091_v49, %s3397_s28  ;;  %v4567_v39 = vld [vmem:[#allocation2 + $0xa8] sm:$0xff]  ;;  %v4615_v30 = vsel %vm949_vm5, %v4047_v25, %v4045_v26 }
 0x4b0   : > { %v2065_v48 = vmul.f32 %v4567_v39, %v2040_v21  ;;  %v2096_v49 = vmul.f32 %v4526_v22, %v2064_v40 }
 0x4b2   : > { %v2097_v53 = vmul.f32 %v4519_v14, %v2065_v48 }
 0x4b6   : > { %2152 = vrot.lane.b32.xlu1 %v2093_v38, %s3397_s28  ;;  %v2068_v38 = vmul.f32 %v2044_v12, %v4215_v52  ;;  %v2069_v52 = vmul.f32 %v2044_v12, %v4260_v50  ;;  %v2072_v50 = vmul.f32 %v2048_v55, %v4272_v17  ;;  %v4605_v12 = vld [vmem:[#allocation2 + $0x10] sm:$0xff]  ;;  %v4618_v17 = vld [vmem:[#allocation2 + $0x20] sm:$0xff] }
 0x4b7   : > { %2150 = vrot.lane.b32.xlu0 %v2092_v18, %s3397_s28  ;;  %2154 = vrot.lane.b32.xlu2 %v2094_v60, %s3397_s28  ;;  %v4579_v60 = vld [vmem:[#allocation2 + $0xb0] sm:$0xff]  ;;  %v2099_v18 = vmul.f32 %v4526_v22, %v2067_v1  ;;  %v4595_v1 = vld [vmem:[#allocation2] sm:$0xff] }
 0x4b8   : > { %v2066_v61 = vmul.f32 %v4579_v60, %v2040_v21  ;;  %v2100_v48 = vmul.f32 %v4519_v14, %v2068_v38  ;;  %v2102_v21 = vmul.f32 %v4526_v22, %v2070_v45  ;;  %v1280_v38 = vmul.f32 %v4595_v1, %v4029_v57  ;;  %v4622_v45 = vld [vmem:[#allocation2 + $0x8] sm:$0xff] }
 0x4ba   : > { %v2098_v40 = vmul.f32 %v4532_v42, %v2066_v61  ;;  %v1282_v61 = vmul.f32 %v4605_v12, %v4029_v57 }
 0x4be   : > { %2158 = vrot.lane.b32.xlu1 %v2096_v49, %s3397_s28  ;;  %v2071_v49 = vmul.f32 %v2048_v55, %v4232_v9  ;;  %v1312_v9 = vmul.f32 %v4047_v25, %v1280_v38  ;;  %v1283_v55 = vmul.f32 %v4618_v17, %v4033_v62 }
 0x4bf   : > { %2156 = vrot.lane.b32.xlu0 %v2095_v47, %s3397_s28  ;;  %2160 = vrot.lane.b32.xlu2 %v2097_v53, %s3397_s28  ;;  %v2101_v47 = vmul.f32 %v4532_v42, %v2069_v52  ;;  %v1432_v52 = vsel %vm949_vm5, %v4115_v23, %v4091_v15 }
 0x4c0   : > { %v2103_v53 = vmul.f32 %v4519_v14, %v2071_v49  ;;  %v1464_v14 = vadd.f32 %v4115_v23, %v1312_v9 }
 0x4c6   : > { %2164 = vrot.lane.b32.xlu1 %v2099_v18, %s3397_s28  ;;  %v2105_v18 = vmul.f32 %v4526_v22, %v2073_v35  ;;  %v1281_v22 = vmul.f32 %v4622_v45, %v4029_v57  ;;  %v1674_v57 = vsel %vm1183_vm6, %v4328_v11, %v4344_v27  ;;  %v4648_v27 = vld [vmem:[#allocation2 + $0x28] sm:$0xff] }
 0x4c7   : > { %2162 = vrot.lane.b32.xlu0 %v2098_v40, %s3397_s28  ;;  %2166 = vrot.lane.b32.xlu2 %v2100_v48, %s3397_s28  ;;  %v1713_v40 = vadd.f32 %v4331_v7, %v1464_v14  ;;  %v2104_v48 = vmul.f32 %v4532_v42, %v2072_v50  ;;  %v1314_v42 = vmul.f32 %v4045_v26, %v1282_v61  ;;  %v4643_v14 = vld [vmem:[#allocation2 + $0x30] sm:$0xff] }
 0x4c8   : > { %v1313_v49 = vmul.f32 %v4615_v30, %v1281_v22  ;;  %v1285_v61 = vmul.f32 %v4643_v14, %v4033_v62 }
 0x4ca   : > { %v1465_v38 = vadd.f32 %v1432_v52, %v1313_v49 }
 0x4ce   : > { %2170 = vrot.lane.b32.xlu1 %v2102_v21, %s3397_s28  ;;  %v1315_v21 = vmul.f32 %v4047_v25, %v1283_v55 }
 0x4cf   : > { %2168 = vrot.lane.b32.xlu0 %v2101_v47, %s3397_s28  ;;  %2172 = vrot.lane.b32.xlu2 %v2103_v53, %s3397_s28  ;;  %v1466_v53 = vadd.f32 %v4091_v15, %v1314_v42  ;;  %v1673_v47 = vsel %vm1183_vm6, %v4331_v7, %v4328_v11  ;;  %v1284_v15 = vmul.f32 %v4648_v27, %v4033_v62  ;;  %v4652_v11 = vld [vmem:[#allocation2 + $0x40] sm:$0xff] }
 0x4d0   : > { %v1467_v35 = vadd.f32 %v4117_v32, %v1315_v21  ;;  %v1714_v50 = vadd.f32 %v1673_v47, %v1465_v38  ;;  %v1286_v7 = vmul.f32 %v4652_v11, %v4031_v13  ;;  %v1676_v62 = vsel %vm1183_vm6, %v4334_v2, %v4350_v33  ;;  %v4672_v21 = vld [vmem:[#allocation2 + $0x50] sm:$0xff]  ;;  %v4678_v33 = vld [vmem:[#allocation2 + $0x48] sm:$0xff] }
 0x4d1   : > { %v1715_v9 = vadd.f32 %v1674_v57, %v1466_v53  ;;  %v1316_v55 = vmul.f32 %v4615_v30, %v1284_v15  ;;  %v1675_v42 = vsel %vm1183_vm6, %v4336_v43, %v4334_v2  ;;  %v1434_v2 = vsel %vm949_vm5, %v4093_v31, %v4123_v63 }
 0x4d2   : > { %v1716_v23 = vadd.f32 %v4336_v43, %v1467_v35  ;;  %v1678_v35 = vsel %vm1183_vm6, %v4339_v6, %v4356_v0 }
 0x4d6   : > { %2176 = vrot.lane.b32.xlu1 %v2105_v18, %s3397_s28  ;;  %v1317_v18 = vmul.f32 %v4045_v26, %v1285_v61 }
 0x4d7   : > { %2174 = vrot.lane.b32.xlu0 %v2104_v48, %s3397_s28  ;;  %2266 = vrot.lane.b32.xlu2 %v1713_v40, %s3407_s27  ;;  %v1433_v40 = vsel %vm949_vm5, %v4117_v32, %v4121_v58  ;;  %v1318_v48 = vmul.f32 %v4047_v25, %v1286_v7  ;;  %v1288_v32 = vmul.f32 %v4672_v21, %v4031_v13  ;;  %s3408_s28 = smov 96  }
 0x4d8   : > { %v1469_v22 = vadd.f32 %v4121_v58, %v1317_v18  ;;  %v1468_v49 = vadd.f32 %v1433_v40, %v1316_v55  ;;  %v1287_v58 = vmul.f32 %v4678_v33, %v4031_v13  ;;  %v1677_v13 = vsel %vm1183_vm6, %v4341_v59, %v4339_v6  ;;  %v5902_v18 = vld [vmem:[#allocation96_spill] sm:$0xff]  ;;  %v5903_v6 = vld [vmem:[#allocation95_spill] sm:$0xff] }
 0x4d9   : > { %v1470_v52 = vadd.f32 %v4093_v31, %v1318_v48  ;;  %v1320_v43 = vmul.f32 %v4045_v26, %v1288_v32  ;;  %v4698_v31 = vpop.permute.xlu0 %722  ;;  %v1769_v48 = vmul.f32 %v4376_v20, %v4141_v4  ;;  %v1770_v55 = vmul.f32 %v4376_v20, %v4164_v3  ;;  %v5904_v32 = vld [vmem:[#allocation87_spill] sm:$0xff] }
 0x4da   : > { %v1718_v57 = vadd.f32 %v1676_v62, %v1469_v22  ;;  %v1717_v53 = vadd.f32 %v1675_v42, %v1468_v49  ;;  %v1319_v38 = vmul.f32 %v4615_v30, %v1287_v58  ;;  %v1954_v22 = vsel %vm949_vm5, %v4474_v10, %v4476_v54 }
 0x4db   : > { %v1719_v47 = vadd.f32 %v4341_v59, %v1470_v52  ;;  %v4708_v59 = vsel %vm1797_vm7, %v5903_v6, %v5902_v18  ;;  %v1802_v52 = vmul.f32 %v5903_v6, %v1769_v48 }
 0x4dc   : > { %v1803_v49 = vmul.f32 %v4708_v59, %v1770_v55 }
 0x4dd   : > { %v1994_v3 = vadd.f32 %v1954_v22, %v1802_v52 }
 0x4de   : > { %2270 = vrot.lane.b32.xlu1 %v1715_v9, %s3407_s27  ;;  %v1472_v9 = vadd.f32 %v4123_v63, %v1320_v43  ;;  %v1771_v63 = vmul.f32 %v4376_v20, %v4160_v51  ;;  %v1955_v51 = vsel %vm949_vm5, %v4476_v54, %v4469_v44  ;;  %v1774_v20 = vmul.f32 %v5904_v32, %v4179_v29 }
 0x4df   : > { %2268 = vrot.lane.b32.xlu0 %v1714_v50, %s3407_s27  ;;  %2272 = vrot.lane.b32.xlu2 %v1716_v23, %s3407_s27  ;;  %v1471_v50 = vadd.f32 %v1434_v2, %v1319_v38  ;;  %v1773_v2 = vmul.f32 %v5904_v32, %v4184_v46  ;;  %v1956_v38 = vsel %vm949_vm5, %v4480_v5, %v4482_v28 }
 0x4e0   : > { %v1721_v23 = vadd.f32 %v1678_v35, %v1472_v9  ;;  %v1804_v62 = vmul.f32 %v5902_v18, %v1771_v63  ;;  %v1807_v29 = vmul.f32 %v5902_v18, %v1774_v20  ;;  %v1957_v35 = vsel %vm949_vm5, %v4482_v28, %v4472_v36  ;;  %v5909_v20 = vld [vmem:[#allocation74_spill] sm:$0xff] }
 0x4e1   : > { %v1720_v61 = vadd.f32 %v1677_v13, %v1471_v50  ;;  %v4700_v15 = vpop.permute.xlu0 %737  ;;  %v1806_v46 = vmul.f32 %v4708_v59, %v1773_v2 }
 0x4e2   : > { %v1996_v42 = vadd.f32 %v4469_v44, %v1804_v62  ;;  %v1772_v44 = vmul.f32 %v5904_v32, %v4150_v37  ;;  %v1999_v37 = vadd.f32 %v4472_v36, %v1807_v29  ;;  %v4750_v36 = vld [vmem:[#allocation2 + $0x60] sm:$0xff]  ;;  %v5908_v32 = vld [vmem:[#allocation78_spill] sm:$0xff] }
 0x4e3   : > { %v1998_v63 = vadd.f32 %v1957_v35, %v1806_v46  ;;  %v5911_v29 = vld [vmem:[#allocation90_spill] sm:$0xff] }
 0x4e4   : > { %v1805_v13 = vmul.f32 %v5903_v6, %v1772_v44  ;;  %v1776_v46 = vmul.f32 %v5911_v29, %v4200_v41 }
 0x4e6   : > { %2276 = vrot.lane.b32.xlu1 %v1718_v57, %s3407_s27  ;;  %v1995_v57 = vadd.f32 %v1955_v51, %v1803_v49  ;;  %v5907_v49 = vld [vmem:[#allocation66_spill] sm:$0xff] }
 0x4e7   : > { %2274 = vrot.lane.b32.xlu0 %v1717_v53, %s3407_s27  ;;  %2278 = vrot.lane.b32.xlu2 %v1719_v47, %s3407_s27 }
 0x4e9   : > { %v4702_v0 = vpop.permute.xlu0 %752 }
 0x4ee   : > { %2282 = vrot.lane.b32.xlu1 %v1721_v23, %s3407_s27  ;;  %v5905_v23 = vld [vmem:[#allocation58_spill] sm:$0xff] }
 0x4ef   : > { %2280 = vrot.lane.b32.xlu0 %v1720_v61, %s3407_s27  ;;  %v1291_v61 = vmul.f32 %v4422_v16, %v5905_v23  ;;  %v1289_v51 = vmul.f32 %v4750_v36, %v5905_v23 }
 0x4f1   : > { %v2131_v7 = vpop.permute.xlu2 %2130  ;;  %v1323_v52 = vmul.f32 %v4045_v26, %v1291_v61 }
 0x4f9   : > { %v2137_v40 = vpop.permute.xlu2 %2136 }
 0x501   : > { %v2143_v9 = vpop.permute.xlu2 %2142 }
 0x510   : > { %v2135_v4 = vpop.permute.xlu1 %2134 }
 0x511   : > { %v2220_v53 = vadd.f32 %v2135_v4, %v1996_v42  ;;  %v2133_v47 = vpop.permute.xlu0 %2132  ;;  %v1290_v42 = vmul.f32 %v4418_v56, %v5905_v23 }
 0x512   : > { %v2178_v10 = vsel %vm1183_vm6, %v2131_v7, %v2133_v47  ;;  %v2179_v58 = vsel %vm1183_vm6, %v2133_v47, %v2135_v4  ;;  %v1997_v7 = vadd.f32 %v1956_v38, %v1805_v13  ;;  %v1777_v38 = vmul.f32 %v5911_v29, %v4192_v34  ;;  %v5912_v34 = vld [vmem:[#allocation100_spill] sm:$0xff] }
 0x513   : > { %v2218_v43 = vadd.f32 %v2178_v10, %v1994_v3  ;;  %v2219_v54 = vadd.f32 %v2179_v58, %v1995_v57  ;;  %2407 = vrot.lane.b32.xlu1 %v2220_v53, %s3408_s28  ;;  %v1680_v3 = vsel %vm1183_vm6, %v5909_v20, %v5908_v32  ;;  %v1321_v53 = vmul.f32 %v4047_v25, %v1289_v51  ;;  %v5910_v10 = vld [vmem:[#allocation73_spill] sm:$0xff] }
 0x514   : > { %v1322_v47 = vmul.f32 %v4615_v30, %v1290_v42  ;;  %v1679_v58 = vsel %vm1183_vm6, %v5910_v10, %v5909_v20  ;;  %v1775_v13 = vmul.f32 %v5911_v29, %v4155_v19  ;;  %v4821_v29 = vld [vmem:[#allocation2 + $0x88] sm:$0xff] }
 0x515   : > { %2403 = vrot.lane.b32.xlu2 %v2218_v43, %s3408_s28  ;;  %2405 = vrot.lane.b32.xlu0 %v2219_v54, %s3408_s28  ;;  %v4771_v43 = vpop.permute.xlu2 %2148  ;;  %v1473_v54 = vadd.f32 %v5907_v49, %v1321_v53  ;;  %v4807_v53 = vld [vmem:[#allocation2 + $0x90] sm:$0xff] }
 0x516   : > { %v1808_v41 = vmul.f32 %v5903_v6, %v1775_v13 }
 0x517   : > { %v1722_v35 = vadd.f32 %v5910_v10, %v1473_v54  ;;  %v5917_v10 = vld [vmem:[#allocation75_spill] sm:$0xff] }
 0x518   : > { %v2141_v50 = vpop.permute.xlu1 %2140  ;;  %v2516_v54 = vld [vmem:[%s5691_s5] sm:$0xff] }
 0x519   : > { %v2223_v48 = vadd.f32 %v2141_v50, %v1999_v37  ;;  %v2139_v55 = vpop.permute.xlu0 %2138 }
 0x51a   : > { %v2180_v5 = vsel %vm1183_vm6, %v2137_v40, %v2139_v55  ;;  %v2181_v62 = vsel %vm1183_vm6, %v2139_v55, %v2141_v50  ;;  %v5906_v40 = vld [vmem:[#allocation63_spill] sm:$0xff]  ;;  %v1810_v50 = vmul.f32 %v5902_v18, %v1777_v38 }
 0x51b   : > { %v2221_v28 = vadd.f32 %v2180_v5, %v1997_v7  ;;  %v2222_v22 = vadd.f32 %v2181_v62, %v1998_v63  ;;  %2413 = vrot.lane.b32.xlu1 %v2223_v48, %s3408_s28  ;;  %v1435_v4 = vsel %vm949_vm5, %v5907_v49, %v5906_v40  ;;  %v1475_v57 = vadd.f32 %v5906_v40, %v1323_v52  ;;  %v5913_v7 = vld [vmem:[#allocation99_spill] sm:$0xff]  ;;  %v5914_v48 = vld [vmem:[#allocation97_spill] sm:$0xff] }
 0x51c   : > { %v1474_v44 = vadd.f32 %v1435_v4, %v1322_v47  ;;  %v1958_v63 = vsel %vm949_vm5, %v5913_v7, %v5912_v34  ;;  %v1959_v19 = vsel %vm949_vm5, %v5912_v34, %v5914_v48  ;;  %v2002_v55 = vadd.f32 %v5914_v48, %v1810_v50  ;;  %v4798_v40 = vld [vmem:[#allocation2 + $0x80] sm:$0xff]  ;;  %v5920_v34 = vld [vmem:[#allocation81_spill] sm:$0xff]  ;;  %v5921_v7 = vld [vmem:[#allocation76_spill] sm:$0xff] }
 0x51d   : > { %2409 = vrot.lane.b32.xlu2 %v2221_v28, %s3408_s28  ;;  %2411 = vrot.lane.b32.xlu0 %v2222_v22, %s3408_s28  ;;  %v1724_v2 = vadd.f32 %v1680_v3, %v1475_v57  ;;  %v1809_v5 = vmul.f32 %v4708_v59, %v1776_v46  ;;  %v2000_v22 = vadd.f32 %v1958_v63, %v1808_v41  ;;  %v4796_v52 = vpop.permute.xlu2 %2154  ;;  %v5915_v49 = vld [vmem:[#allocation59_spill] sm:$0xff]  ;;  %v5922_v48 = vld [vmem:[#allocation98_spill] sm:$0xff] }
 0x51e   : > { %v1723_v37 = vadd.f32 %v1679_v58, %v1474_v44  ;;  %v1292_v4 = vmul.f32 %v4798_v40, %v5915_v49  ;;  %v1294_v47 = vmul.f32 %v4807_v53, %v5915_v49  ;;  %v2517_v44 = vld [vmem:[%s5691_s5 + $0x8] sm:$0xff]  ;;  %v1293_v38 = vmul.f32 %v4821_v29, %v5915_v49 }
 0x51f   : > { %v2001_v51 = vadd.f32 %v1959_v19, %v1809_v5  ;;  %v1682_v63 = vsel %vm1183_vm6, %v5921_v7, %v5920_v34  ;;  %v5923_v19 = vld [vmem:[#allocation102_spill] sm:$0xff] }
 0x520   : > { %v2147_v23 = vpop.permute.xlu1 %2146  ;;  %v1324_v3 = vmul.f32 %v4047_v25, %v1292_v4  ;;  %v1325_v41 = vmul.f32 %v4615_v30, %v1293_v38 }
 0x521   : > { %v2145_v61 = vpop.permute.xlu0 %2144  ;;  %v2226_v42 = vadd.f32 %v2147_v23, %v2002_v55  ;;  %v1961_v55 = vsel %vm949_vm5, %v5923_v19, %v5922_v48 }
 0x522   : > { %v2182_v62 = vsel %vm1183_vm6, %v2143_v9, %v2145_v61  ;;  %v2183_v28 = vsel %vm1183_vm6, %v2145_v61, %v2147_v23  ;;  %v5916_v9 = vld [vmem:[#allocation67_spill] sm:$0xff]  ;;  %v5919_v23 = vld [vmem:[#allocation68_spill] sm:$0xff] }
 0x523   : > { %2288 = vrot.lane.b32.xlu1 %v1724_v2, %s3407_s27  ;;  %v2224_v32 = vadd.f32 %v2182_v62, %v2000_v22  ;;  %v2225_v20 = vadd.f32 %v2183_v28, %v2001_v51  ;;  %v1476_v57 = vadd.f32 %v5916_v9, %v1324_v3  ;;  %v1436_v61 = vsel %vm949_vm5, %v5916_v9, %v5919_v23  ;;  %v5924_v3 = vld [vmem:[#allocation61_spill] sm:$0xff] }
 0x524   : > { %v1681_v62 = vsel %vm1183_vm6, %v5917_v10, %v5921_v7  ;;  %v1477_v22 = vadd.f32 %v1436_v61, %v1325_v41  ;;  %v1296_v34 = vmul.f32 %v4567_v39, %v5924_v3  ;;  %v5927_v7 = vld [vmem:[#allocation77_spill] sm:$0xff] }
 0x525   : > { %2284 = vrot.lane.b32.xlu2 %v1722_v35, %s3407_s27  ;;  %2286 = vrot.lane.b32.xlu0 %v1723_v37, %s3407_s27  ;;  %v1725_v58 = vadd.f32 %v5917_v10, %v1476_v57  ;;  %v4819_v2 = vpop.permute.xlu2 %2160  ;;  %v1326_v35 = vmul.f32 %v4045_v26, %v1294_v47  ;;  %v5918_v37 = vld [vmem:[#allocation89_spill] sm:$0xff] }
 0x526   : > { %v1779_v13 = vmul.f32 %v4422_v16, %v5918_v37  ;;  %v1726_v49 = vadd.f32 %v1681_v62, %v1477_v22  ;;  %v1780_v4 = vmul.f32 %v5918_v37, %v4208_v24  ;;  %v1778_v57 = vmul.f32 %v4418_v56, %v5918_v37  ;;  %v5925_v10 = vld [vmem:[#allocation101_spill] sm:$0xff]  ;;  %v5932_v22 = vld [vmem:[#allocation104_spill] sm:$0xff] }
 0x527   : > { %v1478_v16 = vadd.f32 %v5919_v23, %v1326_v35  ;;  %v1960_v24 = vsel %vm949_vm5, %v5925_v10, %v5923_v19  ;;  %v5926_v35 = vld [vmem:[#allocation64_spill] sm:$0xff]  ;;  %v1297_v10 = vmul.f32 %v4579_v60, %v5924_v3 }
 0x528   : > { %v2153_v46 = vpop.permute.xlu1 %2152  ;;  %v1812_v5 = vmul.f32 %v4708_v59, %v1779_v13  ;;  %v1813_v47 = vmul.f32 %v5902_v18, %v1780_v4 }
 0x529   : > { %v2151_v50 = vpop.permute.xlu0 %2150  ;;  %v1727_v51 = vadd.f32 %v1682_v63, %v1478_v16  ;;  %v5929_v16 = vld [vmem:[#allocation91_spill] sm:$0xff] }
 0x52a   : > { %v2185_v28 = vsel %vm1183_vm6, %v2151_v50, %v2153_v46  ;;  %v2184_v56 = vsel %vm1183_vm6, %v4771_v43, %v2151_v50  ;;  %v1328_v43 = vmul.f32 %v4615_v30, %v1296_v34  ;;  %v3363_v50 = vld [vmem:[#allocation2 + $0x88] sm:$0xff] }
 0x52b   : > { %2419 = vrot.lane.b32.xlu1 %v2226_v42, %s3408_s28  ;;  %v2004_v42 = vadd.f32 %v1961_v55, %v1812_v5  ;;  %v1781_v5 = vmul.f32 %v3363_v50, %v5929_v16  ;;  %v3365_v50 = vld [vmem:[#allocation2 + $0x98] sm:$0xff] }
 0x52d   : > { %2415 = vrot.lane.b32.xlu2 %v2224_v32, %s3408_s28  ;;  %2417 = vrot.lane.b32.xlu0 %v2225_v20, %s3408_s28  ;;  %v2228_v32 = vadd.f32 %v2185_v28, %v2004_v42  ;;  %v4847_v20 = vld [vmem:[#allocation2 + $0xa0] sm:$0xff]  ;;  %v4862_v38 = vpop.permute.xlu2 %2166  ;;  %v5931_v28 = vld [vmem:[#allocation105_spill] sm:$0xff] }
 0x52e   : > { %v1295_v9 = vmul.f32 %v4847_v20, %v5924_v3 }
 0x530   : > { %v2159_v61 = vpop.permute.xlu1 %2158 }
 0x531   : > { %v2157_v55 = vpop.permute.xlu0 %2156 }
 0x532   : > { %v2186_v4 = vsel %vm1183_vm6, %v4796_v52, %v2157_v55  ;;  %v5933_v52 = vld [vmem:[#allocation103_spill] sm:$0xff]  ;;  %v2187_v3 = vsel %vm1183_vm6, %v2157_v55, %v2159_v61 }
 0x533   : > { %2290 = vrot.lane.b32.xlu1 %v1725_v58, %s3407_s27  ;;  %v1327_v58 = vmul.f32 %v4047_v25, %v1295_v9 }
 0x535   : > { %2526 = vperm.xlu2 %3333, %v2516_v54   ;;  %2531 = vperm.xlu0 %3332, %v2517_v44   ;;  %v2005_v54 = vadd.f32 %v5922_v48, %v1813_v47  ;;  %v1811_v44 = vmul.f32 %v5903_v6, %v1778_v57  ;;  %v1479_v37 = vadd.f32 %v5926_v35, %v1327_v58  ;;  %v5928_v48 = vld [vmem:[#allocation69_spill] sm:$0xff]  ;;  %v4887_v57 = vpop.permute.xlu2 %2172 }
 0x536   : > { %v1437_v41 = vsel %vm949_vm5, %v5926_v35, %v5928_v48  ;;  %v2518_v47 = vld [vmem:[%s5691_s5 + $0x10] sm:$0xff] }
 0x537   : > { %v2003_v13 = vadd.f32 %v1960_v24, %v1811_v44  ;;  %v2229_v23 = vadd.f32 %v2153_v46, %v2005_v54  ;;  %v1728_v63 = vadd.f32 %v5927_v7, %v1479_v37  ;;  %v5930_v46 = vld [vmem:[#allocation79_spill] sm:$0xff]  ;;  %v1480_v42 = vadd.f32 %v1437_v41, %v1328_v43  ;;  %v5935_v41 = vld [vmem:[#allocation60_spill] sm:$0xff] }
 0x538   : > { %v1683_v62 = vsel %vm1183_vm6, %v5927_v7, %v5930_v46  ;;  %v1782_v24 = vmul.f32 %v5929_v16, %v4230_v8  ;;  %v4896_v54 = vpop.permute.xlu1 %2164  ;;  %v1963_v44 = vsel %vm949_vm5, %v5931_v28, %v5933_v52  ;;  %v1329_v8 = vmul.f32 %v4045_v26, %v1297_v10  ;;  %v5939_v10 = vld [vmem:[#allocation65_spill] sm:$0xff] }
 0x539   : > { %v2227_v19 = vadd.f32 %v2184_v56, %v2003_v13  ;;  %v4903_v35 = vpop.permute.xlu0 %2162  ;;  %v5934_v13 = vld [vmem:[#allocation84_spill] sm:$0xff] }
 0x53a   : > { %v1815_v56 = vmul.f32 %v4708_v59, %v1782_v24  ;;  %v1481_v34 = vadd.f32 %v5928_v48, %v1329_v8  ;;  %v5941_v8 = vld [vmem:[#allocation92_spill] sm:$0xff] }
 0x53b   : > { %2294 = vrot.lane.b32.xlu1 %v1727_v51, %s3407_s27  ;;  %v1962_v51 = vsel %vm949_vm5, %v5932_v22, %v5931_v28 }
 0x53c   : > { %v2007_v37 = vadd.f32 %v1963_v44, %v1815_v56 }
 0x53d   : > { %2292 = vrot.lane.b32.xlu2 %v1726_v49, %s3407_s27  ;;  %2423 = vrot.lane.b32.xlu0 %v2228_v32, %s3408_s28  ;;  %v1814_v49 = vmul.f32 %v5903_v6, %v1781_v5  ;;  %v1729_v32 = vadd.f32 %v1683_v62, %v1480_v42  ;;  %v1783_v5 = vmul.f32 %v3365_v50, %v5929_v16  ;;  %v4920_v62 = vpop.permute.xlu2 %2266  ;;  %v5936_v42 = vld [vmem:[#allocation70_spill] sm:$0xff] }
 0x53e   : > { %v2231_v7 = vadd.f32 %v2187_v3, %v2007_v37  ;;  %v1784_v37 = vmul.f32 %v4567_v39, %v5941_v8  ;;  %v1438_v39 = vsel %vm949_vm5, %v5936_v42, %v5939_v10 }
 0x53f   : > { %v2006_v9 = vadd.f32 %v1962_v51, %v1814_v49  ;;  %v1816_v49 = vmul.f32 %v5902_v18, %v1783_v5 }
 0x540   : > { %v4928_v22 = vpop.permute.xlu1 %2170 }
 0x541   : > { %v2230_v58 = vadd.f32 %v2186_v4, %v2006_v9  ;;  %v4934_v4 = vpop.permute.xlu0 %2168  ;;  %v5938_v9 = vld [vmem:[#allocation82_spill] sm:$0xff]  ;;  %v2008_v56 = vadd.f32 %v5933_v52, %v1816_v49  ;;  %v1817_v52 = vmul.f32 %v5903_v6, %v1784_v37  ;;  %v1785_v37 = vmul.f32 %v4579_v60, %v5941_v8  ;;  %v5949_v60 = vld [vmem:[#allocation83_spill] sm:$0xff] }
 0x543   : > { %2425 = vrot.lane.b32.xlu1 %v2229_v23, %s3408_s28  ;;  %v1684_v23 = vsel %vm1183_vm6, %v5930_v46, %v5934_v13  ;;  %v4923_v46 = vld [vmem:[#allocation2 + $0xd0] sm:$0xff]  ;;  %v2232_v13 = vadd.f32 %v2159_v61, %v2008_v56  ;;  %v2188_v61 = vsel %vm1183_vm6, %v4819_v2, %v4903_v35  ;;  %v5945_v56 = vld [vmem:[#allocation62_spill] sm:$0xff] }
 0x544   : > { %v1730_v55 = vadd.f32 %v1684_v23, %v1481_v34  ;;  %v1300_v48 = vmul.f32 %v4923_v46, %v5935_v41  ;;  %v5942_v23 = vld [vmem:[#allocation108_spill] sm:$0xff]  ;;  %v5943_v34 = vld [vmem:[#allocation107_spill] sm:$0xff] }
 0x545   : > { %2421 = vrot.lane.b32.xlu2 %v2227_v19, %s3408_s28  ;;  %2296 = vrot.lane.b32.xlu0 %v1728_v63, %s3407_s27  ;;  %v2519_v63 = vld [vmem:[%s5691_s5 + $0x18] sm:$0xff]  ;;  %v4915_v19 = vld [vmem:[#allocation2 + $0xc0] sm:$0xff]  ;;  %v4954_v5 = vpop.permute.xlu2 %2272 }
 0x546   : > { %v1298_v43 = vmul.f32 %v4915_v19, %v5935_v41  ;;  %v1332_v51 = vmul.f32 %v4045_v26, %v1300_v48 }
 0x548   : > { %v1330_v28 = vmul.f32 %v4047_v25, %v1298_v43  ;;  %v1484_v24 = vadd.f32 %v5939_v10, %v1332_v51  ;;  %v4966_v51 = vpop.permute.xlu1 %2176 }
 0x54a   : > { %v1482_v16 = vadd.f32 %v5936_v42, %v1330_v28  ;;  %v4972_v42 = vpop.permute.xlu0 %2174 }
 0x54b   : > { %2298 = vrot.lane.b32.xlu1 %v1729_v32, %s3407_s27  ;;  %v5937_v32 = vld [vmem:[#allocation86_spill] sm:$0xff] }
 0x54d   : > { %2536 = vperm.xlu2 %3333, %v2518_v47   ;;  %2427 = vrot.lane.b32.xlu0 %v2230_v58, %s3408_s28  ;;  %v1686_v47 = vsel %vm1183_vm6, %v5938_v9, %v5937_v32  ;;  %v5940_v58 = vld [vmem:[#allocation80_spill] sm:$0xff]  ;;  %v5944_v32 = vld [vmem:[#allocation106_spill] sm:$0xff] }
 0x54e   : > { %v1731_v44 = vadd.f32 %v5940_v58, %v1482_v16  ;;  %v1733_v3 = vadd.f32 %v1686_v47, %v1484_v24  ;;  %v1685_v16 = vsel %vm1183_vm6, %v5940_v58, %v5938_v9  ;;  %v5946_v9 = vld [vmem:[#allocation72_spill] sm:$0xff]  ;;  %v5947_v58 = vld [vmem:[#allocation71_spill] sm:$0xff] }
 0x553   : > { %2429 = vrot.lane.b32.xlu1 %v2231_v7, %s3408_s28  ;;  %v1964_v7 = vsel %vm949_vm5, %v5943_v34, %v5942_v23  ;;  %v1965_v34 = vsel %vm949_vm5, %v5942_v23, %v5944_v32 }
 0x554   : > { %v2009_v28 = vadd.f32 %v1964_v7, %v1817_v52  ;;  %v2189_v52 = vsel %vm1183_vm6, %v4903_v35, %v4896_v54 }
 0x555   : > { %2300 = vrot.lane.b32.xlu2 %v1730_v55, %s3407_s27  ;;  %2541 = vperm.xlu0 %3332, %v2519_v63   ;;  %v4948_v63 = vld [vmem:[#allocation2 + $0xc8] sm:$0xff]  ;;  %v3368_v55 = vld [vmem:[#allocation2 + $0xb8] sm:$0xff] }
 0x556   : > { %v1299_v43 = vmul.f32 %v4948_v63, %v5935_v41  ;;  %v1786_v50 = vmul.f32 %v3368_v55, %v5941_v8  ;;  %v2233_v24 = vadd.f32 %v2188_v61, %v2009_v28  ;;  %v4992_v55 = vpop.permute.xlu2 %2278  ;;  %v5003_v61 = vld [vmem:[#allocation2 + $0xf0] sm:$0xff] }
 0x558   : > { %v1331_v41 = vmul.f32 %v4615_v30, %v1299_v43  ;;  %v1819_v48 = vmul.f32 %v5902_v18, %v1786_v50  ;;  %v1818_v43 = vmul.f32 %v4708_v59, %v1785_v37  ;;  %v5948_v50 = vld [vmem:[#allocation85_spill] sm:$0xff] }
 0x559   : > { %v1687_v8 = vsel %vm1183_vm6, %v5949_v60, %v5948_v50  ;;  %v5952_v37 = vld [vmem:[#allocation109_spill] sm:$0xff] }
 0x55a   : > { %v1483_v49 = vadd.f32 %v1438_v39, %v1331_v41  ;;  %v2011_v47 = vadd.f32 %v5944_v32, %v1819_v48  ;;  %v2520_v39 = vld [vmem:[%s5691_s5 + $0x20] sm:$0xff]  ;;  %v2010_v41 = vadd.f32 %v1965_v34, %v1818_v43  ;;  %v5007_v48 = vpop.permute.xlu1 %2270 }
 0x55b   : > { %2302 = vrot.lane.b32.xlu1 %v1731_v44, %s3407_s27  ;;  %v4976_v44 = vld [vmem:[#allocation2 + $0xe8] sm:$0xff]  ;;  %v5011_v32 = vld [vmem:[#allocation2 + $0xe0] sm:$0xff] }
 0x55c   : > { %v1732_v10 = vadd.f32 %v1685_v16, %v1483_v49  ;;  %v2235_v2 = vadd.f32 %v4896_v54, %v2011_v47  ;;  %v2234_v16 = vadd.f32 %v2189_v52, %v2010_v41  ;;  %v5009_v49 = vpop.permute.xlu0 %2268  ;;  %v1301_v54 = vmul.f32 %v5011_v32, %v5945_v56  ;;  %v3372_v47 = vld [vmem:[#allocation2 + $0xd0] sm:$0xff] }
 0x55d   : > { %2306 = vrot.lane.b32.xlu0 %v1733_v3, %s3407_s27  ;;  %2431 = vrot.lane.b32.xlu2 %v2232_v13, %s3408_s28  ;;  %v1302_v3 = vmul.f32 %v4976_v44, %v5945_v56  ;;  %v1439_v13 = vsel %vm949_vm5, %v5947_v58, %v5946_v9 }
 0x55f   : > { %v1334_v7 = vmul.f32 %v4615_v30, %v1302_v3  ;;  %v1303_v30 = vmul.f32 %v5003_v61, %v5945_v56 }
 0x561   : > { %v1486_v23 = vadd.f32 %v1439_v13, %v1334_v7  ;;  %v1335_v35 = vmul.f32 %v4045_v26, %v1303_v30  ;;  %v5953_v13 = vld [vmem:[#allocation111_spill] sm:$0xff]  ;;  %v1333_v7 = vmul.f32 %v4047_v25, %v1301_v54  ;;  %v3374_v25 = vld [vmem:[#allocation2 + $0xe8] sm:$0xff] }
 0x562   : > { %v1967_v34 = vsel %vm949_vm5, %v5953_v13, %v5952_v37  ;;  %v5037_v54 = vpop.permute.xlu1 %2276 }
 0x563   : > { %2433 = vrot.lane.b32.xlu1 %v2233_v24, %s3408_s28  ;;  %v1735_v28 = vadd.f32 %v1687_v8, %v1486_v23  ;;  %v5950_v24 = vld [vmem:[#allocation94_spill] sm:$0xff]  ;;  %v1487_v56 = vadd.f32 %v5946_v9, %v1335_v35  ;;  %v2191_v8 = vsel %vm1183_vm6, %v4934_v4, %v4928_v22  ;;  %v1485_v52 = vadd.f32 %v5947_v58, %v1333_v7  ;;  %v3375_v35 = vld [vmem:[#allocation2 + $0xc8] sm:$0xff] }
 0x565   : > { %2304 = vrot.lane.b32.xlu2 %v1732_v10, %s3407_s27  ;;  %2437 = vrot.lane.b32.xlu0 %v2235_v2, %s3408_s28  ;;  %v1788_v10 = vmul.f32 %v3372_v47, %v5950_v24  ;;  %v5951_v2 = vld [vmem:[#allocation88_spill] sm:$0xff]  ;;  %v1734_v41 = vadd.f32 %v5949_v60, %v1485_v52  ;;  %v1787_v47 = vmul.f32 %v3375_v35, %v5950_v24  ;;  %v5955_v60 = vld [vmem:[#allocation110_spill] sm:$0xff] }
 0x566   : > { %v1688_v3 = vsel %vm1183_vm6, %v5948_v50, %v5951_v2  ;;  %v3373_v50 = vld [vmem:[#allocation2 + $0xd8] sm:$0xff]  ;;  %v1966_v2 = vsel %vm949_vm5, %v5955_v60, %v5953_v13  ;;  %v2190_v52 = vsel %vm1183_vm6, %v4862_v38, %v4934_v4  ;;  %v2192_v13 = vsel %vm1183_vm6, %v4887_v57, %v4972_v42  ;;  %v5961_v60 = vld [vmem:[#allocation8_spill] sm:$0xff] }
 0x567   : > { %v1821_v26 = vmul.f32 %v4708_v59, %v1788_v10  ;;  %v1789_v30 = vmul.f32 %v3373_v50, %v5950_v24  ;;  %v5042_v10 = vpop.permute.xlu0 %2274  ;;  %v1820_v24 = vmul.f32 %v5903_v6, %v1787_v47  ;;  %v2193_v57 = vsel %vm1183_vm6, %v4972_v42, %v4966_v51  ;;  %v5959_v47 = vld [vmem:[#allocation3_spill] sm:$0xff]  ;;  %v2521_v42 = vld [vmem:[%s5691_s5 + $0x28] sm:$0xff] }
 0x569   : > { %v2013_v23 = vadd.f32 %v1967_v34, %v1821_v26  ;;  %v1822_v58 = vmul.f32 %v5902_v18, %v1789_v30  ;;  %v5957_v34 = vld [vmem:[#allocation113_spill] sm:$0xff]  ;;  %v2012_v30 = vadd.f32 %v1966_v2, %v1820_v24  ;;  %v5963_v24 = vld [vmem:[#allocation19_spill] sm:$0xff] }
 0x56a   : > { %v5070_v4 = vpop.permute.xlu1 %2282 }
 0x56b   : > { %2546 = vperm.xlu1 %3334, %v2520_v39   ;;  %v1736_v39 = vadd.f32 %v1688_v3, %v1487_v56  ;;  %v5956_v3 = vld [vmem:[#allocation114_spill] sm:$0xff]  ;;  %v2014_v56 = vadd.f32 %v5952_v37, %v1822_v58  ;;  %v757_v58 = vmul.f32 %v4605_v12, %v5959_v47 }
 0x56c   : > { %v1968_v7 = vsel %vm949_vm5, %v5957_v34, %v5956_v3  ;;  %v756_v34 = vmul.f32 %v4622_v45, %v5959_v47  ;;  %v755_v45 = vmul.f32 %v4595_v1, %v5959_v47 }
 0x56d   : > { %2310 = vrot.lane.b32.xlu0 %v1735_v28, %s3407_s27  ;;  %2435 = vrot.lane.b32.xlu2 %v2234_v16, %s3408_s28  ;;  %v5954_v28 = vld [vmem:[#allocation93_spill] sm:$0xff]  ;;  %v2237_v16 = vadd.f32 %v2191_v8, %v2013_v23  ;;  %v2238_v37 = vadd.f32 %v4928_v22, %v2014_v56  ;;  %v5962_v56 = vld [vmem:[#allocation30_spill] sm:$0xff] }
 0x56e   : > { %v1790_v9 = vmul.f32 %v3374_v25, %v5954_v28  ;;  %v951_v12 = vsel %vm949_vm5, %v5963_v24, %v5962_v56 }
 0x56f   : > { %v5028_v43 = vpop.permute.xlu2 %2403 }
 0x570   : > { %v1823_v26 = vmul.f32 %v5903_v6, %v1790_v9  ;;  %v5958_v6 = vld [vmem:[#allocation112_spill] sm:$0xff] }
 0x571   : > { %v1969_v9 = vsel %vm949_vm5, %v5956_v3, %v5958_v6 }
 0x572   : > { %v2015_v23 = vadd.f32 %v1968_v7, %v1823_v26  ;;  %v2522_v7 = vld [vmem:[%s5691_s5 + $0x30] sm:$0xff]  ;;  %v3377_v26 = vld [vmem:[#allocation2 + $0xf8] sm:$0xff] }
 0x573   : > { %2312 = vrot.lane.b32.xlu1 %v1736_v39, %s3407_s27  ;;  %v3376_v39 = vld [vmem:[#allocation2 + $0xf0] sm:$0xff] }
 0x574   : > { %v1791_v50 = vmul.f32 %v3376_v39, %v5954_v28  ;;  %v2239_v25 = vadd.f32 %v2192_v13, %v2015_v23 }
 0x575   : > { %2308 = vrot.lane.b32.xlu2 %v1734_v41, %s3407_s27  ;;  %2441 = vrot.lane.b32.xlu0 %v2237_v16, %s3408_s28  ;;  %v2236_v41 = vadd.f32 %v2190_v52, %v2012_v30  ;;  %v5077_v16 = vpop.permute.xlu0 %2280  ;;  %v1792_v52 = vmul.f32 %v3377_v26, %v5954_v28 }
 0x576   : > { %v1824_v38 = vmul.f32 %v4708_v59, %v1791_v50  ;;  %v5960_v59 = vld [vmem:[#allocation9_spill] sm:$0xff]  ;;  %v5964_v50 = vld [vmem:[#allocation10_spill] sm:$0xff] }
 0x577   : > { %v5055_v8 = vpop.permute.xlu2 %2409  ;;  %v5085_v2 = vsel %vm792_vm8, %v5961_v60, %v5960_v59  ;;  %v799_v39 = vmul.f32 %v5960_v59, %v757_v58  ;;  %v950_v30 = vsel %vm949_vm5, %v5964_v50, %v5963_v24  ;;  %v2523_v58 = vld [vmem:[%s5691_s5 + $0x38] sm:$0xff] }
 0x578   : > { %v2016_v22 = vadd.f32 %v1969_v9, %v1824_v38  ;;  %v798_v13 = vmul.f32 %v5085_v2, %v756_v34  ;;  %v5966_v9 = vld [vmem:[#allocation18_spill] sm:$0xff]  ;;  %v1825_v38 = vmul.f32 %v5902_v18, %v1792_v52  ;;  %v2316_v18 = vsel %vm2314_vm9, %v5009_v49, %v5007_v48 }
 0x579   : > { %v992_v28 = vadd.f32 %v5962_v56, %v799_v39 }
 0x57a   : > { %v2240_v3 = vadd.f32 %v2193_v57, %v2016_v22 }
 0x57b   : > { %2443 = vrot.lane.b32.xlu1 %v2238_v37, %s3408_s28  ;;  %v797_v37 = vmul.f32 %v5961_v60, %v755_v45 }
 0x57d   : > { %2439 = vrot.lane.b32.xlu2 %v2236_v41, %s3408_s28  ;;  %2445 = vrot.lane.b32.xlu0 %v2239_v25, %s3408_s28  ;;  %v991_v41 = vadd.f32 %v951_v12, %v798_v13  ;;  %v5965_v25 = vld [vmem:[#allocation32_spill] sm:$0xff]  ;;  %v990_v47 = vadd.f32 %v950_v30, %v797_v37 }
 0x57e   : > { %v1184_v1 = vsel %vm1183_vm6, %v5966_v9, %v5965_v25 }
 0x57f   : > { %v5079_v35 = vpop.permute.xlu2 %2284  ;;  %v1224_v56 = vadd.f32 %v1184_v1, %v990_v47  ;;  %v758_v47 = vmul.f32 %v4618_v17, %v4698_v31 }
 0x583   : > { %2447 = vrot.lane.b32.xlu1 %v2240_v3, %s3408_s28  ;;  %v5967_v3 = vld [vmem:[#allocation21_spill] sm:$0xff] }
 0x584   : > { %v1185_v34 = vsel %vm1183_vm6, %v5965_v25, %v5967_v3  ;;  %v1226_v24 = vadd.f32 %v5967_v3, %v992_v28  ;;  %v760_v3 = vmul.f32 %v4643_v14, %v4698_v31 }
 0x585   : > { %2551 = vperm.xlu2 %3333, %v2521_v42   ;;  %2556 = vperm.xlu0 %3332, %v2522_v7   ;;  %v2408_v23 = vpop.permute.xlu1 %2407  ;;  %v2017_v42 = vadd.f32 %v5958_v6, %v1825_v38  ;;  %v2315_v7 = vsel %vm2314_vm9, %v4920_v62, %v5009_v49  ;;  %v1225_v12 = vadd.f32 %v1185_v34, %v991_v41 }
 0x586   : > { %v2357_v6 = vadd.f32 %v5007_v48, %v1226_v24  ;;  %v2355_v13 = vadd.f32 %v2315_v7, %v1224_v56 }
 0x587   : > { %v5113_v57 = vpop.permute.xlu2 %2415  ;;  %v2406_v22 = vpop.permute.xlu0 %2405  ;;  %v2241_v26 = vadd.f32 %v4966_v51, %v2017_v42  ;;  %v2356_v62 = vadd.f32 %v2316_v18, %v1225_v12  ;;  %v5968_v18 = vld [vmem:[#allocation5_spill] sm:$0xff] }
 0x588   : > { %v2452_v52 = vsel %vm2451_vm10, %v5028_v43, %v2406_v22  ;;  %v2453_v45 = vsel %vm2451_vm10, %v2406_v22, %v2408_v23  ;;  %v2492_v49 = vadd.f32 %v5028_v43, %v2355_v13  ;;  %v759_v43 = vmul.f32 %v4648_v27, %v4698_v31  ;;  %v5969_v31 = vld [vmem:[#allocation31_spill] sm:$0xff] }
 0x589   : > { %v2493_v50 = vadd.f32 %v2452_v52, %v2356_v62  ;;  %v2494_v30 = vadd.f32 %v2453_v45, %v2357_v6  ;;  %v761_v56 = vmul.f32 %v4652_v11, %v5968_v18  ;;  %v763_v24 = vmul.f32 %v4672_v21, %v5968_v18  ;;  %v5970_v6 = vld [vmem:[#allocation12_spill] sm:$0xff] }
 0x58a   : > { %v762_v27 = vmul.f32 %v4678_v33, %v5968_v18  ;;  %v954_v13 = vsel %vm949_vm5, %v5970_v6, %v5969_v31  ;;  %v800_v11 = vmul.f32 %v5961_v60, %v758_v47  ;;  %v801_v21 = vmul.f32 %v5085_v2, %v759_v43  ;;  %v5976_v18 = vld [vmem:[#allocation20_spill] sm:$0xff]  ;;  %v5980_v6 = vld [vmem:[#allocation34_spill] sm:$0xff] }
 0x58b   : > { %2561 = vperm.xlu1 %3334, %v2523_v58   ;;  %v803_v14 = vmul.f32 %v5961_v60, %v761_v56  ;;  %v802_v62 = vmul.f32 %v5960_v59, %v760_v3 }
 0x58d   : > { %2449 = vrot.lane.b32.xlu2 %v2241_v26, %s3408_s28  ;;  %v5135_v39 = vpop.permute.xlu1 %2413 }
 0x58f   : > { %v2527_v37 = vpop.permute.xlu2 %2526  ;;  %v5138_v51 = vpop.permute.xlu0 %2411 }
 0x590   : > { %v2564_v41 = vadd.f32 %v2527_v37, %v2492_v49  ;;  %v2565_v28 = vadd.f32 %v2527_v37, %v2493_v50  ;;  %v2566_v25 = vadd.f32 %v2527_v37, %v2494_v30  ;;  %v805_v30 = vmul.f32 %v5960_v59, %v763_v24  ;;  %v5971_v37 = vld [vmem:[#allocation41_spill] sm:$0xff]  ;;  %v5977_v24 = vld [vmem:[#allocation38_spill] sm:$0xff] }
 0x592   : > { %v2588_v23 = vadd.f32 3.0, %v2564_v41  ;;  %v2589_v9 = vadd.f32 3.0, %v2565_v28  ;;  %v2590_v1 = vadd.f32 3.0, %v2566_v25 }
 0x594   : > { %v2612_v48 = vmax.f32 %v2588_v23, 0.0  ;;  %v2613_v38 = vmax.f32 %v2589_v9, 0.0  ;;  %v2614_v22 = vmax.f32 %v2590_v1, 0.0  ;;  %v955_v23 = vsel %vm949_vm5, %v5969_v31, %v5971_v37  ;;  %v5972_v9 = vld [vmem:[#allocation25_spill] sm:$0xff]  ;;  %v5973_v1 = vld [vmem:[#allocation11_spill] sm:$0xff] }
 0x595   : > { %v5144_v58 = vpop.permute.xlu1 %2288 }
 0x596   : > { %v2636_v34 = vmin.f32 %v2612_v48, 6.0  ;;  %v2637_v42 = vmin.f32 %v2613_v38, 6.0  ;;  %v2638_v7 = vmin.f32 %v2614_v22, 6.0  ;;  %v952_v48 = vsel %vm949_vm5, %v5973_v1, %v5972_v9 }
 0x597   : > { %v5152_v12 = vpop.permute.xlu2 %2292  ;;  %v5154_v17 = vpop.permute.xlu0 %2286  ;;  %v996_v38 = vadd.f32 %v954_v13, %v803_v14  ;;  %v804_v22 = vmul.f32 %v5085_v2, %v762_v27  ;;  %v993_v47 = vadd.f32 %v952_v48, %v800_v11  ;;  %v5978_v27 = vld [vmem:[#allocation22_spill] sm:$0xff]  ;;  %v5979_v14 = vld [vmem:[#allocation27_spill] sm:$0xff]  ;;  %v1189_v13 = vsel %vm1183_vm6, %v5977_v24, %v5980_v6 }
 0x598   : > { %v2660_v26 = vmul.f32 0.16666667, %v2636_v34  ;;  %v2661_v52 = vmul.f32 0.16666667, %v2637_v42  ;;  %v2662_v45 = vmul.f32 0.16666667, %v2638_v7  ;;  %v2317_v11 = vsel %vm2314_vm9, %v4954_v5, %v5042_v10 }
 0x599   : > { %v997_v3 = vadd.f32 %v955_v23, %v804_v22  ;;  %v5975_v7 = vld [vmem:[#allocation35_spill] sm:$0xff]  ;;  %v2320_v23 = vsel %vm2314_vm9, %v5077_v16, %v5070_v4  ;;  %v2318_v48 = vsel %vm2314_vm9, %v5042_v10, %v5037_v54 }
 0x59a   : > { %v5165_v49 = vmul.f32 %v2660_v26, %v2564_v41  ;;  %v5167_v50 = vmul.f32 %v2661_v52, %v2565_v28  ;;  %v5169_v33 = vmul.f32 %v2662_v45, %v2566_v25  ;;  %v5974_v41 = vld [vmem:[#allocation36_spill] sm:$0xff]  ;;  %v998_v25 = vadd.f32 %v5971_v37, %v805_v30 }
 0x59b   : > { %v953_v28 = vsel %vm949_vm5, %v5972_v9, %v5974_v41  ;;  %v995_v34 = vadd.f32 %v5974_v41, %v802_v62  ;;  %v1186_v56 = vsel %vm1183_vm6, %v5976_v18, %v5975_v7  ;;  %v1188_v26 = vsel %vm1183_vm6, %v5978_v27, %v5977_v24 }
 0x59c   : > { %2732 = vrot.lane.b32.xlu2 %v5165_v49, %s3406_s19  ;;  %2736 = vrot.lane.b32.xlu1 %v5169_v33, %s3406_s19  ;;  %v994_v42 = vadd.f32 %v953_v28, %v801_v21  ;;  %v1187_v31 = vsel %vm1183_vm6, %v5975_v7, %v5979_v14  ;;  %v1230_v21 = vadd.f32 %v1188_v26, %v996_v38 }
 0x59d   : > { %2734 = vrot.lane.b32.xlu0 %v5167_v50, %s3406_s19  ;;  %v2420_v43 = vpop.permute.xlu1 %2419  ;;  %v1227_v62 = vadd.f32 %v1186_v56, %v993_v47  ;;  %v1232_v30 = vadd.f32 %v5980_v6, %v998_v25  ;;  %v2319_v37 = vsel %vm2314_vm9, %v4992_v55, %v5077_v16  ;;  %v1229_v9 = vadd.f32 %v5979_v14, %v995_v34 }
 0x59e   : > { %v1228_v1 = vadd.f32 %v1187_v31, %v994_v42  ;;  %v1231_v5 = vadd.f32 %v1189_v13, %v997_v3  ;;  %v2361_v28 = vadd.f32 %v2319_v37, %v1230_v21  ;;  %v2454_v16 = vsel %vm2451_vm10, %v5055_v8, %v5138_v51 }
 0x59f   : > { %v5196_v52 = vpop.permute.xlu2 %2421  ;;  %v2418_v45 = vpop.permute.xlu0 %2417  ;;  %v2358_v38 = vadd.f32 %v2317_v11, %v1227_v62  ;;  %v2363_v22 = vadd.f32 %v5070_v4, %v1232_v30  ;;  %v2455_v47 = vsel %vm2451_vm10, %v5138_v51, %v5135_v39  ;;  %v2360_v10 = vadd.f32 %v5037_v54, %v1229_v9 }
 0x5a0   : > { %v2456_v41 = vsel %vm2451_vm10, %v5113_v57, %v2418_v45  ;;  %v2457_v55 = vsel %vm2451_vm10, %v2418_v45, %v2420_v43  ;;  %v2362_v25 = vadd.f32 %v2320_v23, %v1231_v5  ;;  %v2359_v3 = vadd.f32 %v2318_v48, %v1228_v1 }
 0x5a1   : > { %v2495_v4 = vadd.f32 %v5055_v8, %v2358_v38  ;;  %v2498_v42 = vadd.f32 %v5113_v57, %v2361_v28  ;;  %v2500_v7 = vadd.f32 %v2457_v55, %v2363_v22  ;;  %v2497_v56 = vadd.f32 %v2455_v47, %v2360_v10 }
 0x5a2   : > { %v2499_v43 = vadd.f32 %v2456_v41, %v2362_v25  ;;  %v2496_v18 = vadd.f32 %v2454_v16, %v2359_v3 }
 0x5a5   : > { %v5229_v34 = vpop.permute.xlu1 %2290 }
 0x5a7   : > { %v2537_v24 = vpop.permute.xlu2 %2536  ;;  %v2532_v27 = vpop.permute.xlu0 %2531 }
 0x5a8   : > { %v2570_v26 = vadd.f32 %v2537_v24, %v2498_v42  ;;  %v2571_v45 = vadd.f32 %v2537_v24, %v2499_v43  ;;  %v2572_v14 = vadd.f32 %v2537_v24, %v2500_v7  ;;  %v2567_v31 = vadd.f32 %v2532_v27, %v2495_v4 }
 0x5a9   : > { %v2568_v39 = vadd.f32 %v2532_v27, %v2496_v18  ;;  %v2569_v51 = vadd.f32 %v2532_v27, %v2497_v56  ;;  %v3378_v27 = vld [vmem:[#allocation2 + $0x70] sm:$0xff] }
 0x5aa   : > { %v2594_v54 = vadd.f32 3.0, %v2570_v26  ;;  %v2591_v6 = vadd.f32 3.0, %v2567_v31  ;;  %v2596_v13 = vadd.f32 3.0, %v2572_v14  ;;  %v2595_v8 = vadd.f32 3.0, %v2571_v45 }
 0x5ab   : > { %v2592_v11 = vadd.f32 3.0, %v2568_v39  ;;  %v2593_v21 = vadd.f32 3.0, %v2569_v51 }
 0x5ac   : > { %v2615_v62 = vmax.f32 %v2591_v6, 0.0  ;;  %v2618_v23 = vmax.f32 %v2594_v54, 0.0  ;;  %v2620_v1 = vmax.f32 %v2596_v13, 0.0  ;;  %v2619_v41 = vmax.f32 %v2595_v8, 0.0 }
 0x5ad   : > { %v2616_v57 = vmax.f32 %v2592_v11, 0.0  ;;  %v2617_v30 = vmax.f32 %v2593_v21, 0.0  ;;  %v5233_v37 = vpop.permute.xlu1 %2294  ;;  %v5982_v11 = vld [vmem:[#allocation37_spill] sm:$0xff] }
 0x5ae   : > { %v2639_v9 = vmin.f32 %v2615_v62, 6.0  ;;  %v2642_v16 = vmin.f32 %v2618_v23, 6.0  ;;  %v2644_v47 = vmin.f32 %v2620_v1, 6.0  ;;  %v2643_v42 = vmin.f32 %v2619_v41, 6.0  ;;  %v5983_v21 = vld [vmem:[#allocation13_spill] sm:$0xff]  ;;  %v5984_v62 = vld [vmem:[#allocation44_spill] sm:$0xff] }
 0x5af   : > { %v2640_v48 = vmin.f32 %v2616_v57, 6.0  ;;  %v2641_v5 = vmin.f32 %v2617_v30, 6.0  ;;  %v5235_v38 = vpop.permute.xlu2 %2300  ;;  %v2424_v22 = vpop.permute.xlu0 %2423  ;;  %v956_v8 = vsel %vm949_vm5, %v5983_v21, %v5982_v11  ;;  %v957_v57 = vsel %vm949_vm5, %v5982_v11, %v5984_v62 }
 0x5b0   : > { %v2663_v55 = vmul.f32 0.16666667, %v2639_v9  ;;  %v2666_v7 = vmul.f32 0.16666667, %v2642_v16  ;;  %v2668_v18 = vmul.f32 0.16666667, %v2644_v47 }
 0x5b1   : > { %v2664_v28 = vmul.f32 0.16666667, %v2640_v48  ;;  %v2665_v25 = vmul.f32 0.16666667, %v2641_v5  ;;  %v2667_v6 = vmul.f32 0.16666667, %v2643_v42 }
 0x5b2   : > { %v5237_v10 = vmul.f32 %v2663_v55, %v2567_v31  ;;  %v5981_v31 = vld [vmem:[#allocation4_spill] sm:$0xff]  ;;  %v5263_v30 = vmul.f32 %v2666_v7, %v2570_v26  ;;  %v5265_v23 = vmul.f32 %v2668_v18, %v2572_v14  ;;  %v2321_v7 = vsel %vm2314_vm9, %v5079_v35, %v5154_v17 }
 0x5b3   : > { %v5239_v3 = vmul.f32 %v2664_v28, %v2568_v39  ;;  %v5241_v4 = vmul.f32 %v2665_v25, %v2569_v51  ;;  %v766_v39 = vmul.f32 %v3378_v27, %v5981_v31  ;;  %v3379_v51 = vld [vmem:[#allocation2 + $0x68] sm:$0xff]  ;;  %v764_v13 = vmul.f32 %v4750_v36, %v5981_v31 }
 0x5b4   : > { %2738 = vrot.lane.b32.xlu2 %v5237_v10, %s3406_s19  ;;  %v765_v54 = vmul.f32 %v3379_v51, %v5981_v31  ;;  %v5270_v5 = vmul.f32 %v2667_v6, %v2571_v45  ;;  %v5985_v45 = vld [vmem:[#allocation42_spill] sm:$0xff]  ;;  %v5986_v25 = vld [vmem:[#allocation24_spill] sm:$0xff]  ;;  %v2322_v18 = vsel %vm2314_vm9, %v5154_v17, %v5144_v58  ;;  %v2458_v51 = vsel %vm2451_vm10, %v5196_v52, %v2424_v22 }
 0x5b5   : > { %2742 = vrot.lane.b32.xlu1 %v5241_v4, %s3406_s19  ;;  %v2426_v43 = vpop.permute.xlu1 %2425  ;;  %2740 = vrot.lane.b32.xlu0 %v5239_v3, %s3406_s19  ;;  %v806_v9 = vmul.f32 %v5961_v60, %v764_v13  ;;  %v808_v1 = vmul.f32 %v5960_v59, %v766_v39  ;;  %v1190_v16 = vsel %vm1183_vm6, %v5986_v25, %v5985_v45  ;;  %v5987_v47 = vld [vmem:[#allocation40_spill] sm:$0xff] }
 0x5b6   : > { %v807_v48 = vmul.f32 %v5085_v2, %v765_v54  ;;  %v1191_v42 = vsel %vm1183_vm6, %v5985_v45, %v5987_v47  ;;  %v2459_v54 = vsel %vm2451_vm10, %v2424_v22, %v2426_v43  ;;  %v768_v22 = vmul.f32 %v4821_v29, %v4700_v15 }
 0x5b7   : > { %v5249_v56 = vpop.permute.xlu0 %2296  ;;  %v5251_v24 = vpop.permute.xlu2 %2431  ;;  %v999_v26 = vadd.f32 %v956_v8, %v806_v9  ;;  %v1001_v14 = vadd.f32 %v5984_v62, %v808_v1 }
 0x5b8   : > { %v1000_v41 = vadd.f32 %v957_v57, %v807_v48 }
 0x5b9   : > { %v1235_v27 = vadd.f32 %v5987_v47, %v1001_v14  ;;  %v1233_v31 = vadd.f32 %v1190_v16, %v999_v26 }
 0x5ba   : > { %v1234_v39 = vadd.f32 %v1191_v42, %v1000_v41 }
 0x5bb   : > { %v2366_v6 = vadd.f32 %v5144_v58, %v1235_v27  ;;  %v2364_v13 = vadd.f32 %v2321_v7, %v1233_v31  ;;  %v767_v58 = vmul.f32 %v4798_v40, %v4700_v15  ;;  %v810_v27 = vmul.f32 %v5085_v2, %v768_v22 }
 0x5bc   : > { %2744 = vrot.lane.b32.xlu2 %v5263_v30, %s3406_s19  ;;  %v2365_v11 = vadd.f32 %v2322_v18, %v1234_v39 }
 0x5bd   : > { %2748 = vrot.lane.b32.xlu1 %v5265_v23, %s3406_s19  ;;  %v5276_v36 = vpop.permute.xlu1 %2298  ;;  %2746 = vrot.lane.b32.xlu0 %v5270_v5, %s3406_s19  ;;  %v2501_v35 = vadd.f32 %v5196_v52, %v2364_v13  ;;  %v2503_v62 = vadd.f32 %v2459_v54, %v2366_v6  ;;  %v769_v52 = vmul.f32 %v4807_v53, %v4700_v15  ;;  %v3380_v6 = vld [vmem:[#allocation2 + $0xb0] sm:$0xff] }
 0x5be   : > { %v2502_v8 = vadd.f32 %v2458_v51, %v2365_v11  ;;  %v809_v18 = vmul.f32 %v5961_v60, %v767_v58  ;;  %v5988_v51 = vld [vmem:[#allocation6_spill] sm:$0xff]  ;;  %v3381_v11 = vld [vmem:[#allocation2 + $0xa8] sm:$0xff]  ;;  %v5991_v58 = vld [vmem:[#allocation47_spill] sm:$0xff] }
 0x5bf   : > { %v5281_v55 = vpop.permute.xlu0 %2427  ;;  %v5283_v28 = vpop.permute.xlu2 %2304  ;;  %v811_v29 = vmul.f32 %v5960_v59, %v769_v52  ;;  %v770_v54 = vmul.f32 %v4847_v20, %v5988_v51  ;;  %v772_v13 = vmul.f32 %v3380_v6, %v5988_v51  ;;  %v5992_v52 = vld [vmem:[#allocation48_spill] sm:$0xff] }
 0x5c1   : > { %v812_v22 = vmul.f32 %v5961_v60, %v770_v54  ;;  %v2323_v54 = vsel %vm2314_vm9, %v5229_v34, %v5152_v12  ;;  %v6000_v34 = vld [vmem:[#allocation28_spill] sm:$0xff] }
 0x5c5   : > { %v5302_v21 = vpop.permute.xlu1 %2429 }
 0x5c7   : > { %v2542_v17 = vpop.permute.xlu0 %2541  ;;  %v5305_v57 = vpop.permute.xlu2 %2435 }
 0x5c8   : > { %v2573_v9 = vadd.f32 %v2542_v17, %v2501_v35  ;;  %v2574_v1 = vadd.f32 %v2542_v17, %v2502_v8  ;;  %v2575_v48 = vadd.f32 %v2542_v17, %v2503_v62  ;;  %v771_v35 = vmul.f32 %v3381_v11, %v5988_v51  ;;  %v5989_v8 = vld [vmem:[#allocation43_spill] sm:$0xff]  ;;  %v5990_v62 = vld [vmem:[#allocation14_spill] sm:$0xff] }
 0x5c9   : > { %v958_v17 = vsel %vm949_vm5, %v5990_v62, %v5989_v8  ;;  %v959_v20 = vsel %vm949_vm5, %v5989_v8, %v5991_v58 }
 0x5ca   : > { %v2597_v26 = vadd.f32 3.0, %v2573_v9  ;;  %v2598_v41 = vadd.f32 3.0, %v2574_v1  ;;  %v2599_v14 = vadd.f32 3.0, %v2575_v48 }
 0x5cc   : > { %v2621_v43 = vmax.f32 %v2597_v26, 0.0  ;;  %v2622_v45 = vmax.f32 %v2598_v41, 0.0  ;;  %v2623_v25 = vmax.f32 %v2599_v14, 0.0 }
 0x5cd   : > { %v5313_v16 = vpop.permute.xlu1 %2302 }
 0x5ce   : > { %v2645_v47 = vmin.f32 %v2621_v43, 6.0  ;;  %v2646_v42 = vmin.f32 %v2622_v45, 6.0  ;;  %v2647_v7 = vmin.f32 %v2623_v25, 6.0  ;;  %v5993_v43 = vld [vmem:[#allocation15_spill] sm:$0xff]  ;;  %v1002_v25 = vadd.f32 %v958_v17, %v809_v18 }
 0x5cf   : > { %v5317_v31 = vpop.permute.xlu0 %2306  ;;  %v5319_v40 = vpop.permute.xlu2 %2308  ;;  %v960_v45 = vsel %vm949_vm5, %v5993_v43, %v5992_v52  ;;  %v5998_v17 = vld [vmem:[#allocation51_spill] sm:$0xff] }
 0x5d0   : > { %v2669_v39 = vmul.f32 0.16666667, %v2645_v47  ;;  %v2670_v15 = vmul.f32 0.16666667, %v2646_v42  ;;  %v2671_v53 = vmul.f32 0.16666667, %v2647_v7  ;;  %v1003_v42 = vadd.f32 %v959_v20, %v810_v27 }
 0x5d1   : > { %v5994_v47 = vld [vmem:[#allocation50_spill] sm:$0xff]  ;;  %v813_v7 = vmul.f32 %v5085_v2, %v771_v35  ;;  %v1005_v51 = vadd.f32 %v960_v45, %v812_v22  ;;  %v2324_v35 = vsel %vm2314_vm9, %v5152_v12, %v5233_v37  ;;  %v2461_v12 = vsel %vm2451_vm10, %v5302_v21, %v5251_v24 }
 0x5d2   : > { %v5329_v26 = vmul.f32 %v2669_v39, %v2573_v9  ;;  %v5331_v41 = vmul.f32 %v2670_v15, %v2574_v1  ;;  %v5333_v14 = vmul.f32 %v2671_v53, %v2575_v48  ;;  %v961_v9 = vsel %vm949_vm5, %v5992_v52, %v5994_v47  ;;  %v5995_v39 = vld [vmem:[#allocation46_spill] sm:$0xff]  ;;  %v5997_v53 = vld [vmem:[#allocation45_spill] sm:$0xff] }
 0x5d3   : > { %v1004_v1 = vadd.f32 %v5991_v58, %v811_v29  ;;  %v814_v48 = vmul.f32 %v5960_v59, %v772_v13  ;;  %v5996_v15 = vld [vmem:[#allocation26_spill] sm:$0xff]  ;;  %v1193_v29 = vsel %vm1183_vm6, %v5995_v39, %v5997_v53  ;;  %v1006_v6 = vadd.f32 %v961_v9, %v813_v7  ;;  %v5999_v58 = vld [vmem:[#allocation49_spill] sm:$0xff] }
 0x5d4   : > { %2750 = vrot.lane.b32.xlu2 %v5329_v26, %s3406_s19  ;;  %2754 = vrot.lane.b32.xlu1 %v5333_v14, %s3406_s19  ;;  %v1192_v27 = vsel %vm1183_vm6, %v5996_v15, %v5995_v39  ;;  %v1195_v20 = vsel %vm1183_vm6, %v5999_v58, %v5998_v17  ;;  %v1237_v22 = vadd.f32 %v1193_v29, %v1003_v42 }
 0x5d5   : > { %2752 = vrot.lane.b32.xlu0 %v5331_v41, %s3406_s19  ;;  %v2434_v18 = vpop.permute.xlu1 %2433  ;;  %v1007_v13 = vadd.f32 %v5994_v47, %v814_v48  ;;  %v1236_v11 = vadd.f32 %v1192_v27, %v1002_v25  ;;  %v1238_v52 = vadd.f32 %v5997_v53, %v1004_v1  ;;  %v1194_v43 = vsel %vm1183_vm6, %v6000_v34, %v5999_v58 }
 0x5d6   : > { %v2460_v25 = vsel %vm2451_vm10, %v5281_v55, %v5302_v21  ;;  %v2368_v47 = vadd.f32 %v2324_v35, %v1237_v22  ;;  %v2325_v42 = vsel %vm2314_vm9, %v5249_v56, %v5276_v36  ;;  %v2326_v1 = vsel %vm2314_vm9, %v5276_v36, %v5235_v38 }
 0x5d7   : > { %v2438_v8 = vpop.permute.xlu0 %2437  ;;  %v5367_v62 = vpop.permute.xlu2 %2439  ;;  %v2367_v45 = vadd.f32 %v2323_v54, %v1236_v11  ;;  %v2369_v9 = vadd.f32 %v5233_v37, %v1238_v52  ;;  %v1240_v48 = vadd.f32 %v1195_v20, %v1006_v6  ;;  %v1241_v7 = vadd.f32 %v5998_v17, %v1007_v13 }
 0x5d8   : > { %v1239_v39 = vadd.f32 %v1194_v43, %v1005_v51  ;;  %v2505_v27 = vadd.f32 %v2460_v25, %v2368_v47  ;;  %v2462_v24 = vsel %vm2451_vm10, %v2434_v18, %v5305_v57  ;;  %v2463_v37 = vsel %vm2451_vm10, %v5305_v57, %v2438_v8 }
 0x5d9   : > { %v2504_v15 = vadd.f32 %v5281_v55, %v2367_v45  ;;  %v2506_v53 = vadd.f32 %v2461_v12, %v2369_v9  ;;  %v2372_v56 = vadd.f32 %v5235_v38, %v1241_v7  ;;  %v2371_v29 = vadd.f32 %v2326_v1, %v1240_v48 }
 0x5da   : > { %v2370_v21 = vadd.f32 %v2325_v42, %v1239_v39 }
 0x5db   : > { %v2508_v51 = vadd.f32 %v2462_v24, %v2371_v29  ;;  %v2509_v35 = vadd.f32 %v2463_v37, %v2372_v56 }
 0x5dc   : > { %v2507_v13 = vadd.f32 %v2434_v18, %v2370_v21 }
 0x5dd   : > { %v2547_v54 = vpop.permute.xlu1 %2546 }
 0x5de   : > { %v2576_v36 = vadd.f32 %v2547_v54, %v2504_v15  ;;  %v2577_v6 = vadd.f32 %v2547_v54, %v2505_v27  ;;  %v2578_v11 = vadd.f32 %v2547_v54, %v2506_v53  ;;  %v6001_v54 = vld [vmem:[#allocation7_spill] sm:$0xff] }
 0x5df   : > { %v5396_v55 = vpop.permute.xlu0 %2310  ;;  %v2552_v17 = vpop.permute.xlu2 %2551 }
 0x5e0   : > { %v2600_v58 = vadd.f32 3.0, %v2576_v36  ;;  %v2601_v20 = vadd.f32 3.0, %v2577_v6  ;;  %v2602_v22 = vadd.f32 3.0, %v2578_v11  ;;  %v2579_v52 = vadd.f32 %v2552_v17, %v2507_v13 }
 0x5e1   : > { %v2580_v34 = vadd.f32 %v2552_v17, %v2508_v51  ;;  %v2581_v57 = vadd.f32 %v2552_v17, %v2509_v35  ;;  %v775_v13 = vmul.f32 %v4923_v46, %v6001_v54  ;;  %v773_v35 = vmul.f32 %v4915_v19, %v6001_v54 }
 0x5e2   : > { %v2624_v8 = vmax.f32 %v2600_v58, 0.0  ;;  %v2625_v38 = vmax.f32 %v2601_v20, 0.0  ;;  %v2626_v43 = vmax.f32 %v2602_v22, 0.0  ;;  %v2603_v45 = vadd.f32 3.0, %v2579_v52 }
 0x5e3   : > { %v2604_v25 = vadd.f32 3.0, %v2580_v34  ;;  %v2605_v12 = vadd.f32 3.0, %v2581_v57  ;;  %v774_v17 = vmul.f32 %v4948_v63, %v6001_v54  ;;  %v776_v46 = vmul.f32 %v5011_v32, %v4702_v0 }
 0x5e4   : > { %v2648_v47 = vmin.f32 %v2624_v8, 6.0  ;;  %v2649_v9 = vmin.f32 %v2625_v38, 6.0  ;;  %v2650_v18 = vmin.f32 %v2626_v43, 6.0  ;;  %v2627_v42 = vmax.f32 %v2603_v45, 0.0  ;;  %v6004_v8 = vld [vmem:[#allocation33_spill] sm:$0xff] }
 0x5e5   : > { %v2628_v1 = vmax.f32 %v2604_v25, 0.0  ;;  %v2629_v48 = vmax.f32 %v2605_v12, 0.0  ;;  %v5398_v7 = vpop.permute.xlu1 %2312  ;;  %v815_v19 = vmul.f32 %v5961_v60, %v773_v35  ;;  %v777_v63 = vmul.f32 %v4976_v44, %v4702_v0  ;;  %v6005_v12 = vld [vmem:[#allocation29_spill] sm:$0xff] }
 0x5e6   : > { %v2672_v39 = vmul.f32 0.16666667, %v2648_v47  ;;  %v2673_v15 = vmul.f32 0.16666667, %v2649_v9  ;;  %v2674_v27 = vmul.f32 0.16666667, %v2650_v18  ;;  %v817_v22 = vmul.f32 %v5960_v59, %v775_v13 }
 0x5e7   : > { %v2651_v53 = vmin.f32 %v2627_v42, 6.0  ;;  %v2442_v24 = vpop.permute.xlu0 %2441  ;;  %v2653_v29 = vmin.f32 %v2629_v48, 6.0  ;;  %v2652_v51 = vmin.f32 %v2628_v1, 6.0  ;;  %v778_v43 = vmul.f32 %v5003_v61, %v4702_v0  ;;  %v6006_v47 = vld [vmem:[#allocation17_spill] sm:$0xff]  ;;  %v6007_v42 = vld [vmem:[#allocation52_spill] sm:$0xff] }
 0x5e8   : > { %v5400_v37 = vmul.f32 %v2672_v39, %v2576_v36  ;;  %v5402_v56 = vmul.f32 %v2673_v15, %v2577_v6  ;;  %v5404_v21 = vmul.f32 %v2674_v27, %v2578_v11  ;;  %v6002_v36 = vld [vmem:[#allocation23_spill] sm:$0xff]  ;;  %v6003_v6 = vld [vmem:[#allocation16_spill] sm:$0xff]  ;;  %v964_v9 = vsel %vm949_vm5, %v6006_v47, %v6005_v12  ;;  %v6008_v1 = vld [vmem:[#allocation53_spill] sm:$0xff] }
 0x5e9   : > { %v962_v11 = vsel %vm949_vm5, %v6003_v6, %v6002_v36  ;;  %v2675_v58 = vmul.f32 0.16666667, %v2651_v53  ;;  %v2677_v20 = vmul.f32 0.16666667, %v2653_v29  ;;  %v963_v38 = vsel %vm949_vm5, %v6002_v36, %v6004_v8  ;;  %v6009_v39 = vld [vmem:[#allocation54_spill] sm:$0xff] }
 0x5ea   : > { %2760 = vrot.lane.b32.xlu1 %v5404_v21, %s3406_s19  ;;  %2756 = vrot.lane.b32.xlu2 %v5400_v37, %s3406_s19  ;;  %v2676_v32 = vmul.f32 0.16666667, %v2652_v51  ;;  %v1008_v25 = vadd.f32 %v962_v11, %v815_v19  ;;  %v816_v44 = vmul.f32 %v5085_v2, %v774_v17  ;;  %v1010_v18 = vadd.f32 %v6004_v8, %v817_v22  ;;  %v6012_v19 = vld [vmem:[#allocation55_spill] sm:$0xff] }
 0x5eb   : > { %2758 = vrot.lane.b32.xlu0 %v5402_v56, %s3406_s19  ;;  %v1196_v48 = vsel %vm1183_vm6, %v6008_v1, %v6007_v42  ;;  %v1197_v15 = vsel %vm1183_vm6, %v6007_v42, %v6009_v39  ;;  %v818_v0 = vmul.f32 %v5961_v60, %v776_v46  ;;  %v819_v53 = vmul.f32 %v5085_v2, %v777_v63  ;;  %v6011_v46 = vld [vmem:[#allocation56_spill] sm:$0xff] }
 0x5ec   : > { %v1009_v27 = vadd.f32 %v963_v38, %v816_v44  ;;  %v5445_v29 = vmul.f32 %v2675_v58, %v2579_v52  ;;  %v5447_v54 = vmul.f32 %v2677_v20, %v2581_v57  ;;  %v820_v13 = vmul.f32 %v5960_v59, %v778_v43 }
 0x5ed   : > { %v2444_v45 = vpop.permute.xlu1 %2443  ;;  %v2327_v51 = vsel %vm2314_vm9, %v5313_v16, %v5283_v28  ;;  %v2328_v35 = vsel %vm2314_vm9, %v5283_v28, %v5317_v31  ;;  %v5456_v17 = vmul.f32 %v2676_v32, %v2580_v34  ;;  %v1242_v60 = vadd.f32 %v1196_v48, %v1008_v25  ;;  %v6010_v28 = vld [vmem:[#allocation39_spill] sm:$0xff]  ;;  %v6013_v32 = vld [vmem:[#allocation57_spill] sm:$0xff] }
 0x5ee   : > { %v1243_v36 = vadd.f32 %v1197_v15, %v1009_v27  ;;  %v1244_v2 = vadd.f32 %v6009_v39, %v1010_v18  ;;  %v1011_v59 = vadd.f32 %v964_v9, %v818_v0  ;;  %v2464_v16 = vsel %vm2451_vm10, %v5367_v62, %v2442_v24 }
 0x5ef   : > { %v2446_v61 = vpop.permute.xlu0 %2445  ;;  %v2465_v52 = vsel %vm2451_vm10, %v2442_v24, %v2444_v45  ;;  %v965_v34 = vsel %vm949_vm5, %v6005_v12, %v6010_v28  ;;  %v2373_v57 = vadd.f32 %v2327_v51, %v1242_v60  ;;  %v1198_v63 = vsel %vm1183_vm6, %v6012_v19, %v6011_v46 }
 0x5f0   : > { %v2374_v6 = vadd.f32 %v2328_v35, %v1243_v36  ;;  %v2375_v11 = vadd.f32 %v5317_v31, %v1244_v2  ;;  %v1012_v58 = vadd.f32 %v965_v34, %v819_v53  ;;  %v1013_v20 = vadd.f32 %v6010_v28, %v820_v13 }
 0x5f1   : > { %v2510_v24 = vadd.f32 %v5367_v62, %v2373_v57  ;;  %v2329_v8 = vsel %vm2314_vm9, %v5319_v40, %v5396_v55  ;;  %v1199_v31 = vsel %vm1183_vm6, %v6011_v46, %v6013_v32  ;;  %v1245_v45 = vadd.f32 %v1198_v63, %v1011_v59  ;;  %v2450_v40 = vpop.permute.xlu2 %2449 }
 0x5f2   : > { %2766 = vrot.lane.b32.xlu1 %v5447_v54, %s3406_s19  ;;  %2762 = vrot.lane.b32.xlu2 %v5445_v29, %s3406_s19  ;;  %v2511_v38 = vadd.f32 %v2464_v16, %v2374_v6  ;;  %v2512_v43 = vadd.f32 %v2465_v52, %v2375_v11  ;;  %v2330_v12 = vsel %vm2314_vm9, %v5396_v55, %v5398_v7 }
 0x5f3   : > { %2764 = vrot.lane.b32.xlu0 %v5456_v17, %s3406_s19  ;;  %v2376_v62 = vadd.f32 %v2329_v8, %v1245_v45  ;;  %v1246_v18 = vadd.f32 %v1199_v31, %v1012_v58  ;;  %v1247_v42 = vadd.f32 %v6013_v32, %v1013_v20 }
 0x5f5   : > { %v2448_v22 = vpop.permute.xlu1 %2447  ;;  %v2377_v27 = vadd.f32 %v2330_v12, %v1246_v18  ;;  %v2378_v53 = vadd.f32 %v5398_v7, %v1247_v42  ;;  %v2513_v13 = vadd.f32 %v2446_v61, %v2376_v62 }
 0x5f6   : > { %v2466_v1 = vsel %vm2451_vm10, %v2446_v61, %v2448_v22  ;;  %v2467_v48 = vsel %vm2451_vm10, %v2448_v22, %v2450_v40 }
 0x5f7   : > { %v2557_v25 = vpop.permute.xlu0 %2556  ;;  %v2514_v60 = vadd.f32 %v2466_v1, %v2377_v27  ;;  %v2515_v36 = vadd.f32 %v2467_v48, %v2378_v53 }
 0x5f8   : > { %v2582_v47 = vadd.f32 %v2557_v25, %v2510_v24  ;;  %v2583_v9 = vadd.f32 %v2557_v25, %v2511_v38  ;;  %v2584_v44 = vadd.f32 %v2557_v25, %v2512_v43 }
 0x5fa   : > { %v2606_v39 = vadd.f32 3.0, %v2582_v47  ;;  %v2607_v15 = vadd.f32 3.0, %v2583_v9  ;;  %v2608_v0 = vadd.f32 3.0, %v2584_v44 }
 0x5fc   : > { %v2630_v55 = vmax.f32 %v2606_v39, 0.0  ;;  %v2631_v51 = vmax.f32 %v2607_v15, 0.0  ;;  %v2632_v35 = vmax.f32 %v2608_v0, 0.0 }
 0x5fd   : > { %v2562_v2 = vpop.permute.xlu1 %2561 }
 0x5fe   : > { %v2654_v59 = vmin.f32 %v2630_v55, 6.0  ;;  %v2655_v16 = vmin.f32 %v2631_v51, 6.0  ;;  %v2656_v52 = vmin.f32 %v2632_v35, 6.0  ;;  %v2585_v28 = vadd.f32 %v2562_v2, %v2513_v13 }
 0x5ff   : > { %v2586_v34 = vadd.f32 %v2562_v2, %v2514_v60  ;;  %v2587_v57 = vadd.f32 %v2562_v2, %v2515_v36 }
 0x600   : > { %v2678_v6 = vmul.f32 0.16666667, %v2654_v59  ;;  %v2679_v11 = vmul.f32 0.16666667, %v2655_v16  ;;  %v2680_v46 = vmul.f32 0.16666667, %v2656_v52 }
 0x601   : > { %v2609_v19 = vadd.f32 3.0, %v2585_v28  ;;  %v2610_v63 = vadd.f32 3.0, %v2586_v34  ;;  %v2611_v58 = vadd.f32 3.0, %v2587_v57 }
 0x602   : > { %v5490_v7 = vmul.f32 %v2678_v6, %v2582_v47  ;;  %v5492_v61 = vmul.f32 %v2679_v11, %v2583_v9  ;;  %v5494_v20 = vmul.f32 %v2680_v46, %v2584_v44  ;;  %v2733_v44 = vpop.permute.xlu2 %2732 }
 0x603   : > { %v2633_v22 = vmax.f32 %v2609_v19, 0.0  ;;  %v2634_v24 = vmax.f32 %v2610_v63, 0.0  ;;  %v2635_v8 = vmax.f32 %v2611_v58, 0.0 }
 0x604   : > { %2768 = vrot.lane.b32.xlu2 %v5490_v7, %s3406_s19  ;;  %2772 = vrot.lane.b32.xlu1 %v5494_v20, %s3406_s19 }
 0x605   : > { %v2657_v38 = vmin.f32 %v2633_v22, 6.0  ;;  %v2658_v43 = vmin.f32 %v2634_v24, 6.0  ;;  %v2659_v32 = vmin.f32 %v2635_v8, 6.0  ;;  %2770 = vrot.lane.b32.xlu0 %v5492_v61, %s3406_s19 }
 0x607   : > { %v2681_v31 = vmul.f32 0.16666667, %v2657_v38  ;;  %v2682_v45 = vmul.f32 0.16666667, %v2658_v43  ;;  %v2683_v25 = vmul.f32 0.16666667, %v2659_v32 }
 0x609   : > { %v5502_v12 = vmul.f32 %v2681_v31, %v2585_v28  ;;  %v5504_v47 = vmul.f32 %v2683_v25, %v2587_v57  ;;  %v5506_v9 = vmul.f32 %v2682_v45, %v2586_v34 }
 0x60c   : > { %2778 = vrot.lane.b32.xlu1 %v5504_v47, %s3406_s19  ;;  %2774 = vrot.lane.b32.xlu2 %v5502_v12, %s3406_s19 }
 0x60d   : > { %2776 = vrot.lane.b32.xlu0 %v5506_v9, %s3406_s19 }
 0x60e   : > { %v2737_v62 = vpop.permute.xlu1 %2736  ;;  %v2739_v42 = vpop.permute.xlu2 %2738 }
 0x60f   : > { %v2735_v18 = vpop.permute.xlu0 %2734 }
 0x610   : > { %v2780_v39 = vsel %vm657_vm3, %v2733_v44, %v2735_v18  ;;  %v2781_v15 = vsel %vm657_vm3, %v2735_v18, %v2737_v62 }
 0x611   : > { %v2812_v35 = vadd.f32 %v2781_v15, %v2780_v39  ;;  %v3409_v15 = vmov 256.0  }
 0x612   : > { %3335 = vrcp.f32 %v3409_v15 }
 0x616   : > { %v2745_v0 = vpop.permute.xlu2 %2744 }
 0x627   : > { %v2743_v40 = vpop.permute.xlu1 %2742  ;;  %v2741_v1 = vpop.permute.xlu0 %2740 }
 0x628   : > { %v2782_v55 = vsel %vm657_vm3, %v2739_v42, %v2741_v1  ;;  %v2783_v51 = vsel %vm657_vm3, %v2741_v1, %v2743_v40 }
 0x629   : > { %v2815_v36 = vadd.f32 %v2783_v51, %v2782_v55 }
 0x62e   : > { %v2751_v59 = vpop.permute.xlu2 %2750 }
 0x62f   : > { %v2749_v48 = vpop.permute.xlu1 %2748  ;;  %v2747_v27 = vpop.permute.xlu0 %2746 }
 0x630   : > { %v2784_v53 = vsel %vm657_vm3, %v2745_v0, %v2747_v27  ;;  %v2785_v13 = vsel %vm657_vm3, %v2747_v27, %v2749_v48  ;;  %v3336_v0 = vpop.eup %3335 }
 0x631   : > { %v2818_v60 = vadd.f32 %v2785_v13, %v2784_v53  ;;  %v2837_v27 = vmul.f32 256.0, %v3336_v0  ;;  %vm2841_vm11 = vweird.f32 %v3336_v0 }
 0x633   : > { %v2838_v53 = vsub.f32 1.0, %v2837_v27 }
 0x635   : > { %2813 = vadd.xlane.f32.xlu2 %v2812_v35  ;;  %v2839_v13 = vmul.f32 %v3336_v0, %v2838_v53 }
 0x636   : > { %2819 = vadd.xlane.f32.xlu1 %v2818_v60 }
 0x637   : > { %2816 = vadd.xlane.f32.xlu0 %v2815_v36  ;;  %v2840_v51 = vadd.f32 %v3336_v0, %v2839_v13 }
 0x639   : > { %v2842_v35 = vsel %vm2841_vm11, %v3336_v0, %v2840_v51 }
 0x644   : > { %v2757_v57 = vpop.permute.xlu2 %2756 }
 0x646   : > { %v2755_v2 = vpop.permute.xlu1 %2754 }
 0x647   : > { %v2753_v16 = vpop.permute.xlu0 %2752 }
 0x648   : > { %v2786_v52 = vsel %vm657_vm3, %v2751_v59, %v2753_v16  ;;  %v2787_v28 = vsel %vm657_vm3, %v2753_v16, %v2755_v2  ;;  %v2851_v16 = vld [vmem:[%s5692_s6] sm:$0xff] }
 0x649   : > { %v2821_v34 = vadd.f32 %v2787_v28, %v2786_v52  ;;  %v2852_v52 = vld [vmem:[%s5692_s6 + $0x8] sm:$0xff] }
 0x64b   : > { %2822 = vadd.xlane.f32.xlu2 %v2821_v34 }
 0x64c   : > { %v2763_v22 = vpop.permute.xlu2 %2762 }
 0x65c   : > { %v2761_v6 = vpop.permute.xlu1 %2760 }
 0x65d   : > { %v2759_v11 = vpop.permute.xlu0 %2758 }
 0x65e   : > { %v2788_v46 = vsel %vm657_vm3, %v2757_v57, %v2759_v11  ;;  %v2789_v19 = vsel %vm657_vm3, %v2759_v11, %v2761_v6  ;;  %v2769_v32 = vpop.permute.xlu2 %2768 }
 0x65f   : > { %v2824_v63 = vadd.f32 %v2789_v19, %v2788_v46  ;;  %v2853_v19 = vld [vmem:[%s5692_s6 + $0x10] sm:$0xff] }
 0x661   : > { %2825 = vadd.xlane.f32.xlu2 %v2824_v63  ;;  %v2854_v63 = vld [vmem:[%s5692_s6 + $0x18] sm:$0xff] }
 0x664   : > { %v2767_v58 = vpop.permute.xlu1 %2766 }
 0x665   : > { %v2765_v24 = vpop.permute.xlu0 %2764 }
 0x666   : > { %v2790_v8 = vsel %vm657_vm3, %v2763_v22, %v2765_v24  ;;  %v2791_v38 = vsel %vm657_vm3, %v2765_v24, %v2767_v58  ;;  %v2775_v42 = vpop.permute.xlu2 %2774 }
 0x667   : > { %v2827_v43 = vadd.f32 %v2791_v38, %v2790_v8  ;;  %v2855_v38 = vld [vmem:[%s5692_s6 + $0x20] sm:$0xff] }
 0x669   : > { %2828 = vadd.xlane.f32.xlu0 %v2827_v43 }
 0x676   : > { %v2773_v31 = vpop.permute.xlu1 %2772 }
 0x677   : > { %v2771_v45 = vpop.permute.xlu0 %2770 }
 0x678   : > { %v2792_v25 = vsel %vm657_vm3, %v2769_v32, %v2771_v45  ;;  %v2793_v44 = vsel %vm657_vm3, %v2771_v45, %v2773_v31 }
 0x679   : > { %v2830_v62 = vadd.f32 %v2793_v44, %v2792_v25  ;;  %v2856_v25 = vld [vmem:[%s5692_s6 + $0x28] sm:$0xff] }
 0x67b   : > { %2831 = vadd.xlane.f32.xlu1 %v2830_v62 }
 0x67e   : > { %v2779_v18 = vpop.permute.xlu1 %2778 }
 0x67f   : > { %v2777_v40 = vpop.permute.xlu0 %2776 }
 0x680   : > { %v2794_v1 = vsel %vm657_vm3, %v2775_v42, %v2777_v40  ;;  %v2795_v48 = vsel %vm657_vm3, %v2777_v40, %v2779_v18  ;;  %v2857_v42 = vld [vmem:[%s5692_s6 + $0x30] sm:$0xff] }
 0x681   : > { %v2833_v39 = vadd.f32 %v2795_v48, %v2794_v1 }
 0x683   : > { %2834 = vadd.xlane.f32.xlu2 %v2833_v39 }
 0x6a8   : > { %v2814_v55 = vpop.xlane.xlu2 %2813 }
 0x6a9   : > { %v2843_v2 = vmul.f32 %v2842_v35, %v2814_v55  ;;  %v2820_v28 = vpop.xlane.xlu1 %2819  ;;  %v2858_v55 = vld [vmem:[%s5692_s6 + $0x38] sm:$0xff] }
 0x6aa   : > { %v2817_v60 = vpop.xlane.xlu0 %2816  ;;  %v2845_v11 = vmul.f32 %v2842_v35, %v2820_v28 }
 0x6ab   : > { %v2844_v59 = vmul.f32 %v2842_v35, %v2817_v60  ;;  %v2859_v34 = vmul.f32 %v2851_v16, %v2843_v2 }
 0x6ac   : > { %v2861_v43 = vmul.f32 %v2853_v19, %v2845_v11  ;;  %v2888_v19 = vld [vmem:[%s5693_s7] sm:$0x1] }
 0x6ad   : > { %v2860_v57 = vmul.f32 %v2852_v52, %v2844_v59  ;;  %v2867_v22 = vsel %vm497_vm0, %v2859_v34, 0.0 }
 0x6ae   : > { %v2870_v40 = vsel %vm497_vm0, %v2861_v43, 0.0 }
 0x6af   : > { %v2868_v24 = vsel %vm497_vm0, %v2860_v57, 0.0 }
 0x6b0   : > { %v2869_v45 = vadd.f32 %v2868_v24, %v2867_v22  ;;  %v2897_v24 = vld [vmem:[%s5694_s8 + $0x30] sm:$0xff] }
 0x6b2   : > { %v2871_v39 = vadd.f32 %v2870_v40, %v2869_v45 }
 0x6be   : > { %v2823_v36 = vpop.xlane.xlu2 %2822 }
 0x6bf   : > { %v2846_v46 = vmul.f32 %v2842_v35, %v2823_v36 }
 0x6c1   : > { %v2862_v32 = vmul.f32 %v2854_v63, %v2846_v46 }
 0x6c3   : > { %v2872_v1 = vsel %vm497_vm0, %v2862_v32, 0.0 }
 0x6c4   : > { %v2873_v27 = vadd.f32 %v2872_v1, %v2871_v39 }
 0x6d4   : > { %v2826_v6 = vpop.xlane.xlu2 %2825 }
 0x6d5   : > { %v2847_v8 = vmul.f32 %v2842_v35, %v2826_v6 }
 0x6d7   : > { %v2863_v62 = vmul.f32 %v2855_v38, %v2847_v8  ;;  %v2895_v8 = vld [vmem:[%s5694_s8 + $0x20] sm:$0xff] }
 0x6d9   : > { %v2874_v15 = vsel %vm497_vm0, %v2863_v62, 0.0  ;;  %v2896_v62 = vld [vmem:[%s5694_s8 + $0x28] sm:$0xff] }
 0x6da   : > { %v2875_v13 = vadd.f32 %v2874_v15, %v2873_v27  ;;  %v2892_v27 = vld [vmem:[%s5694_s8 + $0x8] sm:$0xff] }
 0x6dc   : > { %v2829_v58 = vpop.xlane.xlu0 %2828 }
 0x6dd   : > { %v2848_v31 = vmul.f32 %v2842_v35, %v2829_v58 }
 0x6df   : > { %v2864_v48 = vmul.f32 %v2856_v25, %v2848_v31 }
 0x6e1   : > { %v2876_v53 = vsel %vm497_vm0, %v2864_v48, 0.0 }
 0x6e2   : > { %v2877_v2 = vadd.f32 %v2876_v53, %v2875_v13  ;;  %v2891_v53 = vld [vmem:[%s5694_s8] sm:$0xff] }
 0x6ee   : > { %v2832_v44 = vpop.xlane.xlu1 %2831 }
 0x6ef   : > { %v2849_v18 = vmul.f32 %v2842_v35, %v2832_v44 }
 0x6f1   : > { %v2865_v0 = vmul.f32 %v2857_v42, %v2849_v18  ;;  %v2893_v18 = vld [vmem:[%s5694_s8 + $0x10] sm:$0xff]  ;;  %v2894_v42 = vld [vmem:[%s5694_s8 + $0x18] sm:$0xff] }
 0x6f3   : > { %v2878_v60 = vsel %vm497_vm0, %v2865_v0, 0.0 }
 0x6f4   : > { %v2879_v16 = vadd.f32 %v2878_v60, %v2877_v2  ;;  %v2938_v2 = vld [vmem:[%s5695_s9 + $0x30] sm:$0xff] }
 0x6f6   : > { %v2835_v51 = vpop.xlane.xlu2 %2834 }
 0x6f7   : > { %v2850_v36 = vmul.f32 %v2842_v35, %v2835_v51  ;;  %v2898_v35 = vld [vmem:[%s5694_s8 + $0x38] sm:$0xff] }
 0x6f9   : > { %v2866_v59 = vmul.f32 %v2858_v55, %v2850_v36  ;;  %v2939_v36 = vld [vmem:[%s5695_s9 + $0x38] sm:$0xff] }
 0x6fb   : > { %v2880_v52 = vsel %vm497_vm0, %v2866_v59, 0.0  ;;  %v2936_v59 = vld [vmem:[%s5695_s9 + $0x20] sm:$0xff] }
 0x6fc   : > { %v2881_v28 = vadd.f32 %v2880_v52, %v2879_v16 }
 0x6fe   : > { %v2882_v34 = vrot.slane %v2881_v28, 4 }
 0x700   : > { %v2883_v57 = vadd.f32 %v2882_v34, %v2881_v28 }
 0x702   : > { %v2884_v6 = vrot.slane %v2883_v57, 2 }
 0x704   : > { %v2885_v11 = vadd.f32 %v2884_v6, %v2883_v57 }
 0x706   : > { %v2886_v46 = vrot.slane %v2885_v11, 1 }
 0x708   : > { %v2887_v63 = vadd.f32 %v2886_v46, %v2885_v11 }
 0x70a   : > { %v2889_v58 = vadd.f32 %v2888_v19, %v2887_v63 }
 0x70c   : > { %v2890_v22 = vmax.f32 %v2889_v58, 0.0 }
 0x70e   : > { %v2899_v38 = vperm.slane %v2890_v22, 0 }
 0x710   : > { %v2907_v43 = vmul.f32 %v2899_v38, %v2898_v35  ;;  %v2906_v32 = vmul.f32 %v2899_v38, %v2897_v24  ;;  %v2904_v31 = vmul.f32 %v2899_v38, %v2895_v8  ;;  %v2905_v40 = vmul.f32 %v2899_v38, %v2896_v62  ;;  %v2937_v35 = vld [vmem:[%s5695_s9 + $0x28] sm:$0xff]  ;;  %v2934_v24 = vld [vmem:[%s5695_s9 + $0x10] sm:$0xff] }
 0x711   : > { %v2902_v1 = vmul.f32 %v2899_v38, %v2893_v18  ;;  %v2903_v48 = vmul.f32 %v2899_v38, %v2894_v42  ;;  %v2901_v13 = vmul.f32 %v2899_v38, %v2892_v27  ;;  %v2900_v55 = vmul.f32 %v2899_v38, %v2891_v53 }
 0x712   : > { %v2929_v45 = vsel %vm497_vm0, %v2907_v43, 0.0  ;;  %v2926_v25 = vsel %vm497_vm0, %v2906_v32, 0.0  ;;  %v2920_v44 = vsel %vm497_vm0, %v2904_v31, 0.0  ;;  %v2923_v39 = vsel %vm497_vm0, %v2905_v40, 0.0  ;;  %v2935_v43 = vld [vmem:[%s5695_s9 + $0x18] sm:$0xff] }
 0x713   : > { %2930 = vadd.xlane.f32.xlu1 %v2929_v45  ;;  %2927 = vadd.xlane.f32.xlu0 %v2926_v25  ;;  %v2914_v15 = vsel %vm497_vm0, %v2902_v1, 0.0  ;;  %v2917_v0 = vsel %vm497_vm0, %v2903_v48, 0.0  ;;  %v2911_v51 = vsel %vm497_vm0, %v2901_v13, 0.0  ;;  %v2908_v60 = vsel %vm497_vm0, %v2900_v55, 0.0  ;;  %v2933_v13 = vld [vmem:[%s5695_s9 + $0x8] sm:$0xff]  ;;  %v2932_v55 = vld [vmem:[%s5695_s9] sm:$0xff] }
 0x714   : > { %2921 = vadd.xlane.f32.xlu2 %v2920_v44 }
 0x71b   : > { %2924 = vadd.xlane.f32.xlu0 %v2923_v39  ;;  %2915 = vadd.xlane.f32.xlu1 %v2914_v15 }
 0x71c   : > { %2918 = vadd.xlane.f32.xlu2 %v2917_v0 }
 0x723   : > { %2912 = vadd.xlane.f32.xlu1 %v2911_v51  ;;  %2909 = vadd.xlane.f32.xlu0 %v2908_v60 }
 0x786   : > { %v2931_v16 = vpop.xlane.xlu1 %2930  ;;  %v2928_v52 = vpop.xlane.xlu0 %2927 }
 0x787   : > { %v2947_v28 = vadd.f32 %v2939_v36, %v2931_v16  ;;  %v2946_v34 = vadd.f32 %v2938_v2, %v2928_v52  ;;  %v2922_v57 = vpop.xlane.xlu2 %2921 }
 0x788   : > { %v2944_v6 = vadd.f32 %v2936_v59, %v2922_v57 }
 0x789   : > { %v2955_v11 = vadd.f32 3.0, %v2947_v28  ;;  %v2954_v46 = vadd.f32 3.0, %v2946_v34 }
 0x78a   : > { %v2952_v19 = vadd.f32 3.0, %v2944_v6 }
 0x78b   : > { %v2963_v63 = vmax.f32 %v2955_v11, 0.0  ;;  %v2962_v58 = vmax.f32 %v2954_v46, 0.0 }
 0x78c   : > { %v2960_v22 = vmax.f32 %v2952_v19, 0.0 }
 0x78d   : > { %v2971_v8 = vmin.f32 %v2963_v63, 6.0  ;;  %v2970_v38 = vmin.f32 %v2962_v58, 6.0 }
 0x78e   : > { %v2968_v32 = vmin.f32 %v2960_v22, 6.0  ;;  %v2925_v31 = vpop.xlane.xlu0 %2924  ;;  %v2916_v45 = vpop.xlane.xlu1 %2915 }
 0x78f   : > { %v2979_v25 = vmul.f32 0.16666667, %v2971_v8  ;;  %v2978_v44 = vmul.f32 0.16666667, %v2970_v38  ;;  %v2945_v62 = vadd.f32 %v2937_v35, %v2925_v31  ;;  %v2919_v18 = vpop.xlane.xlu2 %2918  ;;  %v2942_v42 = vadd.f32 %v2934_v24, %v2916_v45 }
 0x790   : > { %v2976_v40 = vmul.f32 0.16666667, %v2968_v32  ;;  %v2943_v1 = vadd.f32 %v2935_v43, %v2919_v18 }
 0x791   : > { %v2953_v48 = vadd.f32 3.0, %v2945_v62  ;;  %v2950_v39 = vadd.f32 3.0, %v2942_v42  ;;  %3012 = vperm.xlu2 %3333, %v2978_v44   ;;  %3017 = vperm.xlu0 %3332, %v2979_v25  }
 0x792   : > { %v2951_v15 = vadd.f32 3.0, %v2943_v1  ;;  %3002 = vperm.xlu1 %3334, %v2976_v40  }
 0x793   : > { %v2961_v0 = vmax.f32 %v2953_v48, 0.0  ;;  %v2958_v27 = vmax.f32 %v2950_v39, 0.0 }
 0x794   : > { %v2959_v53 = vmax.f32 %v2951_v15, 0.0 }
 0x795   : > { %v2969_v51 = vmin.f32 %v2961_v0, 6.0  ;;  %v2966_v60 = vmin.f32 %v2958_v27, 6.0 }
 0x796   : > { %v2967_v36 = vmin.f32 %v2959_v53, 6.0  ;;  %v2913_v2 = vpop.xlane.xlu1 %2912  ;;  %v2910_v59 = vpop.xlane.xlu0 %2909 }
 0x797   : > { %v2977_v16 = vmul.f32 0.16666667, %v2969_v51  ;;  %v2974_v52 = vmul.f32 0.16666667, %v2966_v60  ;;  %v2941_v28 = vadd.f32 %v2933_v13, %v2913_v2  ;;  %v2940_v34 = vadd.f32 %v2932_v55, %v2910_v59 }
 0x798   : > { %v2975_v57 = vmul.f32 0.16666667, %v2967_v36 }
 0x799   : > { %v2949_v6 = vadd.f32 3.0, %v2941_v28  ;;  %v2948_v11 = vadd.f32 3.0, %v2940_v34  ;;  %2992 = vperm.xlu2 %3333, %v2974_v52   ;;  %3007 = vperm.xlu0 %3332, %v2977_v16  }
 0x79a   : > { %2997 = vperm.xlu1 %3334, %v2975_v57  }
 0x79b   : > { %v2957_v46 = vmax.f32 %v2949_v6, 0.0  ;;  %v2956_v19 = vmax.f32 %v2948_v11, 0.0 }
 0x79d   : > { %v2965_v63 = vmin.f32 %v2957_v46, 6.0  ;;  %v2964_v58 = vmin.f32 %v2956_v19, 6.0 }
 0x79f   : > { %v2973_v22 = vmul.f32 0.16666667, %v2965_v63  ;;  %v2972_v35 = vmul.f32 0.16666667, %v2964_v58 }
 0x7a1   : > { %2987 = vperm.xlu2 %3333, %v2973_v22   ;;  %2982 = vperm.xlu0 %3332, %v2972_v35  }
 0x7eb   : > { %v3013_v24 = vpop.permute.xlu2 %3012 }
 0x7ec   : > { %v3038_v8 = vmul.f32 %v3013_v24, %v5490_v7  ;;  %v3039_v38 = vmul.f32 %v3013_v24, %v5492_v61  ;;  %v3040_v32 = vmul.f32 %v3013_v24, %v5494_v20 }
 0x7f3   : > { %v2993_v15 = vpop.permute.xlu2 %2992 }
 0x7fb   : > { %v2988_v51 = vpop.permute.xlu2 %2987 }
 0x803   : > { %v3018_v43 = vpop.permute.xlu0 %3017 }
 0x804   : > { %v3041_v31 = vmul.f32 %v3018_v43, %v5502_v12  ;;  %v3042_v45 = vmul.f32 %v3018_v43, %v5506_v9  ;;  %v3043_v25 = vmul.f32 %v3018_v43, %v5504_v47  ;;  %v3003_v44 = vpop.permute.xlu1 %3002 }
 0x805   : > { %v3032_v7 = vmul.f32 %v3003_v44, %v5400_v37  ;;  %v3033_v61 = vmul.f32 %v3003_v44, %v5402_v56  ;;  %v3034_v12 = vmul.f32 %v3003_v44, %v5404_v21 }
 0x806   : > { %v3055_v62 = vpack.c.bf16 %v3041_v31, %v3038_v8  ;;  %v3056_v18 = vpack.c.bf16 %v3042_v45, %v3039_v38  ;;  %v3057_v42 = vpack.c.bf16 %v3043_v25, %v3040_v32  ;;  %v3274_v8 = vld [vmem:[%s5696_s10] sm:$0xff]  ;;  %v3161_v31 = vld [vmem:[%s3503_s14 + $0x8] sm:$0xff] }
 0x807   : > { %v3160_v25 = vld [vmem:[%s3503_s14] sm:$0xff] }
 0x808   : > { %3109 = vrot.lane.b32.xlu2 %v3057_v42, %s3406_s19  ;;  %3107 = vrot.lane.b32.xlu0 %v3056_v18, %s3406_s19 }
 0x809   : > { %3105 = vrot.lane.b32.xlu1 %v3055_v62, %s3406_s19 }
 0x80b   : > { %v3008_v20 = vpop.permute.xlu0 %3007 }
 0x80c   : > { %v3035_v9 = vmul.f32 %v3008_v20, %v5445_v29  ;;  %v3036_v47 = vmul.f32 %v3008_v20, %v5456_v17  ;;  %v3037_v40 = vmul.f32 %v3008_v20, %v5447_v54  ;;  %v2998_v0 = vpop.permute.xlu1 %2997  ;;  %v3027_v29 = vmul.f32 %v2993_v15, %v5270_v5  ;;  %v3163_v20 = vld [vmem:[%s3503_s14 + $0x18] sm:$0xff] }
 0x80d   : > { %v3030_v37 = vmul.f32 %v2998_v0, %v5331_v41  ;;  %v3031_v56 = vmul.f32 %v2998_v0, %v5333_v14  ;;  %v3029_v21 = vmul.f32 %v2998_v0, %v5329_v26  ;;  %v3028_v54 = vmul.f32 %v2993_v15, %v5265_v23 }
 0x80e   : > { %v3052_v1 = vpack.c.bf16 %v3035_v9, %v3032_v7  ;;  %v3053_v48 = vpack.c.bf16 %v3036_v47, %v3033_v61  ;;  %v3054_v39 = vpack.c.bf16 %v3037_v40, %v3034_v12  ;;  %v3026_v17 = vmul.f32 %v2993_v15, %v5263_v30  ;;  %v3162_v9 = vld [vmem:[%s3503_s14 + $0x10] sm:$0xff] }
 0x80f   : > { %v3050_v27 = vpack.c.bf16 %v3030_v37, %v3027_v29  ;;  %v3051_v53 = vpack.c.bf16 %v3031_v56, %v3028_v54  ;;  %v3024_v23 = vmul.f32 %v2988_v51, %v5239_v3  ;;  %v3025_v30 = vmul.f32 %v2988_v51, %v5241_v4 }
 0x810   : > { %3103 = vrot.lane.b32.xlu2 %v3054_v39, %s3406_s19  ;;  %3101 = vrot.lane.b32.xlu0 %v3053_v48, %s3406_s19  ;;  %v3049_v13 = vpack.c.bf16 %v3029_v21, %v3026_v17  ;;  %v3023_v14 = vmul.f32 %v2988_v51, %v5237_v10 }
 0x811   : > { %3099 = vrot.lane.b32.xlu1 %v3052_v1, %s3406_s19 }
 0x813   : > { %v2983_v55 = vpop.permute.xlu0 %2982 }
 0x814   : > { %v3021_v41 = vmul.f32 %v2983_v55, %v5167_v50  ;;  %v3022_v26 = vmul.f32 %v2983_v55, %v5169_v33  ;;  %v3020_v5 = vmul.f32 %v2983_v55, %v5165_v49  ;;  %v3059_v50 = vld [vmem:[%s5697_s11 + $0x8] sm:$0xff]  ;;  %v3058_v49 = vld [vmem:[%s5697_s11] sm:$0xff] }
 0x816   : > { %v3047_v60 = vpack.c.bf16 %v3024_v23, %v3021_v41  ;;  %v3048_v36 = vpack.c.bf16 %v3025_v30, %v3022_v26  ;;  %v3046_v2 = vpack.c.bf16 %v3023_v14, %v3020_v5 }
 0x818   : > { %3097 = vrot.lane.b32.xlu2 %v3051_v53, %s3406_s19  ;;  %3095 = vrot.lane.b32.xlu0 %v3050_v27, %s3406_s19 }
 0x819   : > { %3093 = vrot.lane.b32.xlu1 %v3049_v13, %s3406_s19 }
 0x820   : > { %3091 = vrot.lane.b32.xlu2 %v3048_v36, %s3406_s19  ;;  %3089 = vrot.lane.b32.xlu0 %v3047_v60, %s3406_s19 }
 0x821   : > { %3087 = vrot.lane.b32.xlu1 %v3046_v2, %s3406_s19 }
 0x828   : > { %3067 = vperm.xlu0 %3332, %v3059_v50  }
 0x829   : > { %3062 = vperm.xlu1 %3334, %v3058_v49  }
 0x862   : > { %v3110_v33 = vpop.permute.xlu2 %3109 }
 0x86a   : > { %v3104_v16 = vpop.permute.xlu2 %3103 }
 0x872   : > { %v3098_v6 = vpop.permute.xlu2 %3097 }
 0x87a   : > { %v3108_v10 = vpop.permute.xlu0 %3107  ;;  %v3092_v58 = vpop.permute.xlu2 %3091 }
 0x87b   : > { %v3106_v3 = vpop.permute.xlu1 %3105  ;;  %v3119_v4 = vsel %vm657_vm3, %v3108_v10, %v3110_v33 }
 0x87c   : > { %v3118_v59 = vsel %vm657_vm3, %v3106_v3, %v3108_v10  ;;  %3150 = vmatpush.bf16.msrb.mxu3 %v3119_v4 }
 0x87d   : > { %3136 = vmatpush.bf16.msrb.mxu2 %v3118_v59 }
 0x882   : > { %v3102_v52 = vpop.permute.xlu0 %3101 }
 0x883   : > { %v3100_v28 = vpop.permute.xlu1 %3099  ;;  %v3117_v34 = vsel %vm657_vm3, %v3102_v52, %v3104_v16 }
 0x884   : > { %v3116_v57 = vsel %vm657_vm3, %v3100_v28, %v3102_v52  ;;  %3151 = vmatpush.bf16.msrb.mxu3 %v3117_v34 }
 0x885   : > { %3137 = vmatpush.bf16.msrb.mxu2 %v3116_v57 }
 0x88a   : > { %v3096_v11 = vpop.permute.xlu0 %3095 }
 0x88b   : > { %v3094_v46 = vpop.permute.xlu1 %3093  ;;  %v3115_v19 = vsel %vm657_vm3, %v3096_v11, %v3098_v6 }
 0x88c   : > { %v3114_v63 = vsel %vm657_vm3, %v3094_v46, %v3096_v11  ;;  %3152 = vmatpush.bf16.msrb.mxu3 %v3115_v19 }
 0x88d   : > { %3138 = vmatpush.bf16.msrb.mxu2 %v3114_v63 }
 0x892   : > { %v3090_v22 = vpop.permute.xlu0 %3089 }
 0x893   : > { %v3088_v35 = vpop.permute.xlu1 %3087  ;;  %v3113_v24 = vsel %vm657_vm3, %v3090_v22, %v3092_v58 }
 0x894   : > { %v3112_v38 = vsel %vm657_vm3, %v3088_v35, %v3090_v22  ;;  %3153 = vmatpush.bf16.msrb.mxu3 %v3113_v24 }
 0x895   : > { %3139 = vmatpush.bf16.msrb.mxu2 %v3112_v38 }
 0x897   : > { %3265 = vmatmul.msk.bf16.vlgmr.msrb.gmra.mxu3 %vm3128_vm12, %v3274_v8 }
 0x898   : > { %3264 = vmatmul.msk.bf16.vlgmr.msrb.gmra.mxu2 %vm3128_vm12, %v3274_v8 }
 0x89a   : > { %v3068_v7 = vpop.permute.xlu0 %3067 }
 0x89b   : > { %v3063_v43 = vpop.permute.xlu1 %3062 }
 0x91a   : > { %v3155_v32 = vpop.f32.mrf.mxu3 }
 0x91b   : > { %v3141_v45 = vpop.f32.mrf.mxu2  ;;  %v3156_v44 = vadd.f32 %v3155_v32, %v3063_v43 }
 0x91c   : > { %v3142_v62 = vadd.f32 %v3141_v45, %v3063_v43 }
 0x91d   : > { %v3165_v18 = vadd.f32 %v3161_v31, %v3156_v44 }
 0x91e   : > { %v3164_v42 = vadd.f32 %v3160_v25, %v3142_v62 }
 0x91f   : > { %3169 = vst [vmem:[%s413_s16 + $0x8] sm:$0xff] %v3165_v18 }
 0x920   : > { %3168 = vst [vmem:[%s413_s16] sm:$0xff] %v3164_v42 }
 0x922   : > { %v3157_v61 = vpop.f32.mrf.mxu3 }
 0x923   : > { %v3143_v12 = vpop.f32.mrf.mxu2  ;;  %v3158_v47 = vadd.f32 %v3157_v61, %v3068_v7 }
 0x924   : > { %v3144_v40 = vadd.f32 %v3143_v12, %v3068_v7 }
 0x925   : > { %v3167_v1 = vadd.f32 %v3163_v20, %v3158_v47 }
 0x926   : > { %v3166_v48 = vadd.f32 %v3162_v9, %v3144_v40 }
 0x927   : > { %3171 = vst [vmem:[%s413_s16 + $0x18] sm:$0xff] %v3167_v1 }
 0x928   : > { %3170 = vst [vmem:[%s413_s16 + $0x10] sm:$0xff] %v3166_v48 }
 0x929 PF: > { %s22_s21 = sadd.s32 1, %s3388_s21  }
 0x92a   : > { %p19_p4 = scmp.ge.s32.totalorder %s22_s21, 6  }
 0x92c   :  { %21 = sbr.rel (!%p19_p4) target bundleno = 1 (0x1), region = 98 }

</bundles_post_ra>
